<compile_context>
chip_gen: v5e
topology: v5e:2x2
jax: 0.10.0
libtpu: 0.0.40
codegen_flags: <defaults>
</compile_context>

<pallas_src>
import functools

import numpy as np
import jax
import jax.numpy as jnp
from jax.experimental import pallas as pl
from jax.experimental.pallas import tpu as pltpu


def _ctrgc_kernel(x_ref, w3b_ref, b3_ref, avg_ref, w2_ref, b2_ref,
                  w1w_ref, b1w_ref, tile_ref, spread_ref, at_ref,
                  w4b_ref, b4_ref, gsum_ref, o_ref, *, batch_block, mxu_dtype):
    f32 = jnp.float32
    # Replicated operands (constant index maps -> DMA'd once, reused every step).
    w3b = w3b_ref[...]        # (OT, CT)  mxu dtype  block-diagonal conv3 weight
    avg = avg_ref[...]        # (C,  CT)  mxu dtype  T-mean operator
    a_t = at_ref[...]         # (V,  V)   mxu dtype  A^T  (a_t[v,u] = A[u,v])
    gsum = gsum_ref[...]      # (R*V, V)  mxu dtype  lane-group sum selector
    w2 = w2_ref[...]          # (R, C)    f32
    b2 = b2_ref[...]          # (R, 1)    f32
    w1w = w1w_ref[...]        # (C, R*V)  f32   W1[r,c] tiled along the u lanes
    b1w = b1w_ref[...]        # (1, R*V)  f32
    tile = tile_ref[...]      # (V, R*V)  f32   lane-tile selector  [v'==u]
    spread = spread_ref[...]  # (R, R*V)  f32   lane-group spread   [r'==r]
    w4b = w4b_ref[...]        # (OT, R*V) f32   alpha*W4[o,r] per (row, group)
    b3 = b3_ref[...]          # (OT, 1)   f32
    b4 = b4_ref[...]          # (OT, 1)   f32   alpha*b4[o] per row

    for b in range(batch_block):          # static unroll: B samples per grid step
        x_b = x_ref[b].astype(mxu_dtype)                                   # (CT, V)

        # conv3 for every (o,t) row at once + T-mean, both on the MXU.
        x3 = jnp.dot(w3b, x_b, preferred_element_type=f32) + b3            # (OT, V)
        xm = jnp.dot(avg, x_b, preferred_element_type=f32)                 # (C, V)

        # Relation branch (tiny, kept in f32):
        #   d_all[v, r*V+u] = tanh(x1[r,u] - x2[r,v])
        x2 = jnp.dot(w2, xm, preferred_element_type=f32) + b2              # (R, V)
        x2w = jnp.dot(jnp.transpose(x2), spread,
                      preferred_element_type=f32)                          # (V, R*V)
        xm_w = jnp.dot(xm, tile, preferred_element_type=f32)               # (C, R*V)
        x1_row = jnp.sum(w1w * xm_w, axis=0, keepdims=True) + b1w          # (1, R*V)
        d_all = jnp.tanh(x1_row - x2w)                                     # (V, R*V)

        # Tail, reassociated into three lane-dense MXU matmuls + one VPU scale:
        #  out[ot,u] = sum_v x3[ot,v]*A[u,v] + alpha*b4[o]*sum_v x3[ot,v]
        #            + alpha*sum_r W4[o,r] * sum_v x3[ot,v]*d_all[v, r*V+u]
        x3_m = x3.astype(mxu_dtype)
        rowsum = jnp.sum(x3, axis=-1, keepdims=True)                       # (OT, 1)
        acc = jnp.dot(x3_m, a_t, preferred_element_type=f32) + b4 * rowsum
        p = jnp.dot(x3_m, d_all.astype(mxu_dtype),
                    preferred_element_type=f32)                            # (OT, R*V)
        acc = acc + jnp.dot((p * w4b).astype(mxu_dtype), gsum,
                            preferred_element_type=f32)                    # (OT, V)
        o_ref[b] = acc.astype(o_ref.dtype)


def prepare_ctrgc_weights(params, A, num_frames, alpha=1.0, mxu_dtype=jnp.bfloat16):
    """Build the fused weight set ONCE (hoisted out of the per-call path)."""
    W1, b1, W2, b2, W3, b3, W4, b4 = params
    f32 = jnp.float32
    T = num_frames
    R, C = W1.shape
    O = W3.shape[0]
    V = A.shape[0]
    CT, OT, RV = C * T, O * T, R * V
    alpha = f32(alpha)

    eye_t = jnp.eye(T, dtype=f32)
    # w3_big[o*T+t, c*T+t'] = W3[o, c] * (t == t')   (block-diagonal over t)
    w3_big = (W3.astype(f32)[:, None, :, None] * eye_t[None, :, None, :]).reshape(OT, CT)
    # avg_big[c, c'*T+t] = (c == c') / T
    avg_big = (jnp.eye(C, dtype=f32)[:, :, None] *
               jnp.full((T,), 1.0 / T, f32)).reshape(C, CT)

    return dict(
        w3_big=w3_big.astype(mxu_dtype),
        b3_rep=jnp.repeat(b3.astype(f32), T).reshape(OT, 1),
        avg_big=avg_big.astype(mxu_dtype),
        w2=W2.astype(f32),
        b2=b2.astype(f32).reshape(R, 1),
        w1_wide=jnp.repeat(W1.astype(f32).T, V, axis=1),              # (C, R*V)
        b1_wide=jnp.repeat(b1.astype(f32), V).reshape(1, RV),
        tile_mat=jnp.tile(jnp.eye(V, dtype=f32), (1, R)),             # (V, R*V)
        spread_mat=jnp.repeat(jnp.eye(R, dtype=f32), V, axis=1),      # (R, R*V)
        a_t=jnp.transpose(A).astype(mxu_dtype),                       # (V, V)
        w4_big=jnp.repeat(jnp.repeat(alpha * W4.astype(f32), T, axis=0),
                          V, axis=1),                                 # (OT, R*V)
        b4_rep=jnp.repeat(alpha * b4.astype(f32), T).reshape(OT, 1),
        gsum=jnp.tile(jnp.eye(V, dtype=f32), (R, 1)).astype(mxu_dtype),  # (R*V, V)
    )


def _pick_batch_block(N):
    # Largest per-step sample block that still leaves >= 2 grid steps (megacore).
    for b in (8, 4, 2):
        if N % b == 0 and N // b >= 2:
            return b
    return 1


def ctrgc_forward(x, weights):
    N, C, T, V = x.shape
    CT = C * T
    OT = weights["w3_big"].shape[0]
    RV = weights["gsum"].shape[0]
    O = OT // T
    R = RV // V
    mxu_dtype = weights["w3_big"].dtype
    B = _pick_batch_block(N)

    x_flat = x.reshape(N, CT, V)                                      # free HBM view

    def rep_spec(shape):                                              # replicated weight
        return pl.BlockSpec(shape, lambda n: (0,) * len(shape))

    grid_spec = pltpu.PrefetchScalarGridSpec(
        num_scalar_prefetch=0,
        grid=(N // B,),
        in_specs=[
            pl.BlockSpec((B, CT, V), lambda n: (n, 0, 0)),            # x: B samples/step
            rep_spec((OT, CT)),                                       # w3_big
            rep_spec((OT, 1)),                                        # b3_rep
            rep_spec((C, CT)),                                        # avg_big
            rep_spec((R, C)),                                         # w2
            rep_spec((R, 1)),                                         # b2
            rep_spec((C, RV)),                                        # w1_wide
            rep_spec((1, RV)),                                        # b1_wide
            rep_spec((V, RV)),                                        # tile_mat
            rep_spec((R, RV)),                                        # spread_mat
            rep_spec((V, V)),                                         # a_t
            rep_spec((OT, RV)),                                       # w4_big
            rep_spec((OT, 1)),                                        # b4_rep
            rep_spec((RV, V)),                                        # gsum
        ],
        out_specs=pl.BlockSpec((B, OT, V), lambda n: (n, 0, 0)),
    )

    flops = 2 * N * (OT * CT * V + C * CT * V + R * C * V + C * V * RV
                     + V * R * RV + OT * V * V + OT * V * RV + OT * RV * V)
    weight_bytes = sum(int(w.size) * w.dtype.itemsize for w in weights.values())
    cost = pl.CostEstimate(
        flops=flops,
        transcendentals=N * V * RV,
        bytes_accessed=int(x.nbytes) + N * OT * V * x.dtype.itemsize + weight_bytes)

    kernel = functools.partial(_ctrgc_kernel, batch_block=B, mxu_dtype=mxu_dtype)
    out_flat = pl.pallas_call(
        kernel,
        out_shape=jax.ShapeDtypeStruct((N, OT, V), x.dtype),
        grid_spec=grid_spec,
        compiler_params=pltpu.CompilerParams(dimension_semantics=("parallel",)),
        cost_estimate=cost,
    )(x_flat, weights["w3_big"], weights["b3_rep"], weights["avg_big"],
      weights["w2"], weights["b2"], weights["w1_wide"], weights["b1_wide"],
      weights["tile_mat"], weights["spread_mat"], weights["a_t"],
      weights["w4_big"], weights["b4_rep"], weights["gsum"])
    return out_flat.reshape(N, O, T, V)


def ctrgc_reference(x, params, A, alpha=1.0):
    """Pure-JAX replica of the PyTorch forward, for correctness checking."""
    W1, b1, W2, b2, W3, b3, W4, b4 = params
    x1 = jnp.einsum('rc,nctv->nrtv', W1, x) + b1[None, :, None, None]
    x2 = jnp.einsum('rc,nctv->nrtv', W2, x) + b2[None, :, None, None]
    x3 = jnp.einsum('oc,nctv->notv', W3, x) + b3[None, :, None, None]
    x1 = x1.mean(axis=2)                                              # (N, R, V)
    x2 = x2.mean(axis=2)
    d = jnp.tanh(x1[:, :, :, None] - x2[:, :, None, :])               # (N, R, V, V)
    y = jnp.einsum('or,nruv->nouv', W4, d) + b4[None, :, None, None]
    y = y * alpha + A[None, None]
    return jnp.einsum('ncuv,nctv->nctu', y, x3)


def init_ctrgc_params(key, in_channels, out_channels, rel_reduction=8):
    if in_channels in (3, 9):
        rel_channels = 8
    else:
        rel_channels = in_channels // rel_reduction
    ks = jax.random.split(key, 4)

    def kaiming_fan_out(k, out_c, in_c):
        # nn.init.kaiming_normal_(mode='fan_out') for a 1x1 conv: std = sqrt(2 / out_c)
        return (2.0 / out_c) ** 0.5 * jax.random.normal(k, (out_c, in_c), jnp.float32)

    W1 = kaiming_fan_out(ks[0], rel_channels, in_channels)
    W2 = kaiming_fan_out(ks[1], rel_channels, in_channels)
    W3 = kaiming_fan_out(ks[2], out_channels, in_channels)
    W4 = kaiming_fan_out(ks[3], out_channels, rel_channels)
    zeros = lambda n: jnp.zeros((n,), jnp.float32)   # conv_init sets biases to 0
    return (W1, zeros(rel_channels), W2, zeros(rel_channels),
            W3, zeros(out_channels), W4, zeros(out_channels))


if __name__ == "__main__":
    key = jax.random.PRNGKey(0)
    kx, ka, kp = jax.random.split(key, 3)

    # N (batch*persons), C (channels), T (time frames), V (skeleton joints)
    N, C, T, V = 8, 16, 8, 25
    out_channels = 16

    x = jax.random.normal(kx, (N, C, T, V), jnp.float32)
    A = jax.random.normal(ka, (V, V), jnp.float32)
    params = init_ctrgc_params(kp, C, out_channels, rel_reduction=2)   # R = 8
    ref = np.asarray(ctrgc_reference(x, params, A, alpha=1.0))

    # f32 MXU-operand path: exact check against the pure-JAX reference.
    w_f32 = prepare_ctrgc_weights(params, A, T, alpha=1.0, mxu_dtype=jnp.float32)
    out_f32 = jax.block_until_ready(ctrgc_forward(x, w_f32))
    np.testing.assert_allclose(np.asarray(out_f32), ref, rtol=5e-4, atol=5e-4)
    assert out_f32.shape == (N, out_channels, T, V)

    # bf16 MXU-operand path (v6e/v7x fast path); accumulation/elementwise stay f32,
    # so check normalized max error against the f32 reference.
    w_bf16 = prepare_ctrgc_weights(params, A, T, alpha=1.0, mxu_dtype=jnp.bfloat16)
    out_bf16 = jax.block_until_ready(ctrgc_forward(x, w_bf16))
    max_err = float(np.max(np.abs(np.asarray(out_bf16) - ref)))
    scale = float(np.max(np.abs(ref)))
    assert max_err <= 3e-2 * scale, (max_err, scale)

    print("KERNEL_OK")
</pallas_src>

<mosaic_0001>
module attributes {stable_mosaic.version = 11 : i64} {
  func.func @_ctrgc_kernel(%arg0: i32, %arg1: memref<4x128x25xf32, #tpu.memory_space<vmem>>, %arg2: memref<128x128xf32, #tpu.memory_space<vmem>>, %arg3: memref<128x1xf32, #tpu.memory_space<vmem>>, %arg4: memref<16x128xf32, #tpu.memory_space<vmem>>, %arg5: memref<8x16xf32, #tpu.memory_space<vmem>>, %arg6: memref<8x1xf32, #tpu.memory_space<vmem>>, %arg7: memref<16x200xf32, #tpu.memory_space<vmem>>, %arg8: memref<1x200xf32, #tpu.memory_space<vmem>>, %arg9: memref<25x200xf32, #tpu.memory_space<vmem>>, %arg10: memref<8x200xf32, #tpu.memory_space<vmem>>, %arg11: memref<25x25xf32, #tpu.memory_space<vmem>>, %arg12: memref<128x200xf32, #tpu.memory_space<vmem>>, %arg13: memref<128x1xf32, #tpu.memory_space<vmem>>, %arg14: memref<200x25xf32, #tpu.memory_space<vmem>>, %arg15: memref<4x128x25xf32, #tpu.memory_space<vmem>>) attributes {dimension_semantics = [#tpu.dimension_semantics<parallel>], iteration_bounds = array<i64: 2>, scalar_prefetch = 0 : i64, scratch_operands = 0 : i64, tpu.core_type = #tpu.core_type<tc>, window_params = [{transform_indices = @transform_0, window_bounds = array<i64: 4, 128, 25>}, {pipeline_mode = #tpu.pipeline_mode<synchronous>, transform_indices = @transform_1, window_bounds = array<i64: 128, 128>}, {pipeline_mode = #tpu.pipeline_mode<synchronous>, transform_indices = @transform_2, window_bounds = array<i64: 128, 1>}, {pipeline_mode = #tpu.pipeline_mode<synchronous>, transform_indices = @transform_3, window_bounds = array<i64: 16, 128>}, {pipeline_mode = #tpu.pipeline_mode<synchronous>, transform_indices = @transform_4, window_bounds = array<i64: 8, 16>}, {pipeline_mode = #tpu.pipeline_mode<synchronous>, transform_indices = @transform_5, window_bounds = array<i64: 8, 1>}, {pipeline_mode = #tpu.pipeline_mode<synchronous>, transform_indices = @transform_6, window_bounds = array<i64: 16, 200>}, {pipeline_mode = #tpu.pipeline_mode<synchronous>, transform_indices = @transform_7, window_bounds = array<i64: 1, 200>}, {pipeline_mode = #tpu.pipeline_mode<synchronous>, transform_indices = @transform_8, window_bounds = array<i64: 25, 200>}, {pipeline_mode = #tpu.pipeline_mode<synchronous>, transform_indices = @transform_9, window_bounds = array<i64: 8, 200>}, {pipeline_mode = #tpu.pipeline_mode<synchronous>, transform_indices = @transform_10, window_bounds = array<i64: 25, 25>}, {pipeline_mode = #tpu.pipeline_mode<synchronous>, transform_indices = @transform_11, window_bounds = array<i64: 128, 200>}, {pipeline_mode = #tpu.pipeline_mode<synchronous>, transform_indices = @transform_12, window_bounds = array<i64: 128, 1>}, {pipeline_mode = #tpu.pipeline_mode<synchronous>, transform_indices = @transform_13, window_bounds = array<i64: 200, 25>}, {transform_indices = @transform_14, window_bounds = array<i64: 4, 128, 25>}]} {
    %c0 = arith.constant 0 : index
    %c0_0 = arith.constant 0 : index
    %0 = vector.load %arg2[%c0, %c0_0] : memref<128x128xf32, #tpu.memory_space<vmem>>, vector<128x128xf32>
    %c0_1 = arith.constant 0 : index
    %c0_2 = arith.constant 0 : index
    %1 = vector.load %arg4[%c0_1, %c0_2] : memref<16x128xf32, #tpu.memory_space<vmem>>, vector<16x128xf32>
    %c0_3 = arith.constant 0 : index
    %c0_4 = arith.constant 0 : index
    %2 = vector.load %arg11[%c0_3, %c0_4] : memref<25x25xf32, #tpu.memory_space<vmem>>, vector<25x25xf32>
    %c0_5 = arith.constant 0 : index
    %c0_6 = arith.constant 0 : index
    %3 = vector.load %arg14[%c0_5, %c0_6] : memref<200x25xf32, #tpu.memory_space<vmem>>, vector<200x25xf32>
    %c0_7 = arith.constant 0 : index
    %c0_8 = arith.constant 0 : index
    %4 = vector.load %arg5[%c0_7, %c0_8] : memref<8x16xf32, #tpu.memory_space<vmem>>, vector<8x16xf32>
    %c0_9 = arith.constant 0 : index
    %c0_10 = arith.constant 0 : index
    %5 = vector.load %arg6[%c0_9, %c0_10] : memref<8x1xf32, #tpu.memory_space<vmem>>, vector<8x1xf32>
    %c0_11 = arith.constant 0 : index
    %c0_12 = arith.constant 0 : index
    %6 = vector.load %arg7[%c0_11, %c0_12] : memref<16x200xf32, #tpu.memory_space<vmem>>, vector<16x200xf32>
    %c0_13 = arith.constant 0 : index
    %c0_14 = arith.constant 0 : index
    %7 = vector.load %arg8[%c0_13, %c0_14] : memref<1x200xf32, #tpu.memory_space<vmem>>, vector<1x200xf32>
    %c0_15 = arith.constant 0 : index
    %c0_16 = arith.constant 0 : index
    %8 = vector.load %arg9[%c0_15, %c0_16] : memref<25x200xf32, #tpu.memory_space<vmem>>, vector<25x200xf32>
    %c0_17 = arith.constant 0 : index
    %c0_18 = arith.constant 0 : index
    %9 = vector.load %arg10[%c0_17, %c0_18] : memref<8x200xf32, #tpu.memory_space<vmem>>, vector<8x200xf32>
    %c0_19 = arith.constant 0 : index
    %c0_20 = arith.constant 0 : index
    %10 = vector.load %arg12[%c0_19, %c0_20] : memref<128x200xf32, #tpu.memory_space<vmem>>, vector<128x200xf32>
    %c0_21 = arith.constant 0 : index
    %c0_22 = arith.constant 0 : index
    %11 = vector.load %arg3[%c0_21, %c0_22] : memref<128x1xf32, #tpu.memory_space<vmem>>, vector<128x1xf32>
    %c0_23 = arith.constant 0 : index
    %c0_24 = arith.constant 0 : index
    %12 = vector.load %arg13[%c0_23, %c0_24] : memref<128x1xf32, #tpu.memory_space<vmem>>, vector<128x1xf32>
    %c0_25 = arith.constant 0 : index
    %c0_26 = arith.constant 0 : index
    %c0_27 = arith.constant 0 : index
    %13 = vector.load %arg1[%c0_25, %c0_26, %c0_27] : memref<4x128x25xf32, #tpu.memory_space<vmem>>, vector<1x128x25xf32>
    %14 = vector.shape_cast %13 : vector<1x128x25xf32> to vector<128x25xf32>
    %cst = arith.constant dense<0.000000e+00> : vector<128x25xf32>
    %15 = tpu.matmul %0, %14, %cst {dimension_numbers = #tpu.dot_dimension_numbers<[1], [0], [0], [1], [0, 0, 1, 1], [], []>} : vector<128x128xf32>, vector<128x25xf32>, vector<128x25xf32> -> vector<128x25xf32>
    %16 = vector.broadcast %11 : vector<128x1xf32> to vector<128x25xf32>
    %17 = arith.addf %15, %16 : vector<128x25xf32>
    %cst_28 = arith.constant dense<0.000000e+00> : vector<16x25xf32>
    %18 = tpu.matmul %1, %14, %cst_28 {dimension_numbers = #tpu.dot_dimension_numbers<[1], [0], [0], [1], [0, 0, 1, 1], [], []>} : vector<16x128xf32>, vector<128x25xf32>, vector<16x25xf32> -> vector<16x25xf32>
    %cst_29 = arith.constant dense<0.000000e+00> : vector<8x25xf32>
    %19 = tpu.matmul %4, %18, %cst_29 {dimension_numbers = #tpu.dot_dimension_numbers<[1], [0], [0], [1], [0, 0, 1, 1], [], []>} : vector<8x16xf32>, vector<16x25xf32>, vector<8x25xf32> -> vector<8x25xf32>
    %20 = vector.broadcast %5 : vector<8x1xf32> to vector<8x25xf32>
    %21 = arith.addf %19, %20 : vector<8x25xf32>
    %22 = tpu.transpose %21, [1, 0] : vector<8x25xf32> -> vector<25x8xf32>
    %cst_30 = arith.constant dense<0.000000e+00> : vector<25x200xf32>
    %23 = tpu.matmul %22, %9, %cst_30 {dimension_numbers = #tpu.dot_dimension_numbers<[1], [0], [0], [1], [0, 0, 1, 1], [], []>} : vector<25x8xf32>, vector<8x200xf32>, vector<25x200xf32> -> vector<25x200xf32>
    %cst_31 = arith.constant dense<0.000000e+00> : vector<16x200xf32>
    %24 = tpu.matmul %18, %8, %cst_31 {dimension_numbers = #tpu.dot_dimension_numbers<[1], [0], [0], [1], [0, 0, 1, 1], [], []>} : vector<16x25xf32>, vector<25x200xf32>, vector<16x200xf32> -> vector<16x200xf32>
    %25 = arith.mulf %6, %24 : vector<16x200xf32>
    %cst_32 = arith.constant dense<0.000000e+00> : vector<200xf32>
    %26 = vector.multi_reduction <add>, %25, %cst_32 [0] : vector<16x200xf32> to vector<200xf32>
    %27 = vector.shape_cast %26 : vector<200xf32> to vector<1x200xf32>
    %28 = arith.addf %27, %7 : vector<1x200xf32>
    %29 = vector.broadcast %28 : vector<1x200xf32> to vector<25x200xf32>
    %30 = arith.subf %29, %23 : vector<25x200xf32>
    %31 = math.tanh %30 : vector<25x200xf32>
    %cst_33 = arith.constant dense<0.000000e+00> : vector<128xf32>
    %32 = vector.multi_reduction <add>, %17, %cst_33 [1] : vector<128x25xf32> to vector<128xf32>
    %33 = vector.shape_cast %32 : vector<128xf32> to vector<128x1xf32>
    %cst_34 = arith.constant dense<0.000000e+00> : vector<128x25xf32>
    %34 = tpu.matmul %17, %2, %cst_34 {dimension_numbers = #tpu.dot_dimension_numbers<[1], [0], [0], [1], [0, 0, 1, 1], [], []>} : vector<128x25xf32>, vector<25x25xf32>, vector<128x25xf32> -> vector<128x25xf32>
    %35 = arith.mulf %12, %33 : vector<128x1xf32>
    %36 = vector.broadcast %35 : vector<128x1xf32> to vector<128x25xf32>
    %37 = arith.addf %34, %36 : vector<128x25xf32>
    %cst_35 = arith.constant dense<0.000000e+00> : vector<128x200xf32>
    %38 = tpu.matmul %17, %31, %cst_35 {dimension_numbers = #tpu.dot_dimension_numbers<[1], [0], [0], [1], [0, 0, 1, 1], [], []>} : vector<128x25xf32>, vector<25x200xf32>, vector<128x200xf32> -> vector<128x200xf32>
    %39 = arith.mulf %38, %10 : vector<128x200xf32>
    %cst_36 = arith.constant dense<0.000000e+00> : vector<128x25xf32>
    %40 = tpu.matmul %39, %3, %cst_36 {dimension_numbers = #tpu.dot_dimension_numbers<[1], [0], [0], [1], [0, 0, 1, 1], [], []>} : vector<128x200xf32>, vector<200x25xf32>, vector<128x25xf32> -> vector<128x25xf32>
    %41 = arith.addf %37, %40 : vector<128x25xf32>
    %c0_37 = arith.constant 0 : index
    %c0_38 = arith.constant 0 : index
    %c0_39 = arith.constant 0 : index
    %42 = vector.load %arg15[%c0_37, %c0_38, %c0_39] : memref<4x128x25xf32, #tpu.memory_space<vmem>>, vector<1x128x25xf32>
    %43 = vector.shape_cast %42 : vector<1x128x25xf32> to vector<128x25xf32>
    %44 = vector.shape_cast %41 : vector<128x25xf32> to vector<1x128x25xf32>
    tpu.vector_store %arg15[%c0_37, %c0_38, %c0_39], %44 {strides = array<i32>} : memref<4x128x25xf32, #tpu.memory_space<vmem>>, vector<1x128x25xf32>,
    %c1 = arith.constant 1 : index
    %c0_40 = arith.constant 0 : index
    %c0_41 = arith.constant 0 : index
    %45 = vector.load %arg1[%c1, %c0_40, %c0_41] : memref<4x128x25xf32, #tpu.memory_space<vmem>>, vector<1x128x25xf32>
    %46 = vector.shape_cast %45 : vector<1x128x25xf32> to vector<128x25xf32>
    %cst_42 = arith.constant dense<0.000000e+00> : vector<128x25xf32>
    %47 = tpu.matmul %0, %46, %cst_42 {dimension_numbers = #tpu.dot_dimension_numbers<[1], [0], [0], [1], [0, 0, 1, 1], [], []>} : vector<128x128xf32>, vector<128x25xf32>, vector<128x25xf32> -> vector<128x25xf32>
    %48 = vector.broadcast %11 : vector<128x1xf32> to vector<128x25xf32>
    %49 = arith.addf %47, %48 : vector<128x25xf32>
    %cst_43 = arith.constant dense<0.000000e+00> : vector<16x25xf32>
    %50 = tpu.matmul %1, %46, %cst_43 {dimension_numbers = #tpu.dot_dimension_numbers<[1], [0], [0], [1], [0, 0, 1, 1], [], []>} : vector<16x128xf32>, vector<128x25xf32>, vector<16x25xf32> -> vector<16x25xf32>
    %cst_44 = arith.constant dense<0.000000e+00> : vector<8x25xf32>
    %51 = tpu.matmul %4, %50, %cst_44 {dimension_numbers = #tpu.dot_dimension_numbers<[1], [0], [0], [1], [0, 0, 1, 1], [], []>} : vector<8x16xf32>, vector<16x25xf32>, vector<8x25xf32> -> vector<8x25xf32>
    %52 = vector.broadcast %5 : vector<8x1xf32> to vector<8x25xf32>
    %53 = arith.addf %51, %52 : vector<8x25xf32>
    %54 = tpu.transpose %53, [1, 0] : vector<8x25xf32> -> vector<25x8xf32>
    %cst_45 = arith.constant dense<0.000000e+00> : vector<25x200xf32>
    %55 = tpu.matmul %54, %9, %cst_45 {dimension_numbers = #tpu.dot_dimension_numbers<[1], [0], [0], [1], [0, 0, 1, 1], [], []>} : vector<25x8xf32>, vector<8x200xf32>, vector<25x200xf32> -> vector<25x200xf32>
    %cst_46 = arith.constant dense<0.000000e+00> : vector<16x200xf32>
    %56 = tpu.matmul %50, %8, %cst_46 {dimension_numbers = #tpu.dot_dimension_numbers<[1], [0], [0], [1], [0, 0, 1, 1], [], []>} : vector<16x25xf32>, vector<25x200xf32>, vector<16x200xf32> -> vector<16x200xf32>
    %57 = arith.mulf %6, %56 : vector<16x200xf32>
    %cst_47 = arith.constant dense<0.000000e+00> : vector<200xf32>
    %58 = vector.multi_reduction <add>, %57, %cst_47 [0] : vector<16x200xf32> to vector<200xf32>
    %59 = vector.shape_cast %58 : vector<200xf32> to vector<1x200xf32>
    %60 = arith.addf %59, %7 : vector<1x200xf32>
    %61 = vector.broadcast %60 : vector<1x200xf32> to vector<25x200xf32>
    %62 = arith.subf %61, %55 : vector<25x200xf32>
    %63 = math.tanh %62 : vector<25x200xf32>
    %cst_48 = arith.constant dense<0.000000e+00> : vector<128xf32>
    %64 = vector.multi_reduction <add>, %49, %cst_48 [1] : vector<128x25xf32> to vector<128xf32>
    %65 = vector.shape_cast %64 : vector<128xf32> to vector<128x1xf32>
    %cst_49 = arith.constant dense<0.000000e+00> : vector<128x25xf32>
    %66 = tpu.matmul %49, %2, %cst_49 {dimension_numbers = #tpu.dot_dimension_numbers<[1], [0], [0], [1], [0, 0, 1, 1], [], []>} : vector<128x25xf32>, vector<25x25xf32>, vector<128x25xf32> -> vector<128x25xf32>
    %67 = arith.mulf %12, %65 : vector<128x1xf32>
    %68 = vector.broadcast %67 : vector<128x1xf32> to vector<128x25xf32>
    %69 = arith.addf %66, %68 : vector<128x25xf32>
    %cst_50 = arith.constant dense<0.000000e+00> : vector<128x200xf32>
    %70 = tpu.matmul %49, %63, %cst_50 {dimension_numbers = #tpu.dot_dimension_numbers<[1], [0], [0], [1], [0, 0, 1, 1], [], []>} : vector<128x25xf32>, vector<25x200xf32>, vector<128x200xf32> -> vector<128x200xf32>
    %71 = arith.mulf %70, %10 : vector<128x200xf32>
    %cst_51 = arith.constant dense<0.000000e+00> : vector<128x25xf32>
    %72 = tpu.matmul %71, %3, %cst_51 {dimension_numbers = #tpu.dot_dimension_numbers<[1], [0], [0], [1], [0, 0, 1, 1], [], []>} : vector<128x200xf32>, vector<200x25xf32>, vector<128x25xf32> -> vector<128x25xf32>
    %73 = arith.addf %69, %72 : vector<128x25xf32>
    %c1_52 = arith.constant 1 : index
    %c0_53 = arith.constant 0 : index
    %c0_54 = arith.constant 0 : index
    %74 = vector.load %arg15[%c1_52, %c0_53, %c0_54] : memref<4x128x25xf32, #tpu.memory_space<vmem>>, vector<1x128x25xf32>
    %75 = vector.shape_cast %74 : vector<1x128x25xf32> to vector<128x25xf32>
    %76 = vector.shape_cast %73 : vector<128x25xf32> to vector<1x128x25xf32>
    tpu.vector_store %arg15[%c1_52, %c0_53, %c0_54], %76 {strides = array<i32>} : memref<4x128x25xf32, #tpu.memory_space<vmem>>, vector<1x128x25xf32>,
    %c2 = arith.constant 2 : index
    %c0_55 = arith.constant 0 : index
    %c0_56 = arith.constant 0 : index
    %77 = vector.load %arg1[%c2, %c0_55, %c0_56] : memref<4x128x25xf32, #tpu.memory_space<vmem>>, vector<1x128x25xf32>
    %78 = vector.shape_cast %77 : vector<1x128x25xf32> to vector<128x25xf32>
    %cst_57 = arith.constant dense<0.000000e+00> : vector<128x25xf32>
    %79 = tpu.matmul %0, %78, %cst_57 {dimension_numbers = #tpu.dot_dimension_numbers<[1], [0], [0], [1], [0, 0, 1, 1], [], []>} : vector<128x128xf32>, vector<128x25xf32>, vector<128x25xf32> -> vector<128x25xf32>
    %80 = vector.broadcast %11 : vector<128x1xf32> to vector<128x25xf32>
    %81 = arith.addf %79, %80 : vector<128x25xf32>
    %cst_58 = arith.constant dense<0.000000e+00> : vector<16x25xf32>
    %82 = tpu.matmul %1, %78, %cst_58 {dimension_numbers = #tpu.dot_dimension_numbers<[1], [0], [0], [1], [0, 0, 1, 1], [], []>} : vector<16x128xf32>, vector<128x25xf32>, vector<16x25xf32> -> vector<16x25xf32>
    %cst_59 = arith.constant dense<0.000000e+00> : vector<8x25xf32>
    %83 = tpu.matmul %4, %82, %cst_59 {dimension_numbers = #tpu.dot_dimension_numbers<[1], [0], [0], [1], [0, 0, 1, 1], [], []>} : vector<8x16xf32>, vector<16x25xf32>, vector<8x25xf32> -> vector<8x25xf32>
    %84 = vector.broadcast %5 : vector<8x1xf32> to vector<8x25xf32>
    %85 = arith.addf %83, %84 : vector<8x25xf32>
    %86 = tpu.transpose %85, [1, 0] : vector<8x25xf32> -> vector<25x8xf32>
    %cst_60 = arith.constant dense<0.000000e+00> : vector<25x200xf32>
    %87 = tpu.matmul %86, %9, %cst_60 {dimension_numbers = #tpu.dot_dimension_numbers<[1], [0], [0], [1], [0, 0, 1, 1], [], []>} : vector<25x8xf32>, vector<8x200xf32>, vector<25x200xf32> -> vector<25x200xf32>
    %cst_61 = arith.constant dense<0.000000e+00> : vector<16x200xf32>
    %88 = tpu.matmul %82, %8, %cst_61 {dimension_numbers = #tpu.dot_dimension_numbers<[1], [0], [0], [1], [0, 0, 1, 1], [], []>} : vector<16x25xf32>, vector<25x200xf32>, vector<16x200xf32> -> vector<16x200xf32>
    %89 = arith.mulf %6, %88 : vector<16x200xf32>
    %cst_62 = arith.constant dense<0.000000e+00> : vector<200xf32>
    %90 = vector.multi_reduction <add>, %89, %cst_62 [0] : vector<16x200xf32> to vector<200xf32>
    %91 = vector.shape_cast %90 : vector<200xf32> to vector<1x200xf32>
    %92 = arith.addf %91, %7 : vector<1x200xf32>
    %93 = vector.broadcast %92 : vector<1x200xf32> to vector<25x200xf32>
    %94 = arith.subf %93, %87 : vector<25x200xf32>
    %95 = math.tanh %94 : vector<25x200xf32>
    %cst_63 = arith.constant dense<0.000000e+00> : vector<128xf32>
    %96 = vector.multi_reduction <add>, %81, %cst_63 [1] : vector<128x25xf32> to vector<128xf32>
    %97 = vector.shape_cast %96 : vector<128xf32> to vector<128x1xf32>
    %cst_64 = arith.constant dense<0.000000e+00> : vector<128x25xf32>
    %98 = tpu.matmul %81, %2, %cst_64 {dimension_numbers = #tpu.dot_dimension_numbers<[1], [0], [0], [1], [0, 0, 1, 1], [], []>} : vector<128x25xf32>, vector<25x25xf32>, vector<128x25xf32> -> vector<128x25xf32>
    %99 = arith.mulf %12, %97 : vector<128x1xf32>
    %100 = vector.broadcast %99 : vector<128x1xf32> to vector<128x25xf32>
    %101 = arith.addf %98, %100 : vector<128x25xf32>
    %cst_65 = arith.constant dense<0.000000e+00> : vector<128x200xf32>
    %102 = tpu.matmul %81, %95, %cst_65 {dimension_numbers = #tpu.dot_dimension_numbers<[1], [0], [0], [1], [0, 0, 1, 1], [], []>} : vector<128x25xf32>, vector<25x200xf32>, vector<128x200xf32> -> vector<128x200xf32>
    %103 = arith.mulf %102, %10 : vector<128x200xf32>
    %cst_66 = arith.constant dense<0.000000e+00> : vector<128x25xf32>
    %104 = tpu.matmul %103, %3, %cst_66 {dimension_numbers = #tpu.dot_dimension_numbers<[1], [0], [0], [1], [0, 0, 1, 1], [], []>} : vector<128x200xf32>, vector<200x25xf32>, vector<128x25xf32> -> vector<128x25xf32>
    %105 = arith.addf %101, %104 : vector<128x25xf32>
    %c2_67 = arith.constant 2 : index
    %c0_68 = arith.constant 0 : index
    %c0_69 = arith.constant 0 : index
    %106 = vector.load %arg15[%c2_67, %c0_68, %c0_69] : memref<4x128x25xf32, #tpu.memory_space<vmem>>, vector<1x128x25xf32>
    %107 = vector.shape_cast %106 : vector<1x128x25xf32> to vector<128x25xf32>
    %108 = vector.shape_cast %105 : vector<128x25xf32> to vector<1x128x25xf32>
    tpu.vector_store %arg15[%c2_67, %c0_68, %c0_69], %108 {strides = array<i32>} : memref<4x128x25xf32, #tpu.memory_space<vmem>>, vector<1x128x25xf32>,
    %c3 = arith.constant 3 : index
    %c0_70 = arith.constant 0 : index
    %c0_71 = arith.constant 0 : index
    %109 = vector.load %arg1[%c3, %c0_70, %c0_71] : memref<4x128x25xf32, #tpu.memory_space<vmem>>, vector<1x128x25xf32>
    %110 = vector.shape_cast %109 : vector<1x128x25xf32> to vector<128x25xf32>
    %cst_72 = arith.constant dense<0.000000e+00> : vector<128x25xf32>
    %111 = tpu.matmul %0, %110, %cst_72 {dimension_numbers = #tpu.dot_dimension_numbers<[1], [0], [0], [1], [0, 0, 1, 1], [], []>} : vector<128x128xf32>, vector<128x25xf32>, vector<128x25xf32> -> vector<128x25xf32>
    %112 = vector.broadcast %11 : vector<128x1xf32> to vector<128x25xf32>
    %113 = arith.addf %111, %112 : vector<128x25xf32>
    %cst_73 = arith.constant dense<0.000000e+00> : vector<16x25xf32>
    %114 = tpu.matmul %1, %110, %cst_73 {dimension_numbers = #tpu.dot_dimension_numbers<[1], [0], [0], [1], [0, 0, 1, 1], [], []>} : vector<16x128xf32>, vector<128x25xf32>, vector<16x25xf32> -> vector<16x25xf32>
    %cst_74 = arith.constant dense<0.000000e+00> : vector<8x25xf32>
    %115 = tpu.matmul %4, %114, %cst_74 {dimension_numbers = #tpu.dot_dimension_numbers<[1], [0], [0], [1], [0, 0, 1, 1], [], []>} : vector<8x16xf32>, vector<16x25xf32>, vector<8x25xf32> -> vector<8x25xf32>
    %116 = vector.broadcast %5 : vector<8x1xf32> to vector<8x25xf32>
    %117 = arith.addf %115, %116 : vector<8x25xf32>
    %118 = tpu.transpose %117, [1, 0] : vector<8x25xf32> -> vector<25x8xf32>
    %cst_75 = arith.constant dense<0.000000e+00> : vector<25x200xf32>
    %119 = tpu.matmul %118, %9, %cst_75 {dimension_numbers = #tpu.dot_dimension_numbers<[1], [0], [0], [1], [0, 0, 1, 1], [], []>} : vector<25x8xf32>, vector<8x200xf32>, vector<25x200xf32> -> vector<25x200xf32>
    %cst_76 = arith.constant dense<0.000000e+00> : vector<16x200xf32>
    %120 = tpu.matmul %114, %8, %cst_76 {dimension_numbers = #tpu.dot_dimension_numbers<[1], [0], [0], [1], [0, 0, 1, 1], [], []>} : vector<16x25xf32>, vector<25x200xf32>, vector<16x200xf32> -> vector<16x200xf32>
    %121 = arith.mulf %6, %120 : vector<16x200xf32>
    %cst_77 = arith.constant dense<0.000000e+00> : vector<200xf32>
    %122 = vector.multi_reduction <add>, %121, %cst_77 [0] : vector<16x200xf32> to vector<200xf32>
    %123 = vector.shape_cast %122 : vector<200xf32> to vector<1x200xf32>
    %124 = arith.addf %123, %7 : vector<1x200xf32>
    %125 = vector.broadcast %124 : vector<1x200xf32> to vector<25x200xf32>
    %126 = arith.subf %125, %119 : vector<25x200xf32>
    %127 = math.tanh %126 : vector<25x200xf32>
    %cst_78 = arith.constant dense<0.000000e+00> : vector<128xf32>
    %128 = vector.multi_reduction <add>, %113, %cst_78 [1] : vector<128x25xf32> to vector<128xf32>
    %129 = vector.shape_cast %128 : vector<128xf32> to vector<128x1xf32>
    %cst_79 = arith.constant dense<0.000000e+00> : vector<128x25xf32>
    %130 = tpu.matmul %113, %2, %cst_79 {dimension_numbers = #tpu.dot_dimension_numbers<[1], [0], [0], [1], [0, 0, 1, 1], [], []>} : vector<128x25xf32>, vector<25x25xf32>, vector<128x25xf32> -> vector<128x25xf32>
    %131 = arith.mulf %12, %129 : vector<128x1xf32>
    %132 = vector.broadcast %131 : vector<128x1xf32> to vector<128x25xf32>
    %133 = arith.addf %130, %132 : vector<128x25xf32>
    %cst_80 = arith.constant dense<0.000000e+00> : vector<128x200xf32>
    %134 = tpu.matmul %113, %127, %cst_80 {dimension_numbers = #tpu.dot_dimension_numbers<[1], [0], [0], [1], [0, 0, 1, 1], [], []>} : vector<128x25xf32>, vector<25x200xf32>, vector<128x200xf32> -> vector<128x200xf32>
    %135 = arith.mulf %134, %10 : vector<128x200xf32>
    %cst_81 = arith.constant dense<0.000000e+00> : vector<128x25xf32>
    %136 = tpu.matmul %135, %3, %cst_81 {dimension_numbers = #tpu.dot_dimension_numbers<[1], [0], [0], [1], [0, 0, 1, 1], [], []>} : vector<128x200xf32>, vector<200x25xf32>, vector<128x25xf32> -> vector<128x25xf32>
    %137 = arith.addf %133, %136 : vector<128x25xf32>
    %c3_82 = arith.constant 3 : index
    %c0_83 = arith.constant 0 : index
    %c0_84 = arith.constant 0 : index
    %138 = vector.load %arg15[%c3_82, %c0_83, %c0_84] : memref<4x128x25xf32, #tpu.memory_space<vmem>>, vector<1x128x25xf32>
    %139 = vector.shape_cast %138 : vector<1x128x25xf32> to vector<128x25xf32>
    %140 = vector.shape_cast %137 : vector<128x25xf32> to vector<1x128x25xf32>
    tpu.vector_store %arg15[%c3_82, %c0_83, %c0_84], %140 {strides = array<i32>} : memref<4x128x25xf32, #tpu.memory_space<vmem>>, vector<1x128x25xf32>,
    return
  }
  func.func @transform_0(%arg0: i32) -> (i32, i32, i32) {
    %c0_i32 = arith.constant 0 : i32
    %c0_i32_0 = arith.constant 0 : i32
    %c0_i32_1 = arith.constant 0 : i32
    return %arg0, %c0_i32, %c0_i32_0 : i32, i32, i32
  }
  func.func @transform_1(%arg0: i32) -> (i32, i32) {
    %c0_i32 = arith.constant 0 : i32
    %c0_i32_0 = arith.constant 0 : i32
    %c0_i32_1 = arith.constant 0 : i32
    return %c0_i32, %c0_i32_0 : i32, i32
  }
  func.func @transform_2(%arg0: i32) -> (i32, i32) {
    %c0_i32 = arith.constant 0 : i32
    %c0_i32_0 = arith.constant 0 : i32
    %c0_i32_1 = arith.constant 0 : i32
    return %c0_i32, %c0_i32_0 : i32, i32
  }
  func.func @transform_3(%arg0: i32) -> (i32, i32) {
    %c0_i32 = arith.constant 0 : i32
    %c0_i32_0 = arith.constant 0 : i32
    %c0_i32_1 = arith.constant 0 : i32
    return %c0_i32, %c0_i32_0 : i32, i32
  }
  func.func @transform_4(%arg0: i32) -> (i32, i32) {
    %c0_i32 = arith.constant 0 : i32
    %c0_i32_0 = arith.constant 0 : i32
    %c0_i32_1 = arith.constant 0 : i32
    return %c0_i32, %c0_i32_0 : i32, i32
  }
  func.func @transform_5(%arg0: i32) -> (i32, i32) {
    %c0_i32 = arith.constant 0 : i32
    %c0_i32_0 = arith.constant 0 : i32
    %c0_i32_1 = arith.constant 0 : i32
    return %c0_i32, %c0_i32_0 : i32, i32
  }
  func.func @transform_6(%arg0: i32) -> (i32, i32) {
    %c0_i32 = arith.constant 0 : i32
    %c0_i32_0 = arith.constant 0 : i32
    %c0_i32_1 = arith.constant 0 : i32
    return %c0_i32, %c0_i32_0 : i32, i32
  }
  func.func @transform_7(%arg0: i32) -> (i32, i32) {
    %c0_i32 = arith.constant 0 : i32
    %c0_i32_0 = arith.constant 0 : i32
    %c0_i32_1 = arith.constant 0 : i32
    return %c0_i32, %c0_i32_0 : i32, i32
  }
  func.func @transform_8(%arg0: i32) -> (i32, i32) {
    %c0_i32 = arith.constant 0 : i32
    %c0_i32_0 = arith.constant 0 : i32
    %c0_i32_1 = arith.constant 0 : i32
    return %c0_i32, %c0_i32_0 : i32, i32
  }
  func.func @transform_9(%arg0: i32) -> (i32, i32) {
    %c0_i32 = arith.constant 0 : i32
    %c0_i32_0 = arith.constant 0 : i32
    %c0_i32_1 = arith.constant 0 : i32
    return %c0_i32, %c0_i32_0 : i32, i32
  }
  func.func @transform_10(%arg0: i32) -> (i32, i32) {
    %c0_i32 = arith.constant 0 : i32
    %c0_i32_0 = arith.constant 0 : i32
    %c0_i32_1 = arith.constant 0 : i32
    return %c0_i32, %c0_i32_0 : i32, i32
  }
  func.func @transform_11(%arg0: i32) -> (i32, i32) {
    %c0_i32 = arith.constant 0 : i32
    %c0_i32_0 = arith.constant 0 : i32
    %c0_i32_1 = arith.constant 0 : i32
    return %c0_i32, %c0_i32_0 : i32, i32
  }
  func.func @transform_12(%arg0: i32) -> (i32, i32) {
    %c0_i32 = arith.constant 0 : i32
    %c0_i32_0 = arith.constant 0 : i32
    %c0_i32_1 = arith.constant 0 : i32
    return %c0_i32, %c0_i32_0 : i32, i32
  }
  func.func @transform_13(%arg0: i32) -> (i32, i32) {
    %c0_i32 = arith.constant 0 : i32
    %c0_i32_0 = arith.constant 0 : i32
    %c0_i32_1 = arith.constant 0 : i32
    return %c0_i32, %c0_i32_0 : i32, i32
  }
  func.func @transform_14(%arg0: i32) -> (i32, i32, i32) {
    %c0_i32 = arith.constant 0 : i32
    %c0_i32_0 = arith.constant 0 : i32
    %c0_i32_1 = arith.constant 0 : i32
    return %arg0, %c0_i32, %c0_i32_0 : i32, i32, i32
  }
}

</mosaic_0001>

<bundles_post_ra>
// kernel: tpu_custom_call.1
= control target key start
LH: loop header
LB: loop body
LE: loop exit
PB: predicated region body
PF: predicated region fallthrough
CT: control target
= control target key end

     0   :  { %s5345_s29 = smov 0   ;;  %s8718_s0 = inlined_call_operand.vmem [shape: f32[8,128,25], index: 0, kind: input, shape index: {}]   ;;  %s8719_s1 = inlined_call_operand.vmem [shape: f32[128,128], index: 1, kind: input, shape index: {}]   ;;  %s8720_s2 = inlined_call_operand.vmem [shape: f32[128,1], index: 2, kind: input, shape index: {}]   ;;  %s8721_s3 = inlined_call_operand.vmem [shape: f32[16,128], index: 3, kind: input, shape index: {}]   ;;  %s8722_s4 = inlined_call_operand.vmem [shape: f32[8,16], index: 4, kind: input, shape index: {}]   ;;  %s8723_s5 = inlined_call_operand.vmem [shape: f32[8,1], index: 5, kind: input, shape index: {}]   ;;  %s8724_s6 = inlined_call_operand.vmem [shape: f32[16,200], index: 6, kind: input, shape index: {}]   ;;  %s8725_s7 = inlined_call_operand.vmem [shape: f32[1,200], index: 7, kind: input, shape index: {}]   ;;  %s8726_s8 = inlined_call_operand.vmem [shape: f32[25,200], index: 8, kind: input, shape index: {}]   ;;  %s8727_s9 = inlined_call_operand.vmem [shape: f32[8,200], index: 9, kind: input, shape index: {}]   ;;  %s8728_s10 = inlined_call_operand.vmem [shape: f32[25,25], index: 10, kind: input, shape index: {}]   ;;  %s8729_s11 = inlined_call_operand.vmem [shape: f32[128,200], index: 11, kind: input, shape index: {}]   ;;  %s8730_s12 = inlined_call_operand.vmem [shape: f32[128,1], index: 12, kind: input, shape index: {}]   ;;  %s8731_s13 = inlined_call_operand.vmem [shape: f32[200,25], index: 13, kind: input, shape index: {}]   ;;  %s8732_s14 = inlined_call_operand.vmem [shape: f32[8,128,25], index: 14, kind: output, shape index: {}]  }
   0x1 LB: > { %s4587_s30 = sadd.s32 4294967295, %s5267_s29   ;;  %p4591_p0 = scmp.ge.s32.totalorder %s5267_s29, 1  ;;  %s5267_s29 = sphi %s5345_s29, %s24_s29  }
   0x2   : > { %p414_p1 = scmp.lt.s32.totalorder %s5267_s29, 3 }
   0x4   : > { %p415_p2 = pnand %p4591_p0, %p414_p1 }
   0x6   : > { %418 = sbr.rel (%p415_p2) target bundleno = 3317 (0xcf5), region = 76 }
   0xb   : > { %s4592_s15 = sshll.u32 %s4587_s30, 2  ;;  %v5382_v16 = vld [vmem:[%s8721_s3] sm:$0xff]  ;;  %v5388_v17 = vld [vmem:[%s8721_s3 + $0x8] sm:$0xff]  ;;  %v5269_v19 = vmov 0   ;;  %vm793_vm0 = vcmask 130048   ;;  %v578_v26 = vld [vmem:[%s8720_s2 + $0x30] sm:$0xff] }
   0xc   : > { %p463_p3 = scmp.lt.s32.totalorder %s4592_s15, 7  ;;  %v524_v18 = vld [vmem:[%s8723_s5] sm:$0xff]  ;;  %5045 = vset.pattern.permute.xlu0 %v5269_v19  ;;  %5046 = vset.pattern.permute.xlu1 %v5269_v19  ;;  %v577_v24 = vld [vmem:[%s8720_s2 + $0x28] sm:$0xff]  ;;  %v5428_v27 = vld [vmem:[%s8719_s1 + $0x10] sm:$0xff]  ;;  %vm927_vm1 = vcmask 1040384   ;;  %vm849_vm2 = vcmask 64512  }
   0xd   : > { %790 = vperm.xlu0 %5045, %v524_v18   ;;  %5047 = vset.pattern.permute.xlu2 %v5269_v19  ;;  %v5402_v22 = vld [vmem:[%s8722_s4] sm:$0xff]  ;;  %v5419_v25 = vld [vmem:[%s8719_s1 + $0x8] sm:$0xff]  ;;  %v579_v29 = vld [vmem:[%s8720_s2 + $0x38] sm:$0xff]  ;;  %vm920_vm3 = vcmask 203776   ;;  %vm991_vm4 = vcmask 588800  }
   0xe   : > { %s9355_s15 = smov (!%p463_p3, %s4592_s15), 7  ;;  %v5410_v23 = vld [vmem:[%s8719_s1] sm:$0xff]  ;;  %647 = vperm.xlu1 %5046, %v577_v24   ;;  %v581_v28 = vld [vmem:[%s8720_s2 + $0x48] sm:$0xff]  ;;  %657 = vperm.xlu2 %5047, %v579_v29   ;;  %v5440_v30 = vld [vmem:[%s8719_s1 + $0x18] sm:$0xff] }
   0xf   : > { %s5024_s16 = sshll.u32 %s9355_s15, 7  ;;  %v573_v31 = vld [vmem:[%s8720_s2 + $0x8] sm:$0xff]  ;;  %v580_v32 = vld [vmem:[%s8720_s2 + $0x40] sm:$0xff]  ;;  %v575_v37 = vld [vmem:[%s8720_s2 + $0x18] sm:$0xff] }
  0x10   : > { %s5361_s19 = scalar_lea.vmem %s8718_s0, %s5024_s16  ;;  %v5455_v36 = vld [vmem:[%s8719_s1 + $0x20] sm:$0xff]  ;;  %v5467_v39 = vld [vmem:[%s8719_s1 + $0x28] sm:$0xff]  ;;  %v5473_v40 = vld [vmem:[%s8719_s1 + $0x30] sm:$0xff]  ;;  %s7797_s24 = scalar_lea.vmem %s8732_s14, %s5024_s16 }
  0x11   : > { %v619_v0 = vld [vmem:[%s5361_s19 + $0x78] sm:$0xff]  ;;  %v618_v1 = vld [vmem:[%s5361_s19 + $0x70] sm:$0xff]  ;;  %v617_v2 = vld [vmem:[%s5361_s19 + $0x68] sm:$0xff] }
  0x12   : > { %765 = vmatpush.msra.mxu1 %v619_v0  ;;  %700 = vmatpush.msra.mxu0 %v619_v0  ;;  %v616_v3 = vld [vmem:[%s5361_s19 + $0x60] sm:$0xff]  ;;  %v615_v4 = vld [vmem:[%s5361_s19 + $0x58] sm:$0xff]  ;;  %v614_v5 = vld [vmem:[%s5361_s19 + $0x50] sm:$0xff] }
  0x13   : > { %v613_v6 = vld [vmem:[%s5361_s19 + $0x48] sm:$0xff]  ;;  %v612_v7 = vld [vmem:[%s5361_s19 + $0x40] sm:$0xff]  ;;  %v611_v8 = vld [vmem:[%s5361_s19 + $0x38] sm:$0xff] }
  0x14   : > { %766 = vmatpush.msra.mxu1 %v618_v1  ;;  %701 = vmatpush.msra.mxu0 %v618_v1  ;;  %v610_v9 = vld [vmem:[%s5361_s19 + $0x30] sm:$0xff]  ;;  %v609_v10 = vld [vmem:[%s5361_s19 + $0x28] sm:$0xff]  ;;  %v608_v11 = vld [vmem:[%s5361_s19 + $0x20] sm:$0xff] }
  0x15   : > { %v607_v12 = vld [vmem:[%s5361_s19 + $0x18] sm:$0xff]  ;;  %v606_v13 = vld [vmem:[%s5361_s19 + $0x10] sm:$0xff]  ;;  %v605_v14 = vld [vmem:[%s5361_s19 + $0x8] sm:$0xff] }
  0x16   : > { %767 = vmatpush.msra.mxu1 %v617_v2  ;;  %702 = vmatpush.msra.mxu0 %v617_v2  ;;  %v604_v15 = vld [vmem:[%s5361_s19] sm:$0xff]  ;;  %v574_v41 = vld [vmem:[%s8720_s2 + $0x10] sm:$0xff]  ;;  %v5482_v42 = vld [vmem:[%s8719_s1 + $0x38] sm:$0xff] }
  0x17   : > { %652 = vperm.xlu1 %5046, %v578_v26   ;;  %662 = vperm.xlu2 %5047, %v580_v32   ;;  %v572_v38 = vld [vmem:[%s8720_s2] sm:$0xff]  ;;  %v5497_v45 = vld [vmem:[%s8719_s1 + $0x48] sm:$0xff]  ;;  %v5503_v46 = vld [vmem:[%s8719_s1 + $0x50] sm:$0xff] }
  0x18   : > { %768 = vmatpush.msra.mxu1 %v616_v3  ;;  %703 = vmatpush.msra.mxu0 %v616_v3  ;;  %v5488_v43 = vld [vmem:[%s8719_s1 + $0x40] sm:$0xff]  ;;  %v487_v47 = vld [vmem:[%s8719_s1 + $0x58] sm:$0xff]  ;;  %v582_v49 = vld [vmem:[%s8720_s2 + $0x50] sm:$0xff] }
  0x19   : > { %v576_v44 = vld [vmem:[%s8720_s2 + $0x20] sm:$0xff]  ;;  %v5523_v51 = vld [vmem:[%s8727_s9 + $0x8] sm:$0xff]  ;;  %v497_v60 = vld [vmem:[%s8728_s10 + $0x18] sm:$0x1] }
  0x1a   : > { %769 = vmatpush.msra.mxu1 %v615_v4  ;;  %704 = vmatpush.msra.mxu0 %v615_v4  ;;  %v488_v48 = vld [vmem:[%s8719_s1 + $0x60] sm:$0xff]  ;;  %v583_v61 = vld [vmem:[%s8720_s2 + $0x58] sm:$0xff]  ;;  %v496_v62 = vld [vmem:[%s8728_s10 + $0x10] sm:$0xff] }
  0x1b   : > { %v5518_v50 = vld [vmem:[%s8727_s9] sm:$0xff]  ;;  %v495_v1 = vld [vmem:[%s8728_s10 + $0x8] sm:$0xff]  ;;  %v536_v3 = vld [vmem:[%s8726_s8 + $0x30] sm:$0x1] }
  0x1c   : > { %770 = vmatpush.msra.mxu1 %v614_v5  ;;  %705 = vmatpush.msra.mxu0 %v614_v5  ;;  %v584_v54 = vld [vmem:[%s8720_s2 + $0x60] sm:$0xff]  ;;  %v5565_v4 = vld [vmem:[%s8726_s8 + $0x38] sm:$0x1] }
  0x1d   : > { %5026 = vmatpush.msra.mxu3 %v5518_v50  ;;  %v494_v2 = vld [vmem:[%s8728_s10] sm:$0xff] }
  0x1e   : > { %771 = vmatpush.msra.mxu1 %v613_v6  ;;  %706 = vmatpush.msra.mxu0 %v613_v6  ;;  %v534_v5 = vld [vmem:[%s8726_s8 + $0x20] sm:$0xff] }
  0x1f   : > { %667 = vperm.xlu1 %5046, %v581_v28   ;;  %622 = vperm.xlu2 %5047, %v572_v38  }
  0x20   : > { %772 = vmatpush.msra.mxu1 %v612_v7  ;;  %707 = vmatpush.msra.mxu0 %v612_v7  ;;  %v5578_v7 = vld [vmem:[%s8726_s8 + $0x28] sm:$0xff] }
  0x21   : > { %4607 = vmatpush.msk.msrb.mxu3 %vm927_vm1, %v536_v3  ;;  %v586_v3 = vld [vmem:[%s8720_s2 + $0x70] sm:$0xff] }
  0x22   : > { %773 = vmatpush.msra.mxu1 %v611_v8  ;;  %708 = vmatpush.msra.mxu0 %v611_v8  ;;  %v532_v8 = vld [vmem:[%s8726_s8 + $0x10] sm:$0xff] }
  0x23   : > { %947 = vmatpush.msrb.mxu3 %v534_v5 }
  0x24   : > { %774 = vmatpush.msra.mxu1 %v610_v9  ;;  %709 = vmatpush.msra.mxu0 %v610_v9  ;;  %v5586_v9 = vld [vmem:[%s8726_s8 + $0x18] sm:$0xff] }
  0x25   : > { %948 = vmatpush.msrb.mxu3 %v532_v8 }
  0x26   : > { %775 = vmatpush.msra.mxu1 %v609_v10  ;;  %710 = vmatpush.msra.mxu0 %v609_v10 }
  0x27   : > { %627 = vperm.xlu1 %5046, %v573_v31   ;;  %632 = vperm.xlu2 %5047, %v574_v41  }
  0x28   : > { %776 = vmatpush.msra.mxu1 %v608_v11  ;;  %711 = vmatpush.msra.mxu0 %v608_v11 }
  0x2a   : > { %777 = vmatpush.msra.mxu1 %v607_v12  ;;  %712 = vmatpush.msra.mxu0 %v607_v12  ;;  %v530_v12 = vld [vmem:[%s8726_s8] sm:$0xff] }
  0x2b   : > { %949 = vmatpush.msrb.mxu3 %v530_v12 }
  0x2c   : > { %778 = vmatpush.msra.mxu1 %v606_v13  ;;  %713 = vmatpush.msra.mxu0 %v606_v13  ;;  %v5600_v13 = vld [vmem:[%s8726_s8 + $0x8] sm:$0xff] }
  0x2e   : > { %779 = vmatpush.msra.mxu1 %v605_v14  ;;  %714 = vmatpush.msra.mxu0 %v605_v14 }
  0x2f   : > { %637 = vperm.xlu1 %5046, %v575_v37   ;;  %642 = vperm.xlu2 %5047, %v576_v44  }
  0x30   : > { %780 = vmatpush.msra.mxu1 %v604_v15  ;;  %715 = vmatpush.msra.mxu0 %v604_v15 }
  0x31   : > { %781 = vmatmul.f32.vlgmr.msra.gmra.mxu1 %v5382_v16  ;;  %716 = vmatmul.f32.vlgmr.msra.gmra.mxu0 %v5410_v23 }
  0x32   : > { %877 = vmatpush.msrb.mxu1 %v5518_v50 }
  0x34   : > { %4613 = vmatpush.msk.msra.mxu1 %vm927_vm1, %v497_v60  ;;  %v585_v60 = vld [vmem:[%s8720_s2 + $0x68] sm:$0xff] }
  0x36   : > { %1234 = vmatpush.msra.mxu1 %v496_v62  ;;  %v587_v62 = vld [vmem:[%s8720_s2 + $0x78] sm:$0xff] }
  0x37   : > { %672 = vperm.xlu1 %5046, %v582_v49   ;;  %677 = vperm.xlu2 %5047, %v583_v61  }
  0x38   : > { %1235 = vmatpush.msra.mxu1 %v495_v1 }
  0x39   : > { %784 = vmatmul.f32.gmra.mxu1 %v5388_v17  ;;  %719 = vmatmul.f32.gmra.mxu0 %v5419_v25 }
  0x3a   : > { %1236 = vmatpush.msra.mxu1 %v494_v2 }
  0x3f   : > { %687 = vperm.xlu1 %5046, %v585_v60   ;;  %692 = vperm.xlu2 %5047, %v586_v3   ;;  %v526_v3 = vld [vmem:[%s8724_s6 + $0x8] sm:$0xff] }
  0x41   : > { %722 = vmatmul.f32.gmra.mxu0 %v5428_v27 }
  0x47   : > { %697 = vperm.xlu1 %5046, %v587_v62  }
  0x49   : > { %725 = vmatmul.f32.gmra.mxu0 %v5440_v30 }
  0x51   : > { %728 = vmatmul.f32.gmra.mxu0 %v5455_v36 }
  0x59   : > { %731 = vmatmul.f32.gmra.mxu0 %v5467_v39 }
  0x61   : > { %734 = vmatmul.f32.gmra.mxu0 %v5473_v40 }
  0x68   : > { %v5537_v57 = vpop.permute.xlu2 %657 }
  0x69   : > { %737 = vmatmul.f32.gmra.mxu0 %v5482_v42  ;;  %8851 = vst [vmem:[#allocation4_spill] sm:$0xff] %v5537_v57 }
  0x71   : > { %740 = vmatmul.f32.gmra.mxu0 %v5488_v43  ;;  %v5551_v63 = vpop.permute.xlu2 %662 }
  0x72   : > { %8853 = vst [vmem:[#allocation6_spill] sm:$0xff] %v5551_v63 }
  0x79   : > { %743 = vmatmul.f32.gmra.mxu0 %v5497_v45  ;;  %v5588_v10 = vpop.permute.xlu2 %622 }
  0x7a   : > { %8855 = vst [vmem:[#allocation8_spill] sm:$0xff] %v5588_v10 }
  0x7f   : > { %v5449_v33 = vpop.permute.xlu0 %790 }
  0x80   : > { %8849 = vst [vmem:[#allocation2_spill] sm:$0xff] %v5449_v33  ;;  %v5535_v56 = vpop.permute.xlu1 %647 }
  0x81   : > { %746 = vmatmul.f32.gmra.mxu0 %v5503_v46  ;;  %8850 = vst [vmem:[#allocation3_spill] sm:$0xff] %v5535_v56  ;;  %v5607_v18 = vpop.permute.xlu2 %632 }
  0x82   : > { %8857 = vst [vmem:[#allocation10_spill] sm:$0xff] %v5607_v18 }
  0x89   : > { %749 = vmatmul.f32.gmra.mxu0 %v487_v47  ;;  %v5539_v59 = vpop.permute.xlu1 %652  ;;  %v5625_v37 = vpop.permute.xlu2 %642 }
  0x8a   : > { %8852 = vst [vmem:[#allocation5_spill] sm:$0xff] %v5539_v59 }
  0x8b   : > { %8859 = vst [vmem:[#allocation12_spill] sm:$0xff] %v5625_v37 }
  0x91   : > { %752 = vmatmul.f32.gmra.mxu0 %v488_v48  ;;  %v5570_v6 = vpop.permute.xlu1 %667 }
  0x92   : > { %8854 = vst [vmem:[#allocation7_spill] sm:$0xff] %v5570_v6 }
  0x99   : > { %v5605_v15 = vpop.permute.xlu1 %627 }
  0x9a   : > { %8856 = vst [vmem:[#allocation9_spill] sm:$0xff] %v5605_v15 }
  0xa1   : > { %v5616_v29 = vpop.permute.xlu1 %637 }
  0xa2   : > { %8858 = vst [vmem:[#allocation11_spill] sm:$0xff] %v5616_v29 }
  0xae   : > { %v5394_v20 = vpop.f32.mrf.mxu1  ;;  %v5528_v52 = vpop.f32.mrf.mxu0 }
  0xaf   : > { %v5629_v38 = vadd.f32 %v5528_v52, %v5588_v10 }
  0xb1   : > { %8860 = vst [vmem:[#allocation13_spill] sm:$0xff] %v5629_v38 }
  0xb6   : > { %v5396_v21 = vpop.f32.mrf.mxu1  ;;  %v5530_v53 = vpop.f32.mrf.mxu0 }
  0xb7   : > { %811 = vmatpush.msra.mxu2 %v5396_v21  ;;  %v5642_v49 = vadd.f32 %v5530_v53, %v5605_v15 }
  0xb9   : > { %812 = vmatpush.msra.mxu2 %v5394_v20  ;;  %8861 = vst [vmem:[#allocation14_spill] sm:$0xff] %v5642_v49 }
  0xba   : > { %4598 = vmatmul.msk.f32.vlgmr.msra.gmra.mxu2 %vm793_vm0, %v5402_v22 }
  0xbb   : > { %906 = vmatpush.msrb.mxu2 %v5523_v51 }
  0xbd   : > { %4610 = vmatpush.msk.msra.mxu2 %vm927_vm1, %v5565_v4 }
  0xbe   : > { %v723_v55 = vpop.f32.mrf.mxu0 }
  0xbf   : > { %970 = vmatpush.msra.mxu2 %v5578_v7  ;;  %v5610_v26 = vadd.f32 %v723_v55, %v5607_v18 }
  0xc1   : > { %971 = vmatpush.msra.mxu2 %v5586_v9  ;;  %v1032_v28 = vsel %vm920_vm3, %v5610_v26, 0.0 }
  0xc3   : > { %972 = vmatpush.msra.mxu2 %v5600_v13 }
  0xc6   : > { %v726_v58 = vpop.f32.mrf.mxu0 }
  0xc7   : > { %v5619_v32 = vadd.f32 %v726_v58, %v5616_v29 }
  0xce   : > { %v729_v0 = vpop.f32.mrf.mxu0 }
  0xcf   : > { %v5632_v44 = vadd.f32 %v729_v0, %v5625_v37 }
  0xd1   : > { %v1038_v47 = vsel %vm920_vm3, %v5632_v44, 0.0 }
  0xd6   : > { %v5590_v11 = vpop.f32.mrf.mxu0 }
  0xd7   : > { %v5696_v0 = vadd.f32 %v5590_v11, %v5535_v56 }
  0xd9   : > { %8865 = vst [vmem:[#allocation18_spill] sm:$0xff] %v5696_v0 }
  0xde   : > { %v735_v19 = vpop.f32.mrf.mxu0 }
  0xdf   : > { %v5645_v52 = vadd.f32 %v735_v19, %v5539_v59 }
  0xe1   : > { %v1044_v53 = vsel %vm920_vm3, %v5645_v52, 0.0 }
 0x13d   : > { %v814_v34 = vpop.f32.mrf.mxu2 }
 0x13e   : > { %v815_v35 = vadd.f32 %v814_v34, %v5449_v33  ;;  %v738_v34 = vpop.f32.mrf.mxu0 }
 0x13f   : > { %v5706_v5 = vadd.f32 %v738_v34, %v5537_v57 }
 0x140   : > { %817 = vxpose.xlu0.b32.start.end [1/1] (short) (narrow) %v815_v35, 32  ;;  %v1035_v35 = vsel %vm920_vm3, %v5619_v32, 0.0 }
 0x141   : > { %8866 = vst [vmem:[#allocation19_spill] sm:$0xff] %v5706_v5 }
 0x146   : > { %v741_v48 = vpop.f32.mrf.mxu0 }
 0x14e   : > { %v744_v55 = vpop.f32.mrf.mxu0 }
 0x14f   : > { %v5662_v58 = vadd.f32 %v744_v55, %v5570_v6 }
 0x151   : > { %v1053_v61 = vsel %vm920_vm3, %v5662_v58, 0.0 }
 0x156   : > { %v747_v1 = vpop.f32.mrf.mxu0 }
 0x15e   : > { %v750_v2 = vpop.f32.mrf.mxu0 }
 0x166   : > { %v753_v8 = vpop.f32.mrf.mxu0 }
 0x1c6   : > { %682 = vperm.xlu0 %5045, %v584_v54   ;;  %v5656_v54 = vld [vmem:[%s8719_s1 + $0x68] sm:$0xff] }
 0x1c7   : > { %8862 = vst [vmem:[#allocation15_spill] sm:$0xff] %v5656_v54  ;;  %755 = vmatmul.f32.gmra.mxu0 %v5656_v54 }
 0x1e4   : > { %v833_v14 = vpop.trf.xlu0 }
 0x1e5   : > { %4599 = vmatmul.msk.f32.vlgmr.msrb.gmra.mxu1 %vm849_vm2, %v833_v14  ;;  %4603 = vmatmul.msk.f32.vlgmr.msrb.gmra.mxu2 %vm849_vm2, %v833_v14  ;;  %v5716_v14 = vadd.f32 %v741_v48, %v5551_v63 }
 0x1e7   : > { %8868 = vst [vmem:[#allocation21_spill] sm:$0xff] %v5716_v14 }
 0x1ec   : > { %v834_v24 = vpop.trf.xlu0 }
 0x1ed   : > { %4600 = vmatmul.msk.f32.gmra.mxu1 %vm849_vm2, %v834_v24  ;;  %4604 = vmatmul.msk.f32.gmra.mxu2 %vm849_vm2, %v834_v24  ;;  %v5724_v24 = vpop.permute.xlu1 %672 }
 0x1ee   : > { %8869 = vst [vmem:[#allocation22_spill] sm:$0xff] %v5724_v24 }
 0x1f0   : > { %1033 = vadd.xlane.f32.xlu0 %v1032_v28  ;;  %v5727_v28 = vadd.f32 %v747_v1, %v5724_v24  ;;  %v5770_v24 = vld [vmem:[%s8724_s6 + $0x18] sm:$0xff] }
 0x1f1   : > { %8877 = vst [vmem:[#allocation30_spill] sm:$0xff] %v5770_v24 }
 0x1f2   : > { %8870 = vst [vmem:[#allocation23_spill] sm:$0xff] %v5727_v28 }
 0x1f4   : > { %v835_v31 = vpop.trf.xlu0 }
 0x1f5   : > { %4601 = vmatmul.msk.f32.gmra.mxu1 %vm849_vm2, %v835_v31  ;;  %4605 = vmatmul.msk.f32.gmra.mxu2 %vm849_vm2, %v835_v31  ;;  %v5731_v31 = vpop.permute.xlu2 %677  ;;  %v5746_v55 = vpop.permute.xlu1 %687 }
 0x1f6   : > { %8871 = vst [vmem:[#allocation24_spill] sm:$0xff] %v5731_v31  ;;  %v5734_v34 = vadd.f32 %v750_v2, %v5731_v31 }
 0x1f7   : > { %8873 = vst [vmem:[#allocation26_spill] sm:$0xff] %v5746_v55 }
 0x1f8   : > { %1036 = vadd.xlane.f32.xlu0 %v1035_v35  ;;  %8872 = vst [vmem:[#allocation25_spill] sm:$0xff] %v5734_v34 }
 0x1fc   : > { %v836_v41 = vpop.trf.xlu0 }
 0x1fd   : > { %4602 = vmatmul.msk.f32.vlgmr.msra.gmra.mxu3 %vm849_vm2, %v836_v41  ;;  %4606 = vmatmul.msk.f32.gmra.mxu2 %vm849_vm2, %v836_v41  ;;  %v5753_v2 = vpop.permute.xlu2 %692  ;;  %v5777_v57 = vpop.permute.xlu1 %697 }
 0x1fe   : > { %4614 = vmatmul.msk.f32.vlgmr.msra.gmra.mxu1 %vm920_vm3, %v5629_v38  ;;  %8875 = vst [vmem:[#allocation28_spill] sm:$0xff] %v5753_v2 }
 0x1ff   : > { %8878 = vst [vmem:[#allocation31_spill] sm:$0xff] %v5777_v57 }
 0x200   : > { %1039 = vadd.xlane.f32.xlu0 %v1038_v47 }
 0x205   : > { %4608 = vmatmul.msk.f32.vlgmr.msrb.gmra.mxu3 %vm920_vm3, %v5394_v20  ;;  %4611 = vmatmul.msk.f32.vlgmr.msra.gmra.mxu2 %vm920_vm3, %v5394_v20  ;;  %v5673_v20 = vld [vmem:[%s8719_s1 + $0x70] sm:$0xff] }
 0x206   : > { %4615 = vmatmul.msk.f32.gmra.mxu1 %vm920_vm3, %v5642_v49  ;;  %8863 = vst [vmem:[#allocation16_spill] sm:$0xff] %v5673_v20  ;;  %758 = vmatmul.f32.gmra.mxu0 %v5673_v20 }
 0x208   : > { %1045 = vadd.xlane.f32.xlu0 %v1044_v53 }
 0x20d   : > { %4609 = vmatmul.msk.f32.gmra.mxu3 %vm920_vm3, %v5396_v21  ;;  %4612 = vmatmul.msk.f32.gmra.mxu2 %vm920_vm3, %v5396_v21  ;;  %v5686_v21 = vld [vmem:[%s8719_s1 + $0x78] sm:$0xff] }
 0x20e   : > { %4616 = vmatmul.msk.f32.gmra.mxu1 %vm920_vm3, %v5610_v26  ;;  %8864 = vst [vmem:[#allocation17_spill] sm:$0xff] %v5686_v21  ;;  %761 = vmatmul.f32.gmra.mxu0 %v5686_v21 }
 0x210   : > { %1054 = vadd.xlane.f32.xlu0 %v1053_v61 }
 0x216   : > { %4617 = vmatmul.msk.f32.gmra.mxu1 %vm920_vm3, %v5619_v32 }
 0x21e   : > { %4618 = vmatmul.msk.f32.gmra.mxu1 %vm920_vm3, %v5632_v44 }
 0x226   : > { %4619 = vmatmul.msk.f32.gmra.mxu1 %vm920_vm3, %v5696_v0 }
 0x22e   : > { %4620 = vmatmul.msk.f32.gmra.mxu1 %vm920_vm3, %v5645_v52 }
 0x236   : > { %4621 = vmatmul.msk.f32.gmra.mxu1 %vm920_vm3, %v5706_v5 }
 0x238   : > { %v5710_v11 = vpop.permute.xlu0 %682 }
 0x239   : > { %8867 = vst [vmem:[#allocation20_spill] sm:$0xff] %v5710_v11  ;;  %v5713_v12 = vadd.f32 %v753_v8, %v5710_v11  ;;  %v527_v11 = vld [vmem:[%s8724_s6 + $0x10] sm:$0xff] }
 0x23b   : > { %v1062_v19 = vsel %vm920_vm3, %v5713_v12, 0.0 }
 0x23c   : > { %1063 = vadd.xlane.f32.xlu0 %v1062_v19 }
 0x23e   : > { %4622 = vmatmul.msk.f32.gmra.mxu1 %vm920_vm3, %v5716_v14 }
 0x244   : > { %v756_v60 = vpop.f32.mrf.mxu0 }
 0x245   : > { %v5749_v61 = vadd.f32 %v756_v60, %v5746_v55  ;;  %v525_v60 = vld [vmem:[%s8724_s6] sm:$0xff] }
 0x246   : > { %4623 = vmatmul.msk.f32.gmra.mxu1 %vm920_vm3, %v5662_v58 }
 0x247   : > { %8874 = vst [vmem:[#allocation27_spill] sm:$0xff] %v5749_v61 }
 0x24e   : > { %4624 = vmatmul.msk.f32.gmra.mxu1 %vm920_vm3, %v5727_v28 }
 0x256   : > { %4625 = vmatmul.msk.f32.gmra.mxu1 %vm920_vm3, %v5734_v34 }
 0x25e   : > { %4626 = vmatmul.msk.f32.gmra.mxu1 %vm920_vm3, %v5713_v12 }
 0x262   : > { %v879_v63 = vpop.f32.mrf.mxu1 }
 0x266   : > { %4627 = vmatmul.msk.f32.gmra.mxu1 %vm920_vm3, %v5749_v61 }
 0x268   : > { %v5740_v35 = vpop.f32.mrf.mxu2 }
 0x270   : > { %v5742_v41 = vpop.f32.mrf.mxu2 }
 0x278   : > { %v5744_v47 = vpop.f32.mrf.mxu2 }
 0x280   : > { %v888_v48 = vpop.f32.mrf.mxu3  ;;  %v917_v53 = vpop.f32.mrf.mxu2 }
 0x283   : > { %v759_v8 = vpop.f32.mrf.mxu0 }
 0x284   : > { %v5759_v19 = vadd.f32 %v759_v8, %v5753_v2 }
 0x286   : > { %8876 = vst [vmem:[#allocation29_spill] sm:$0xff] %v5759_v19  ;;  %4628 = vmatmul.msk.f32.gmra.mxu1 %vm920_vm3, %v5759_v19 }
 0x288   : > { %v951_v62 = vpop.f32.mrf.mxu3  ;;  %v974_v1 = vpop.f32.mrf.mxu2 }
 0x289   : > { %v981_v59 = vmul.f32 %v974_v1, %v526_v3  ;;  %v980_v37 = vmul.f32 %v951_v62, %v525_v60 }
 0x28b   : > { %v992_v55 = vsel %vm991_vm4, %v981_v59, 0.0  ;;  %v762_v29 = vpop.f32.mrf.mxu0 }
 0x28c   : > { %v5780_v3 = vadd.f32 %v762_v29, %v5777_v57 }
 0x28e   : > { %4629 = vmatmul.msk.f32.gmra.mxu1 %vm920_vm3, %v5780_v3  ;;  %v1071_v59 = vsel %vm920_vm3, %v5780_v3, 0.0 }
 0x28f   : > { %1072 = vadd.xlane.f32.xlu0 %v1071_v59 }
 0x290   : > { %v954_v8 = vpop.f32.mrf.mxu3  ;;  %v977_v2 = vpop.f32.mrf.mxu2 }
 0x291   : > { %v982_v18 = vmul.f32 %v954_v8, %v527_v11  ;;  %v983_v10 = vmul.f32 %v977_v2, %v5770_v24 }
 0x293   : > { %v984_v31 = vadd.f32 %v982_v18, %v980_v37  ;;  %v993_v6 = vsel %vm991_vm4, %v983_v10, 0.0  ;;  %v882_v10 = vpop.f32.mrf.mxu1 }
 0x294   : > { %v994_v56 = vadd.f32 %v993_v6, %v992_v55  ;;  %v529_v6 = vld [vmem:[%s8725_s7] sm:$0x3] }
 0x295   : > { %v985_v1 = vrot.slane %v984_v31, 4  ;;  %v5789_v2 = vperm.slane %v529_v6, 0  ;;  %v5791_v60 = vperm.slane %v529_v6, 1 }
 0x296   : > { %v995_v33 = vrot.slane %v994_v56, 4 }
 0x297   : > { %v986_v15 = vadd.f32 %v985_v1, %v984_v31 }
 0x298   : > { %v996_v11 = vadd.f32 %v995_v33, %v994_v56 }
 0x299   : > { %v987_v18 = vrot.slane %v986_v15, 2 }
 0x29a   : > { %v997_v37 = vrot.slane %v996_v11, 2 }
 0x29b   : > { %v988_v55 = vadd.f32 %v987_v18, %v986_v15  ;;  %v885_v24 = vpop.f32.mrf.mxu1 }
 0x29c   : > { %v998_v29 = vadd.f32 %v997_v37, %v996_v11 }
 0x29d   : > { %v989_v62 = vrot.slane %v988_v55, 1 }
 0x29e   : > { %v999_v31 = vrot.slane %v998_v29, 1 }
 0x29f   : > { %v990_v33 = vadd.f32 %v989_v62, %v988_v55  ;;  %v4689_v62 = vld [vmem:[%s5361_s19 + $0xc8] sm:$0xff] }
 0x2a0   : > { %v1000_v56 = vadd.f32 %v999_v31, %v998_v29  ;;  %v4688_v31 = vld [vmem:[%s5361_s19 + $0xc0] sm:$0xff] }
 0x2a1   : > { %v1006_v8 = vadd.f32 %v5789_v2, %v990_v33  ;;  %v4687_v33 = vld [vmem:[%s5361_s19 + $0xb8] sm:$0xff] }
 0x2a2   : > { %v1007_v1 = vadd.f32 %v5791_v60, %v1000_v56  ;;  %v4686_v56 = vld [vmem:[%s5361_s19 + $0xb0] sm:$0xff] }
 0x2a3   : > { %v1008_v59 = vperm.slane %v1006_v8, 0  ;;  %v4685_v8 = vld [vmem:[%s5361_s19 + $0xa8] sm:$0xff] }
 0x2a4   : > { %v1009_v57 = vperm.slane %v1007_v1, 0  ;;  %v4684_v1 = vld [vmem:[%s5361_s19 + $0xa0] sm:$0xff] }
 0x2a5   : > { %v1016_v21 = vsub.f32 %v1008_v59, %v888_v48  ;;  %v1014_v20 = vsub.f32 %v1008_v59, %v885_v24  ;;  %v1012_v11 = vsub.f32 %v1008_v59, %v882_v10  ;;  %v1010_v6 = vsub.f32 %v1008_v59, %v879_v63  ;;  %v4692_v48 = vld [vmem:[%s5361_s19 + $0xe0] sm:$0xff]  ;;  %v4690_v10 = vld [vmem:[%s5361_s19 + $0xd0] sm:$0xff]  ;;  %v4683_v59 = vld [vmem:[%s5361_s19 + $0x98] sm:$0xff] }
 0x2a6   : > { %v1017_v54 = vsub.f32 %v1009_v57, %v917_v53  ;;  %v1015_v15 = vsub.f32 %v1009_v57, %v5744_v47  ;;  %v1013_v18 = vsub.f32 %v1009_v57, %v5742_v41  ;;  %v1011_v37 = vsub.f32 %v1009_v57, %v5740_v35  ;;  %v4695_v35 = vld [vmem:[%s5361_s19 + $0xf8] sm:$0xff]  ;;  %v4694_v41 = vld [vmem:[%s5361_s19 + $0xf0] sm:$0xff]  ;;  %v4693_v47 = vld [vmem:[%s5361_s19 + $0xe8] sm:$0xff] }
 0x2a7   : > { %5048 = vtanh.f32 %v1016_v21  ;;  %v4691_v53 = vld [vmem:[%s5361_s19 + $0xd8] sm:$0xff] }
 0x2a8   : > { %5050 = vtanh.f32 %v1017_v54 }
 0x2a9   : > { %5052 = vtanh.f32 %v1014_v20 }
 0x2aa   : > { %5054 = vtanh.f32 %v1015_v15  ;;  %v4681_v15 = vld [vmem:[%s5361_s19 + $0x88] sm:$0xff] }
 0x2ab   : > { %5056 = vtanh.f32 %v1012_v11  ;;  %v4680_v11 = vld [vmem:[%s5361_s19 + $0x80] sm:$0xff] }
 0x2ac   : > { %5058 = vtanh.f32 %v1013_v18  ;;  %v5900_v18 = vld [vmem:[%s8731_s13 + $0x50] sm:$0xff] }
 0x2ad   : > { %v5049_v55 = vpop.eup %5048  ;;  %5060 = vtanh.f32 %v1010_v6  ;;  %v5905_v6 = vld [vmem:[%s8731_s13 + $0xb8] sm:$0xff] }
 0x2ae   : > { %v5051_v29 = vpop.eup %5050  ;;  %4630 = vmatpush.msk.msra.mxu3 %vm927_vm1, %v5049_v55  ;;  %5062 = vtanh.f32 %v1011_v37  ;;  %v5912_v37 = vld [vmem:[%s8731_s13 + $0x48] sm:$0xff]  ;;  %v5917_v55 = vld [vmem:[%s8731_s13 + $0xb0] sm:$0xff] }
 0x2af   : > { %v5053_v24 = vpop.eup %5052  ;;  %4647 = vmatpush.msk.msrb.mxu0 %vm927_vm1, %v5051_v29  ;;  %5027 = vmatpush.msk.msrb.mxu2 %vm927_vm1, %v5051_v29 }
 0x2b0   : > { %v5055_v54 = vpop.eup %5054  ;;  %1305 = vmatpush.msra.mxu3 %v5053_v24  ;;  %v5929_v24 = vld [vmem:[%s8731_s13 + $0xa8] sm:$0xff] }
 0x2b1   : > { %v5057_v63 = vpop.eup %5056  ;;  %1370 = vmatpush.msrb.mxu0 %v5055_v54  ;;  %5029 = vmatpush.msrb.mxu2 %v5055_v54 }
 0x2b2   : > { %v5059_v57 = vpop.eup %5058  ;;  %1306 = vmatpush.msra.mxu3 %v5057_v63  ;;  %v5945_v63 = vld [vmem:[%s8731_s13 + $0xa0] sm:$0xff] }
 0x2b3   : > { %v5061_v20 = vpop.eup %5060  ;;  %1371 = vmatpush.msrb.mxu0 %v5059_v57  ;;  %5031 = vmatpush.msrb.mxu2 %v5059_v57 }
 0x2b4   : > { %v5063_v21 = vpop.eup %5062  ;;  %1307 = vmatpush.msra.mxu3 %v5061_v20  ;;  %v5955_v20 = vld [vmem:[%s8731_s13 + $0x98] sm:$0xff] }
 0x2b5   : > { %4631 = vmatmul.msk.f32.vlgmr.msra.gmra.mxu3 %vm920_vm3, %v5629_v38  ;;  %1372 = vmatpush.msrb.mxu0 %v5063_v21 }
 0x2b6   : > { %5028 = vmatpush.msk.msrb.mxu3 %vm927_vm1, %v5051_v29  ;;  %5033 = vmatpush.msrb.mxu2 %v5063_v21  ;;  %v5922_v29 = vld [vmem:[%s8731_s13 + $0x40] sm:$0xff] }
 0x2b7   : > { %4648 = vmatmul.msk.f32.vlgmr.msrb.gmra.mxu0 %vm920_vm3, %v5629_v38  ;;  %4653 = vmatmul.msk.f32.vlgmr.msrb.gmra.mxu2 %vm920_vm3, %v5696_v0 }
 0x2b8   : > { %5030 = vmatpush.msrb.mxu3 %v5055_v54  ;;  %1746 = vmatpush.msra.mxu2 %v4695_v35  ;;  %v5934_v54 = vld [vmem:[%s8731_s13 + $0x38] sm:$0xff] }
 0x2ba   : > { %5032 = vmatpush.msrb.mxu3 %v5059_v57  ;;  %1747 = vmatpush.msra.mxu2 %v4694_v41  ;;  %v5950_v57 = vld [vmem:[%s8731_s13 + $0x30] sm:$0xff] }
 0x2bc   : > { %5034 = vmatpush.msrb.mxu3 %v5063_v21  ;;  %1748 = vmatpush.msra.mxu2 %v4693_v47  ;;  %v5962_v21 = vld [vmem:[%s8731_s13 + $0x28] sm:$0xff] }
 0x2bd   : > { %4632 = vmatmul.msk.f32.gmra.mxu3 %vm920_vm3, %v5642_v49 }
 0x2be   : > { %1749 = vmatpush.msra.mxu2 %v4692_v48  ;;  %1681 = vmatpush.msra.mxu3 %v4695_v35  ;;  %v5967_v35 = vld [vmem:[%s8731_s13 + $0x90] sm:$0xff] }
 0x2bf   : > { %4649 = vmatmul.msk.f32.gmra.mxu0 %vm920_vm3, %v5642_v49  ;;  %4654 = vmatmul.msk.f32.gmra.mxu2 %vm920_vm3, %v5645_v52 }
 0x2c0   : > { %1750 = vmatpush.msra.mxu2 %v4691_v53  ;;  %1682 = vmatpush.msra.mxu3 %v4694_v41  ;;  %v5972_v41 = vld [vmem:[%s8731_s13 + $0x20] sm:$0xff] }
 0x2c2   : > { %1751 = vmatpush.msra.mxu2 %v4690_v10  ;;  %1683 = vmatpush.msra.mxu3 %v4693_v47  ;;  %v5983_v47 = vld [vmem:[%s8731_s13 + $0x88] sm:$0xff] }
 0x2c4   : > { %1752 = vmatpush.msra.mxu2 %v4689_v62  ;;  %1684 = vmatpush.msra.mxu3 %v4692_v48  ;;  %v5988_v48 = vld [vmem:[%s8731_s13 + $0x18] sm:$0xff] }
 0x2c5   : > { %4633 = vmatmul.msk.f32.gmra.mxu3 %vm920_vm3, %v5610_v26 }
 0x2c6   : > { %1753 = vmatpush.msra.mxu2 %v4688_v31  ;;  %1685 = vmatpush.msra.mxu3 %v4691_v53  ;;  %v5993_v53 = vld [vmem:[%s8731_s13 + $0x80] sm:$0xff] }
 0x2c7   : > { %4650 = vmatmul.msk.f32.gmra.mxu0 %vm920_vm3, %v5610_v26  ;;  %4655 = vmatmul.msk.f32.gmra.mxu2 %vm920_vm3, %v5706_v5  ;;  %v4682_v26 = vld [vmem:[%s5361_s19 + $0x90] sm:$0xff] }
 0x2c8   : > { %1754 = vmatpush.msra.mxu2 %v4687_v33  ;;  %1686 = vmatpush.msra.mxu3 %v4690_v10  ;;  %v6000_v10 = vld [vmem:[%s8731_s13 + $0x10] sm:$0xff] }
 0x2ca   : > { %1755 = vmatpush.msra.mxu2 %v4686_v56  ;;  %1687 = vmatpush.msra.mxu3 %v4689_v62  ;;  %v6007_v62 = vld [vmem:[%s8731_s13 + $0x8] sm:$0xff] }
 0x2cc   : > { %1756 = vmatpush.msra.mxu2 %v4685_v8  ;;  %1688 = vmatpush.msra.mxu3 %v4688_v31  ;;  %v6013_v31 = vld [vmem:[%s8731_s13] sm:$0xff] }
 0x2cd   : > { %4634 = vmatmul.msk.f32.gmra.mxu3 %vm920_vm3, %v5619_v32 }
 0x2ce   : > { %1757 = vmatpush.msra.mxu2 %v4684_v1  ;;  %1689 = vmatpush.msra.mxu3 %v4687_v33  ;;  %v6030_v33 = vld [vmem:[%s8729_s11 + $0x8] sm:$0xff] }
 0x2cf   : > { %4651 = vmatmul.msk.f32.gmra.mxu0 %vm920_vm3, %v5619_v32  ;;  %4656 = vmatmul.msk.f32.gmra.mxu2 %vm920_vm3, %v5716_v14  ;;  %v5861_v32 = vld [vmem:[%s8731_s13 + $0x78] sm:$0xff] }
 0x2d0   : > { %1758 = vmatpush.msra.mxu2 %v4683_v59  ;;  %1690 = vmatpush.msra.mxu3 %v4686_v56 }
 0x2d1   : > { %1502 = vmatpush.msra.mxu0 %v5861_v32 }
 0x2d2   : > { %1759 = vmatpush.msra.mxu2 %v4682_v26  ;;  %1691 = vmatpush.msra.mxu3 %v4685_v8 }
 0x2d4   : > { %1760 = vmatpush.msra.mxu2 %v4681_v15  ;;  %1692 = vmatpush.msra.mxu3 %v4684_v1  ;;  %v6047_v1 = vld [vmem:[%s8729_s11 + $0x18] sm:$0xff] }
 0x2d5   : > { %4635 = vmatmul.msk.f32.gmra.mxu3 %vm920_vm3, %v5632_v44 }
 0x2d6   : > { %1761 = vmatpush.msra.mxu2 %v4680_v11  ;;  %1693 = vmatpush.msra.mxu3 %v4683_v59 }
 0x2d7   : > { %4652 = vmatmul.msk.f32.gmra.mxu0 %vm920_vm3, %v5632_v44  ;;  %4657 = vmatmul.msk.f32.gmra.mxu2 %vm920_vm3, %v5662_v58  ;;  %v5880_v44 = vld [vmem:[%s8731_s13 + $0x60] sm:$0xff] }
 0x2d8   : > { %1694 = vmatpush.msra.mxu3 %v4682_v26 }
 0x2da   : > { %1695 = vmatpush.msra.mxu3 %v4681_v15  ;;  %v6057_v15 = vld [vmem:[%s8729_s11 + $0x10] sm:$0xff] }
 0x2dc   : > { %1696 = vmatpush.msra.mxu3 %v4680_v11 }
 0x2dd   : > { %4636 = vmatmul.msk.f32.gmra.mxu3 %vm920_vm3, %v5696_v0 }
 0x2df   : > { %1762 = vmatmul.f32.vlgmr.msra.gmra.mxu2 %v5382_v16  ;;  %v5869_v16 = vld [vmem:[%s8731_s13 + $0x70] sm:$0xff] }
 0x2e0   : > { %1503 = vmatpush.msra.mxu0 %v5869_v16 }
 0x2e5   : > { %4637 = vmatmul.msk.f32.gmra.mxu3 %vm920_vm3, %v5645_v52  ;;  %v5886_v52 = vld [vmem:[%s8731_s13 + $0x58] sm:$0xff] }
 0x2e7   : > { %1765 = vmatmul.f32.gmra.mxu2 %v5388_v17  ;;  %v5874_v17 = vld [vmem:[%s8731_s13 + $0x68] sm:$0xff] }
 0x2e8   : > { %1504 = vmatpush.msra.mxu0 %v5874_v17 }
 0x2ea   : > { %1505 = vmatpush.msra.mxu0 %v5880_v44 }
 0x2ec   : > { %1506 = vmatpush.msra.mxu0 %v5886_v52 }
 0x2ed   : > { %4638 = vmatmul.msk.f32.gmra.mxu3 %vm920_vm3, %v5706_v5 }
 0x2ee   : > { %1507 = vmatpush.msra.mxu0 %v5900_v18 }
 0x2f0   : > { %1508 = vmatpush.msra.mxu0 %v5912_v37 }
 0x2f2   : > { %1509 = vmatpush.msra.mxu0 %v5922_v29 }
 0x2f4   : > { %1510 = vmatpush.msra.mxu0 %v5934_v54 }
 0x2f5   : > { %4639 = vmatmul.msk.f32.gmra.mxu3 %vm920_vm3, %v5716_v14  ;;  %v8896_v14 = vld [vmem:[#allocation16_spill] sm:$0xff] }
 0x2f6   : > { %1511 = vmatpush.msra.mxu0 %v5950_v57 }
 0x2f8   : > { %1512 = vmatpush.msra.mxu0 %v5962_v21 }
 0x2fa   : > { %1513 = vmatpush.msra.mxu0 %v5972_v41 }
 0x2fc   : > { %1514 = vmatpush.msra.mxu0 %v5988_v48 }
 0x2fd   : > { %4640 = vmatmul.msk.f32.gmra.mxu3 %vm920_vm3, %v5662_v58  ;;  %v5895_v58 = vld [vmem:[%s8731_s13 + $0xc0] sm:$0xff] }
 0x2fe   : > { %1574 = vmatpush.msrb.mxu1 %v5895_v58  ;;  %1515 = vmatpush.msra.mxu0 %v6000_v10 }
 0x300   : > { %1575 = vmatpush.msrb.mxu1 %v5905_v6  ;;  %1516 = vmatpush.msra.mxu0 %v6007_v62 }
 0x302   : > { %1576 = vmatpush.msrb.mxu1 %v5917_v55  ;;  %1517 = vmatpush.msra.mxu0 %v6013_v31 }
 0x304   : > { %1577 = vmatpush.msrb.mxu1 %v5929_v24  ;;  %4708 = vmatpush.msk.msrb.mxu0 %vm927_vm1, %v5565_v4 }
 0x305   : > { %4641 = vmatmul.msk.f32.gmra.mxu3 %vm920_vm3, %v5727_v28 }
 0x306   : > { %1578 = vmatpush.msrb.mxu1 %v5945_v63  ;;  %1933 = vmatpush.msrb.mxu0 %v5578_v7  ;;  %v6038_v7 = vld [vmem:[%s8729_s11] sm:$0xff] }
 0x308   : > { %1579 = vmatpush.msrb.mxu1 %v5955_v20  ;;  %1934 = vmatpush.msrb.mxu0 %v5586_v9 }
 0x30a   : > { %1580 = vmatpush.msrb.mxu1 %v5967_v35  ;;  %1935 = vmatpush.msrb.mxu0 %v5600_v13 }
 0x30c   : > { %1581 = vmatpush.msrb.mxu1 %v5983_v47 }
 0x30d   : > { %4642 = vmatmul.msk.f32.gmra.mxu3 %vm920_vm3, %v5734_v34 }
 0x30e   : > { %1582 = vmatpush.msrb.mxu1 %v5993_v53 }
 0x315   : > { %4643 = vmatmul.msk.f32.gmra.mxu3 %vm920_vm3, %v5713_v12 }
 0x31d   : > { %4644 = vmatmul.msk.f32.gmra.mxu3 %vm920_vm3, %v5749_v61 }
 0x325   : > { %4645 = vmatmul.msk.f32.gmra.mxu3 %vm920_vm3, %v5759_v19 }
 0x32d   : > { %4646 = vmatmul.msk.f32.gmra.mxu3 %vm920_vm3, %v5780_v3 }
 0x334   : > { %v1374_v56 = vpop.f32.mrf.mxu0 }
 0x335   : > { %v1423_v4 = vmul.f32 %v1374_v56, %v6030_v33  ;;  %4658 = vmatmul.msk.f32.vlgmr.msrb.gmra.mxu3 %vm920_vm3, %v5727_v28 }
 0x336   : > { %2456 = vmatpush.msrb.mxu3 %v5861_v32 }
 0x337   : > { %4664 = vmatmul.msk.f32.vlgmr.msrb.gmra.mxu1 %vm991_vm4, %v1423_v4  ;;  %v6085_v4 = vld [vmem:[%s8729_s11 + $0x38] sm:$0xff] }
 0x338   : > { %v1309_v9 = vpop.f32.mrf.mxu3  ;;  %2457 = vmatpush.msrb.mxu3 %v5869_v16 }
 0x339   : > { %v1422_v13 = vmul.f32 %v1309_v9, %v6038_v7 }
 0x33a   : > { %v1389_v8 = vpop.f32.mrf.mxu2  ;;  %2458 = vmatpush.msrb.mxu3 %v5874_v17  ;;  %v6066_v17 = vld [vmem:[%s8729_s11 + $0x28] sm:$0xff] }
 0x33b   : > { %1518 = vmatmul.f32.vlgmr.msra.gmra.mxu0 %v1422_v13  ;;  %v6104_v13 = vld [vmem:[%s8729_s11 + $0x48] sm:$0xff] }
 0x33c   : > { %v1377_v59 = vpop.f32.mrf.mxu0  ;;  %2459 = vmatpush.msrb.mxu3 %v5880_v44 }
 0x33d   : > { %v1425_v26 = vmul.f32 %v1377_v59, %v6047_v1  ;;  %4659 = vmatmul.msk.f32.gmra.mxu3 %vm920_vm3, %v5734_v34 }
 0x33e   : > { %2460 = vmatpush.msrb.mxu3 %v5886_v52 }
 0x33f   : > { %4665 = vmatmul.msk.f32.gmra.mxu1 %vm991_vm4, %v1425_v26 }
 0x340   : > { %v1312_v11 = vpop.f32.mrf.mxu3  ;;  %2461 = vmatpush.msrb.mxu3 %v5900_v18  ;;  %v6076_v18 = vld [vmem:[%s8729_s11 + $0x20] sm:$0xff] }
 0x341   : > { %v1424_v32 = vmul.f32 %v1312_v11, %v6057_v15  ;;  %v6114_v11 = vld [vmem:[%s8729_s11 + $0x40] sm:$0xff] }
 0x342   : > { %v1392_v16 = vpop.f32.mrf.mxu2  ;;  %2462 = vmatpush.msrb.mxu3 %v5912_v37 }
 0x343   : > { %1521 = vmatmul.f32.gmra.mxu0 %v1424_v32 }
 0x344   : > { %v1380_v44 = vpop.f32.mrf.mxu0  ;;  %2463 = vmatpush.msrb.mxu3 %v5922_v29 }
 0x345   : > { %v1427_v52 = vmul.f32 %v1380_v44, %v6066_v17  ;;  %4660 = vmatmul.msk.f32.gmra.mxu3 %vm920_vm3, %v5713_v12 }
 0x346   : > { %2464 = vmatpush.msrb.mxu3 %v5934_v54 }
 0x347   : > { %4666 = vmatmul.msk.f32.gmra.mxu1 %vm991_vm4, %v1427_v52  ;;  %v6121_v52 = vld [vmem:[%s8729_s11 + $0x58] sm:$0xff] }
 0x348   : > { %v1315_v56 = vpop.f32.mrf.mxu3  ;;  %2465 = vmatpush.msrb.mxu3 %v5950_v57  ;;  %v6095_v57 = vld [vmem:[%s8729_s11 + $0x30] sm:$0xff] }
 0x349   : > { %v1426_v37 = vmul.f32 %v1315_v56, %v6076_v18 }
 0x34a   : > { %v1395_v29 = vpop.f32.mrf.mxu2  ;;  %2466 = vmatpush.msrb.mxu3 %v5962_v21 }
 0x34b   : > { %1524 = vmatmul.f32.gmra.mxu0 %v1426_v37  ;;  %v1433_v37 = vmul.f32 %v1389_v8, %v6121_v52  ;;  %v6145_v8 = vld [vmem:[%s8729_s11 + $0x60] sm:$0xff] }
 0x34c   : > { %v1383_v12 = vpop.f32.mrf.mxu0  ;;  %2467 = vmatpush.msrb.mxu3 %v5972_v41 }
 0x34d   : > { %v1429_v54 = vmul.f32 %v1383_v12, %v6085_v4  ;;  %4661 = vmatmul.msk.f32.gmra.mxu3 %vm920_vm3, %v5749_v61  ;;  %v6129_v12 = vld [vmem:[%s8729_s11 + $0x50] sm:$0xff] }
 0x34e   : > { %2468 = vmatpush.msrb.mxu3 %v5988_v48 }
 0x34f   : > { %4667 = vmatmul.msk.f32.gmra.mxu1 %vm991_vm4, %v1429_v54 }
 0x350   : > { %v1318_v9 = vpop.f32.mrf.mxu3  ;;  %2469 = vmatpush.msrb.mxu3 %v6000_v10 }
 0x351   : > { %v1428_v21 = vmul.f32 %v1318_v9, %v6095_v57 }
 0x352   : > { %v1398_v41 = vpop.f32.mrf.mxu2  ;;  %2470 = vmatpush.msrb.mxu3 %v6007_v62 }
 0x353   : > { %1527 = vmatmul.f32.gmra.mxu0 %v1428_v21  ;;  %v6136_v21 = vld [vmem:[%s8729_s11 + $0x68] sm:$0xff] }
 0x354   : > { %v1386_v59 = vpop.f32.mrf.mxu0  ;;  %2471 = vmatpush.msrb.mxu3 %v6013_v31 }
 0x355   : > { %v1431_v26 = vmul.f32 %v1386_v59, %v6104_v13  ;;  %4662 = vmatmul.msk.f32.gmra.mxu3 %vm920_vm3, %v5759_v19 }
 0x357   : > { %4668 = vmatmul.msk.f32.gmra.mxu1 %vm991_vm4, %v1431_v26 }
 0x358   : > { %v1321_v32 = vpop.f32.mrf.mxu3 }
 0x359   : > { %v1430_v44 = vmul.f32 %v1321_v32, %v6114_v11 }
 0x35a   : > { %v1401_v56 = vpop.f32.mrf.mxu2 }
 0x35b   : > { %1530 = vmatmul.f32.gmra.mxu0 %v1430_v44  ;;  %v6152_v44 = vld [vmem:[%s8729_s11 + $0x78] sm:$0xff] }
 0x35d   : > { %4663 = vmatmul.msk.f32.gmra.mxu3 %vm920_vm3, %v5780_v3  ;;  %v1435_v3 = vmul.f32 %v1392_v16, %v6136_v21  ;;  %v6165_v16 = vld [vmem:[%s8729_s11 + $0x70] sm:$0xff] }
 0x35f   : > { %4669 = vmatmul.msk.f32.gmra.mxu1 %vm991_vm4, %v1433_v37 }
 0x360   : > { %v1324_v54 = vpop.f32.mrf.mxu3 }
 0x361   : > { %v1432_v9 = vmul.f32 %v1324_v54, %v6129_v12 }
 0x362   : > { %v6138_v59 = vpop.f32.mrf.mxu2 }
 0x363   : > { %1533 = vmatmul.f32.gmra.mxu0 %v1432_v9 }
 0x365   : > { %1697 = vmatmul.f32.vlgmr.msra.gmra.mxu3 %v5410_v23  ;;  %v1437_v23 = vmul.f32 %v1395_v29, %v6152_v44 }
 0x367   : > { %4670 = vmatmul.msk.f32.gmra.mxu1 %vm991_vm4, %v1435_v3 }
 0x368   : > { %v1327_v26 = vpop.f32.mrf.mxu3 }
 0x369   : > { %v1434_v32 = vmul.f32 %v1327_v26, %v6145_v8  ;;  %v6190_v26 = vld [vmem:[%s8729_s11 + $0x98] sm:$0xff] }
 0x36a   : > { %v6154_v37 = vpop.f32.mrf.mxu2 }
 0x36b   : > { %1783 = vmatpush.msrb.mxu2 %v6154_v37  ;;  %1536 = vmatmul.f32.gmra.mxu0 %v1434_v32 }
 0x36d   : > { %1784 = vmatpush.msrb.mxu2 %v6138_v59  ;;  %1700 = vmatmul.f32.gmra.mxu3 %v5419_v25  ;;  %v6174_v25 = vld [vmem:[%s8729_s11 + $0x88] sm:$0xff] }
 0x36e   : > { %4696 = vmatmul.msk.f32.vlgmr.msrb.gmra.mxu2 %vm793_vm0, %v5402_v22  ;;  %v6176_v22 = vpop.f32.mrf.mxu1  ;;  %v1439_v9 = vmul.f32 %v1398_v41, %v6174_v25  ;;  %v1441_v41 = vmul.f32 %v1401_v56, %v6190_v26  ;;  %v6207_v56 = vld [vmem:[%s8729_s11 + $0xa0] sm:$0xff] }
 0x36f   : > { %4671 = vmatmul.msk.f32.gmra.mxu1 %vm991_vm4, %v1437_v23  ;;  %1848 = vmatpush.msra.mxu2 %v5518_v50  ;;  %8879 = vst [vmem:[#allocation32_spill] sm:$0xff] %v6176_v22  ;;  %v6183_v50 = vld [vmem:[%s8729_s11 + $0x80] sm:$0xff] }
 0x370   : > { %v1330_v54 = vpop.f32.mrf.mxu3  ;;  %8882 = vst [vmem:[#allocation35_spill] sm:$0xff] %v6207_v56 }
 0x371   : > { %1877 = vmatpush.msrb.mxu2 %v5523_v51  ;;  %v1436_v29 = vmul.f32 %v1330_v54, %v6165_v16 }
 0x373   : > { %1539 = vmatmul.f32.gmra.mxu0 %v1436_v29 }
 0x375   : > { %1703 = vmatmul.f32.gmra.mxu3 %v5428_v27  ;;  %v6197_v27 = vld [vmem:[%s8729_s11 + $0x90] sm:$0xff] }
 0x376   : > { %8880 = vst [vmem:[#allocation33_spill] sm:$0xff] %v6197_v27  ;;  %v6199_v32 = vpop.f32.mrf.mxu1 }
 0x377   : > { %4672 = vmatmul.msk.f32.gmra.mxu1 %vm991_vm4, %v1439_v9  ;;  %8881 = vst [vmem:[#allocation34_spill] sm:$0xff] %v6199_v32  ;;  %v6214_v9 = vld [vmem:[%s8729_s11 + $0xb0] sm:$0xff]  ;;  %v8893_v32 = vld [vmem:[#allocation15_spill] sm:$0xff] }
 0x378   : > { %v1333_v51 = vpop.f32.mrf.mxu3  ;;  %8883 = vst [vmem:[#allocation36_spill] sm:$0xff] %v6214_v9 }
 0x379   : > { %v1438_v3 = vmul.f32 %v1333_v51, %v6183_v50 }
 0x37b   : > { %1542 = vmatmul.f32.gmra.mxu0 %v1438_v3 }
 0x37d   : > { %1706 = vmatmul.f32.gmra.mxu3 %v5440_v30 }
 0x37f   : > { %4673 = vmatmul.msk.f32.gmra.mxu1 %vm991_vm4, %v1441_v41 }
 0x380   : > { %v1336_v23 = vpop.f32.mrf.mxu3 }
 0x381   : > { %v1440_v54 = vmul.f32 %v1336_v23, %v6197_v27 }
 0x383   : > { %1545 = vmatmul.f32.gmra.mxu0 %v1440_v54 }
 0x385   : > { %1709 = vmatmul.f32.gmra.mxu3 %v5455_v36  ;;  %v6221_v36 = vld [vmem:[%s8729_s11 + $0xc0] sm:$0xff] }
 0x386   : > { %8884 = vst [vmem:[#allocation37_spill] sm:$0xff] %v6221_v36 }
 0x388   : > { %v1339_v30 = vpop.f32.mrf.mxu3 }
 0x389   : > { %v1442_v29 = vmul.f32 %v1339_v30, %v6207_v56 }
 0x38b   : > { %1548 = vmatmul.f32.gmra.mxu0 %v1442_v29 }
 0x38d   : > { %1712 = vmatmul.f32.gmra.mxu3 %v5467_v39  ;;  %v6228_v39 = vld [vmem:[%s8729_s11 + $0xd0] sm:$0xff] }
 0x38e   : > { %8885 = vst [vmem:[#allocation38_spill] sm:$0xff] %v6228_v39 }
 0x390   : > { %v1342_v51 = vpop.f32.mrf.mxu3 }
 0x391   : > { %v1444_v3 = vmul.f32 %v1342_v51, %v6214_v9 }
 0x393   : > { %1551 = vmatmul.f32.gmra.mxu0 %v1444_v3 }
 0x395   : > { %1715 = vmatmul.f32.gmra.mxu3 %v5473_v40  ;;  %v6235_v40 = vld [vmem:[%s8729_s11 + $0xe0] sm:$0xff] }
 0x396   : > { %8886 = vst [vmem:[#allocation39_spill] sm:$0xff] %v6235_v40 }
 0x398   : > { %v1345_v41 = vpop.f32.mrf.mxu3 }
 0x399   : > { %v1446_v23 = vmul.f32 %v1345_v41, %v6221_v36  ;;  %v6244_v41 = vpop.f32.mrf.mxu1 }
 0x39a   : > { %8888 = vst [vmem:[#allocation41_spill] sm:$0xff] %v6244_v41 }
 0x39b   : > { %1554 = vmatmul.f32.gmra.mxu0 %v1446_v23  ;;  %v6251_v23 = vld [vmem:[%s8729_s11 + $0xa8] sm:$0xff] }
 0x39d   : > { %1718 = vmatmul.f32.gmra.mxu3 %v5482_v42  ;;  %v6242_v42 = vld [vmem:[%s8729_s11 + $0xf0] sm:$0xff] }
 0x39e   : > { %8887 = vst [vmem:[#allocation40_spill] sm:$0xff] %v6242_v42 }
 0x3a0   : > { %v1348_v54 = vpop.f32.mrf.mxu3 }
 0x3a1   : > { %v1448_v30 = vmul.f32 %v1348_v54, %v6228_v39 }
 0x3a3   : > { %1557 = vmatmul.f32.gmra.mxu0 %v1448_v30  ;;  %v6254_v30 = vpop.f32.mrf.mxu1 }
 0x3a4   : > { %8889 = vst [vmem:[#allocation42_spill] sm:$0xff] %v6254_v30 }
 0x3a5   : > { %1721 = vmatmul.f32.gmra.mxu3 %v5488_v43 }
 0x3a8   : > { %v1351_v29 = vpop.f32.mrf.mxu3 }
 0x3a9   : > { %v1450_v51 = vmul.f32 %v1351_v29, %v6235_v40  ;;  %v6262_v29 = vld [vmem:[%s8719_s1 + $0x58] sm:$0xff]  ;;  %v8906_v40 = vld [vmem:[#allocation4_spill] sm:$0xff] }
 0x3aa   : > { %8890 = vst [vmem:[#allocation43_spill] sm:$0xff] %v6262_v29 }
 0x3ab   : > { %1560 = vmatmul.f32.gmra.mxu0 %v1450_v51 }
 0x3ad   : > { %1724 = vmatmul.f32.gmra.mxu3 %v5497_v45 }
 0x3b0   : > { %v1354_v3 = vpop.f32.mrf.mxu3 }
 0x3b1   : > { %v1452_v43 = vmul.f32 %v1354_v3, %v6242_v42  ;;  %v8905_v42 = vld [vmem:[#allocation3_spill] sm:$0xff] }
 0x3b3   : > { %1563 = vmatmul.f32.gmra.mxu0 %v1452_v43  ;;  %v6274_v43 = vpop.f32.mrf.mxu1 }
 0x3b4   : > { %8891 = vst [vmem:[#allocation44_spill] sm:$0xff] %v6274_v43  ;;  %v6293_v43 = vld [vmem:[%s8729_s11 + $0xd8] sm:$0xff] }
 0x3b5   : > { %1727 = vmatmul.f32.gmra.mxu3 %v5503_v46  ;;  %v6268_v46 = vld [vmem:[%s8729_s11 + $0xb8] sm:$0xff]  ;;  %8894 = vst [vmem:[#allocation15_spill] sm:$0xff] %v6293_v43 }
 0x3b8   : > { %v1404_v54 = vpop.f32.mrf.mxu3 }
 0x3b9   : > { %v1443_v45 = vmul.f32 %v1404_v54, %v6251_v23  ;;  %v6279_v54 = vld [vmem:[%s8719_s1 + $0x60] sm:$0xff] }
 0x3ba   : > { %8892 = vst [vmem:[#allocation45_spill] sm:$0xff] %v6279_v54 }
 0x3bb   : > { %4674 = vmatmul.msk.f32.gmra.mxu1 %vm991_vm4, %v1443_v45  ;;  %4709 = vmatmul.msk.f32.vlgmr.msrb.gmra.mxu0 %vm920_vm3, %v6138_v59  ;;  %v6285_v45 = vld [vmem:[%s8729_s11 + $0xc8] sm:$0xff]  ;;  %v6295_v22 = vpop.f32.mrf.mxu1 }
 0x3bc   : > { %8895 = vst [vmem:[#allocation46_spill] sm:$0xff] %v6295_v22  ;;  %v8899_v22 = vld [vmem:[#allocation17_spill] sm:$0xff] }
 0x3bd   : > { %1730 = vmatmul.f32.gmra.mxu3 %v6262_v29  ;;  %v8908_v29 = vld [vmem:[#allocation24_spill] sm:$0xff] }
 0x3c0   : > { %v1407_v51 = vpop.f32.mrf.mxu3 }
 0x3c1   : > { %v1445_v3 = vmul.f32 %v1407_v51, %v6268_v46 }
 0x3c3   : > { %4675 = vmatmul.msk.f32.gmra.mxu1 %vm991_vm4, %v1445_v3  ;;  %4710 = vmatmul.msk.f32.gmra.mxu0 %vm920_vm3, %v6154_v37 }
 0x3c5   : > { %1733 = vmatmul.f32.gmra.mxu3 %v6279_v54  ;;  %v8907_v54 = vld [vmem:[#allocation7_spill] sm:$0xff] }
 0x3c8   : > { %v1410_v51 = vpop.f32.mrf.mxu3 }
 0x3c9   : > { %v1447_v3 = vmul.f32 %v1410_v51, %v6285_v45  ;;  %v6303_v51 = vld [vmem:[%s8729_s11 + $0xe8] sm:$0xff] }
 0x3ca   : > { %8897 = vst [vmem:[#allocation16_spill] sm:$0xff] %v6303_v51 }
 0x3cb   : > { %4676 = vmatmul.msk.f32.gmra.mxu1 %vm991_vm4, %v1447_v3  ;;  %v6305_v3 = vpop.f32.mrf.mxu1 }
 0x3cc   : > { %8898 = vst [vmem:[#allocation47_spill] sm:$0xff] %v6305_v3 }
 0x3cd   : > { %1736 = vmatmul.f32.gmra.mxu3 %v8893_v32 }
 0x3d0   : > { %v1413_v19 = vpop.f32.mrf.mxu3 }
 0x3d1   : > { %v1449_v34 = vmul.f32 %v1413_v19, %v6293_v43 }
 0x3d3   : > { %4677 = vmatmul.msk.f32.gmra.mxu1 %vm991_vm4, %v1449_v34  ;;  %v6313_v34 = vld [vmem:[%s8729_s11 + $0xf8] sm:$0xff]  ;;  %v6316_v38 = vpop.f32.mrf.mxu1 }
 0x3d4   : > { %8900 = vst [vmem:[#allocation17_spill] sm:$0xff] %v6313_v34 }
 0x3d5   : > { %1739 = vmatmul.f32.gmra.mxu3 %v8896_v14  ;;  %8901 = vst [vmem:[#allocation48_spill] sm:$0xff] %v6316_v38  ;;  %v8904_v38 = vld [vmem:[#allocation11_spill] sm:$0xff] }
 0x3d8   : > { %v1416_v32 = vpop.f32.mrf.mxu3 }
 0x3d9   : > { %v1451_v0 = vmul.f32 %v1416_v32, %v6303_v51  ;;  %v8902_v32 = vld [vmem:[#allocation9_spill] sm:$0xff]  ;;  %v8910_v51 = vld [vmem:[#allocation31_spill] sm:$0xff] }
 0x3db   : > { %4678 = vmatmul.msk.f32.gmra.mxu1 %vm991_vm4, %v1451_v0 }
 0x3dd   : > { %1742 = vmatmul.f32.gmra.mxu3 %v8899_v22  ;;  %v8903_v22 = vld [vmem:[#allocation2_spill] sm:$0xff] }
 0x3e0   : > { %v1419_v14 = vpop.f32.mrf.mxu3 }
 0x3e1   : > { %v1453_v19 = vmul.f32 %v1419_v14, %v6313_v34  ;;  %v8909_v34 = vld [vmem:[#allocation26_spill] sm:$0xff] }
 0x3e3   : > { %4679 = vmatmul.msk.f32.gmra.mxu1 %vm991_vm4, %v1453_v19 }
 0x3e8   : > { %v6319_v30 = vpop.f32.mrf.mxu3 }
 0x3f0   : > { %v1701_v3 = vpop.f32.mrf.mxu3 }
 0x3f1   : > { %v6322_v41 = vadd.f32 %v1701_v3, %v8902_v32  ;;  %v1786_v0 = vpop.f32.mrf.mxu2 }
 0x3f2   : > { %v1787_v61 = vadd.f32 %v1786_v0, %v8903_v22 }
 0x3f3   : > { %v1986_v28 = vsel %vm920_vm3, %v6322_v41, 0.0 }
 0x3f4   : > { %1789 = vxpose.xlu2.b32.start.end [1/1] (short) (narrow) %v1787_v61, 32  ;;  %1987 = vadd.xlane.f32.xlu0 %v1986_v28 }
 0x3f8   : > { %v6327_v5 = vpop.f32.mrf.mxu3 }
 0x400   : > { %v1707_v14 = vpop.f32.mrf.mxu3 }
 0x401   : > { %v6330_v49 = vadd.f32 %v1707_v14, %v8904_v38 }
 0x403   : > { %v1992_v19 = vsel %vm920_vm3, %v6330_v49, 0.0 }
 0x404   : > { %1993 = vadd.xlane.f32.xlu0 %v1992_v19 }
 0x408   : > { %v6334_v3 = vpop.f32.mrf.mxu3 }
 0x410   : > { %v1713_v32 = vpop.f32.mrf.mxu3 }
 0x411   : > { %v6337_v0 = vadd.f32 %v1713_v32, %v8905_v42 }
 0x413   : > { %v1998_v61 = vsel %vm920_vm3, %v6337_v0, 0.0 }
 0x414   : > { %1999 = vadd.xlane.f32.xlu0 %v1998_v61 }
 0x418   : > { %v6341_v28 = vpop.f32.mrf.mxu3 }
 0x420   : > { %v1719_v22 = vpop.f32.mrf.mxu3 }
 0x421   : > { %v6344_v14 = vadd.f32 %v1719_v22, %v8906_v40 }
 0x423   : > { %v2004_v38 = vsel %vm920_vm3, %v6344_v14, 0.0 }
 0x424   : > { %2005 = vadd.xlane.f32.xlu0 %v2004_v38 }
 0x428   : > { %v6348_v19 = vpop.f32.mrf.mxu3 }
 0x430   : > { %v1725_v39 = vpop.f32.mrf.mxu3 }
 0x431   : > { %v6351_v32 = vadd.f32 %v1725_v39, %v8907_v54 }
 0x433   : > { %v2010_v42 = vsel %vm920_vm3, %v6351_v32, 0.0 }
 0x434   : > { %2011 = vadd.xlane.f32.xlu0 %v2010_v42 }
 0x438   : > { %v6355_v61 = vpop.f32.mrf.mxu3 }
 0x440   : > { %v1731_v36 = vpop.f32.mrf.mxu3 }
 0x441   : > { %v6358_v22 = vadd.f32 %v1731_v36, %v8908_v29 }
 0x443   : > { %v2016_v40 = vsel %vm920_vm3, %v6358_v22, 0.0 }
 0x444   : > { %2017 = vadd.xlane.f32.xlu0 %v2016_v40  ;;  %v6376_v40 = vpop.f32.mrf.mxu0 }
 0x445   : > { %8911 = vst [vmem:[#allocation49_spill] sm:$0xff] %v6376_v40 }
 0x448   : > { %v6362_v38 = vpop.f32.mrf.mxu3 }
 0x44c   : > { %v6378_v27 = vpop.f32.mrf.mxu0 }
 0x44d   : > { %8912 = vst [vmem:[#allocation50_spill] sm:$0xff] %v6378_v27  ;;  %v6401_v27 = vld [vmem:[%s8726_s8 + $0x10] sm:$0xff] }
 0x44e   : > { %8917 = vst [vmem:[#allocation55_spill] sm:$0xff] %v6401_v27 }
 0x450   : > { %v1737_v9 = vpop.f32.mrf.mxu3 }
 0x451   : > { %v6365_v39 = vadd.f32 %v1737_v9, %v8909_v34 }
 0x453   : > { %v2022_v54 = vsel %vm920_vm3, %v6365_v39, 0.0 }
 0x454   : > { %2023 = vadd.xlane.f32.xlu0 %v2022_v54  ;;  %v6380_v9 = vpop.f32.mrf.mxu0  ;;  %v6386_v54 = vld [vmem:[%s8726_s8 + $0x30] sm:$0x1] }
 0x455   : > { %8913 = vst [vmem:[#allocation51_spill] sm:$0xff] %v6380_v9  ;;  %v6407_v9 = vld [vmem:[%s8726_s8] sm:$0xff] }
 0x456   : > { %8914 = vst [vmem:[#allocation52_spill] sm:$0xff] %v6386_v54 }
 0x457   : > { %8918 = vst [vmem:[#allocation56_spill] sm:$0xff] %v6407_v9 }
 0x458   : > { %v6369_v42 = vpop.f32.mrf.mxu3 }
 0x460   : > { %v1743_v56 = vpop.f32.mrf.mxu3 }
 0x461   : > { %v6372_v36 = vadd.f32 %v1743_v56, %v8910_v51  ;;  %v6393_v56 = vld [vmem:[%s8726_s8 + $0x20] sm:$0xff] }
 0x462   : > { %8915 = vst [vmem:[#allocation53_spill] sm:$0xff] %v6393_v56 }
 0x463   : > { %v2028_v29 = vsel %vm920_vm3, %v6372_v36, 0.0 }
 0x464   : > { %2029 = vadd.xlane.f32.xlu0 %v2028_v29  ;;  %v6396_v29 = vpop.f32.mrf.mxu0 }
 0x465   : > { %8916 = vst [vmem:[#allocation54_spill] sm:$0xff] %v6396_v29 }
 0x46c   : > { %v6411_v51 = vpop.f32.mrf.mxu0 }
 0x46d   : > { %8919 = vst [vmem:[#allocation57_spill] sm:$0xff] %v6411_v51  ;;  %v6430_v51 = vld [vmem:[%s8728_s10 + $0x10] sm:$0xff] }
 0x46e   : > { %8923 = vst [vmem:[#allocation61_spill] sm:$0xff] %v6430_v51 }
 0x48d   : > { %v1805_v34 = vpop.trf.xlu2 }
 0x48e   : > { %4697 = vmatmul.msk.f32.vlgmr.msra.gmra.mxu2 %vm849_vm2, %v1805_v34 }
 0x48f   : > { %4705 = vmatpush.msk.msra.mxu2 %vm927_vm1, %v6386_v54  ;;  %v6414_v54 = vpop.f32.mrf.mxu0 }
 0x490   : > { %8920 = vst [vmem:[#allocation58_spill] sm:$0xff] %v6414_v54  ;;  %v6442_v54 = vld [vmem:[%s8728_s10] sm:$0xff] }
 0x491   : > { %1910 = vmatpush.msra.mxu2 %v6393_v56  ;;  %8925 = vst [vmem:[#allocation63_spill] sm:$0xff] %v6442_v54 }
 0x493   : > { %1911 = vmatpush.msra.mxu2 %v6401_v27  ;;  %v6421_v27 = vld [vmem:[%s8728_s10 + $0x18] sm:$0x1] }
 0x494   : > { %8921 = vst [vmem:[#allocation59_spill] sm:$0xff] %v6421_v27 }
 0x495   : > { %v1806_v40 = vpop.trf.xlu2  ;;  %1912 = vmatpush.msra.mxu2 %v6407_v9 }
 0x496   : > { %4698 = vmatmul.msk.f32.gmra.mxu2 %vm849_vm2, %v1806_v40 }
 0x497   : > { %v6425_v9 = vpop.f32.mrf.mxu0 }
 0x498   : > { %8922 = vst [vmem:[#allocation60_spill] sm:$0xff] %v6425_v9 }
 0x49d   : > { %v1807_v29 = vpop.trf.xlu2 }
 0x49e   : > { %4699 = vmatmul.msk.f32.gmra.mxu2 %vm849_vm2, %v1807_v29 }
 0x49f   : > { %v6446_v9 = vpop.f32.mrf.mxu0 }
 0x4a0   : > { %8926 = vst [vmem:[#allocation64_spill] sm:$0xff] %v6446_v9 }
 0x4a5   : > { %v1808_v56 = vpop.trf.xlu2 }
 0x4a6   : > { %4700 = vmatmul.msk.f32.gmra.mxu2 %vm849_vm2, %v1808_v56 }
 0x4ae   : > { %4701 = vmatmul.msk.f32.vlgmr.msrb.gmra.mxu2 %vm849_vm2, %v1805_v34  ;;  %v6436_v34 = vld [vmem:[%s8728_s10 + $0x8] sm:$0xff] }
 0x4af   : > { %4711 = vmatpush.msk.msrb.mxu2 %vm927_vm1, %v6421_v27  ;;  %8924 = vst [vmem:[#allocation62_spill] sm:$0xff] %v6436_v34 }
 0x4b1   : > { %2188 = vmatpush.msrb.mxu2 %v6430_v51  ;;  %v6449_v51 = vpop.f32.mrf.mxu0 }
 0x4b2   : > { %8927 = vst [vmem:[#allocation65_spill] sm:$0xff] %v6449_v51 }
 0x4b3   : > { %2189 = vmatpush.msrb.mxu2 %v6436_v34 }
 0x4b5   : > { %2190 = vmatpush.msrb.mxu2 %v6442_v54  ;;  %v8953_v54 = vld [vmem:[#allocation20_spill] sm:$0xff] }
 0x4b6   : > { %4702 = vmatmul.msk.f32.gmra.mxu2 %vm849_vm2, %v1806_v40 }
 0x4b9   : > { %v6452_v27 = vpop.f32.mrf.mxu0 }
 0x4ba   : > { %8928 = vst [vmem:[#allocation66_spill] sm:$0xff] %v6452_v27 }
 0x4be   : > { %4703 = vmatmul.msk.f32.gmra.mxu2 %vm849_vm2, %v1807_v29  ;;  %v8942_v29 = vld [vmem:[#allocation5_spill] sm:$0xff] }
 0x4c1   : > { %v6463_v40 = vpop.f32.mrf.mxu0 }
 0x4c2   : > { %8929 = vst [vmem:[#allocation67_spill] sm:$0xff] %v6463_v40  ;;  %v8947_v40 = vld [vmem:[#allocation30_spill] sm:$0xff] }
 0x4c6   : > { %4704 = vmatmul.msk.f32.gmra.mxu2 %vm849_vm2, %v1808_v56 }
 0x4ce   : > { %4706 = vmatmul.msk.f32.vlgmr.msra.gmra.mxu2 %vm920_vm3, %v6138_v59  ;;  %v8930_v59 = vld [vmem:[#allocation8_spill] sm:$0xff] }
 0x4cf   : > { %2528 = vmatpush.msra.mxu2 %v5895_v58  ;;  %v6469_v58 = vadd.f32 %v6319_v30, %v8930_v59 }
 0x4d1   : > { %2529 = vmatpush.msra.mxu2 %v5905_v6  ;;  %8931 = vst [vmem:[#allocation68_spill] sm:$0xff] %v6469_v58  ;;  %v6475_v6 = vpop.f32.mrf.mxu0 }
 0x4d2   : > { %8932 = vst [vmem:[#allocation69_spill] sm:$0xff] %v6475_v6 }
 0x4d3   : > { %2530 = vmatpush.msra.mxu2 %v5917_v55  ;;  %v8933_v55 = vld [vmem:[#allocation10_spill] sm:$0xff] }
 0x4d5   : > { %2531 = vmatpush.msra.mxu2 %v5929_v24  ;;  %v6481_v24 = vadd.f32 %v6327_v5, %v8933_v55 }
 0x4d6   : > { %4707 = vmatmul.msk.f32.gmra.mxu2 %vm920_vm3, %v6154_v37 }
 0x4d7   : > { %2532 = vmatpush.msra.mxu2 %v5945_v63 }
 0x4d9   : > { %2533 = vmatpush.msra.mxu2 %v5955_v20  ;;  %v6483_v63 = vpop.f32.mrf.mxu0  ;;  %v6487_v20 = vpop.f32.mrf.mxu1 }
 0x4da   : > { %8934 = vst [vmem:[#allocation70_spill] sm:$0xff] %v6483_v63 }
 0x4db   : > { %2534 = vmatpush.msra.mxu2 %v5967_v35  ;;  %8935 = vst [vmem:[#allocation71_spill] sm:$0xff] %v6487_v20 }
 0x4dd   : > { %2535 = vmatpush.msra.mxu2 %v5983_v47 }
 0x4de   : > { %4712 = vmatmul.msk.f32.vlgmr.msrb.gmra.mxu2 %vm920_vm3, %v6469_v58 }
 0x4df   : > { %2536 = vmatpush.msra.mxu2 %v5993_v53  ;;  %v8938_v53 = vld [vmem:[#allocation12_spill] sm:$0xff] }
 0x4e0   : > { %v6497_v37 = vadd.f32 %v6334_v3, %v8938_v53  ;;  %v8955_v53 = vld [vmem:[#allocation28_spill] sm:$0xff] }
 0x4e1   : > { %v6489_v35 = vpop.f32.mrf.mxu0  ;;  %v6493_v47 = vpop.f32.mrf.mxu1 }
 0x4e2   : > { %8936 = vst [vmem:[#allocation72_spill] sm:$0xff] %v6489_v35  ;;  %v6511_v35 = vadd.f32 %v6341_v28, %v8942_v29 }
 0x4e3   : > { %8937 = vst [vmem:[#allocation73_spill] sm:$0xff] %v6493_v47 }
 0x4e6   : > { %4713 = vmatmul.msk.f32.gmra.mxu2 %vm920_vm3, %v6322_v41 }
 0x4e9   : > { %v6501_v5 = vpop.f32.mrf.mxu0  ;;  %v6503_v30 = vpop.f32.mrf.mxu1 }
 0x4ea   : > { %8939 = vst [vmem:[#allocation74_spill] sm:$0xff] %v6501_v5 }
 0x4eb   : > { %8940 = vst [vmem:[#allocation75_spill] sm:$0xff] %v6503_v30 }
 0x4ee   : > { %4714 = vmatmul.msk.f32.gmra.mxu2 %vm920_vm3, %v6481_v24 }
 0x4f1   : > { %v6507_v56 = vpop.f32.mrf.mxu0  ;;  %v6513_v63 = vpop.f32.mrf.mxu1 }
 0x4f2   : > { %8941 = vst [vmem:[#allocation76_spill] sm:$0xff] %v6507_v56  ;;  %v8945_v56 = vld [vmem:[#allocation6_spill] sm:$0xff] }
 0x4f3   : > { %8943 = vst [vmem:[#allocation77_spill] sm:$0xff] %v6513_v63  ;;  %v6527_v47 = vadd.f32 %v6348_v19, %v8945_v56 }
 0x4f6   : > { %4715 = vmatmul.msk.f32.gmra.mxu2 %vm920_vm3, %v6330_v49 }
 0x4f9   : > { %v1937_v6 = vpop.f32.mrf.mxu0  ;;  %v6521_v5 = vpop.f32.mrf.mxu1 }
 0x4fa   : > { %8944 = vst [vmem:[#allocation78_spill] sm:$0xff] %v6521_v5  ;;  %v6539_v5 = vld [vmem:[%s8724_s6 + $0x8] sm:$0xff] }
 0x4fb   : > { %8948 = vst [vmem:[#allocation30_spill] sm:$0xff] %v6539_v5  ;;  %v1944_v51 = vmul.f32 %v6539_v5, %v1937_v6 }
 0x4fd   : > { %v1954_v9 = vsel %vm991_vm4, %v1944_v51, 0.0 }
 0x4fe   : > { %4716 = vmatmul.msk.f32.gmra.mxu2 %vm920_vm3, %v6497_v37 }
 0x501   : > { %v1940_v28 = vpop.f32.mrf.mxu0  ;;  %v6531_v63 = vpop.f32.mrf.mxu1 }
 0x502   : > { %8946 = vst [vmem:[#allocation79_spill] sm:$0xff] %v6531_v63  ;;  %v1946_v27 = vmul.f32 %v1940_v28, %v8947_v40  ;;  %v8950_v28 = vld [vmem:[#allocation22_spill] sm:$0xff] }
 0x503   : > { %v6552_v55 = vadd.f32 %v6355_v61, %v8950_v28  ;;  %v6564_v61 = vadd.f32 %v6362_v38, %v8953_v54  ;;  %v6575_v38 = vadd.f32 %v6369_v42, %v8955_v53 }
 0x504   : > { %v1955_v19 = vsel %vm991_vm4, %v1946_v27, 0.0 }
 0x505   : > { %v1956_v56 = vadd.f32 %v1955_v19, %v1954_v9 }
 0x506   : > { %4717 = vmatmul.msk.f32.gmra.mxu2 %vm920_vm3, %v6337_v0 }
 0x507   : > { %v1957_v29 = vrot.slane %v1956_v56, 4 }
 0x509   : > { %v6546_v63 = vpop.f32.mrf.mxu1  ;;  %v1958_v6 = vadd.f32 %v1957_v29, %v1956_v56 }
 0x50a   : > { %8949 = vst [vmem:[#allocation80_spill] sm:$0xff] %v6546_v63 }
 0x50b   : > { %v1959_v59 = vrot.slane %v1958_v6, 2 }
 0x50d   : > { %v1960_v51 = vadd.f32 %v1959_v59, %v1958_v6 }
 0x50e   : > { %4718 = vmatmul.msk.f32.gmra.mxu2 %vm920_vm3, %v6511_v35 }
 0x50f   : > { %v1961_v63 = vrot.slane %v1960_v51, 1 }
 0x511   : > { %v6517_v3 = vpop.f32.mrf.mxu2  ;;  %v6556_v5 = vpop.f32.mrf.mxu1  ;;  %v1962_v56 = vadd.f32 %v1961_v63, %v1960_v51 }
 0x512   : > { %8951 = vst [vmem:[#allocation81_spill] sm:$0xff] %v6556_v5 }
 0x513   : > { %v1964_v5 = vadd.f32 %v1962_v56, %v5791_v60 }
 0x515   : > { %v1966_v59 = vperm.slane %v1964_v5, 0 }
 0x516   : > { %4719 = vmatmul.msk.f32.gmra.mxu2 %vm920_vm3, %v6344_v14 }
 0x519   : > { %v6523_v30 = vpop.f32.mrf.mxu2  ;;  %v6560_v19 = vpop.f32.mrf.mxu1 }
 0x51a   : > { %8952 = vst [vmem:[#allocation82_spill] sm:$0xff] %v6560_v19 }
 0x51e   : > { %4720 = vmatmul.msk.f32.gmra.mxu2 %vm920_vm3, %v6527_v47 }
 0x521   : > { %v6534_v20 = vpop.f32.mrf.mxu2  ;;  %v6569_v34 = vpop.f32.mrf.mxu1 }
 0x522   : > { %8954 = vst [vmem:[#allocation83_spill] sm:$0xff] %v6569_v34 }
 0x526   : > { %4721 = vmatmul.msk.f32.gmra.mxu2 %vm920_vm3, %v6351_v32 }
 0x529   : > { %v6548_v40 = vpop.f32.mrf.mxu2  ;;  %v6579_v63 = vpop.f32.mrf.mxu1 }
 0x52a   : > { %8956 = vst [vmem:[#allocation84_spill] sm:$0xff] %v6579_v63 }
 0x52e   : > { %4722 = vmatmul.msk.f32.gmra.mxu2 %vm920_vm3, %v6552_v55 }
 0x531   : > { %v1879_v27 = vpop.f32.mrf.mxu2 }
 0x532   : > { %v1968_v43 = vsub.f32 %v1966_v59, %v1879_v27 }
 0x536   : > { %4723 = vmatmul.msk.f32.gmra.mxu2 %vm920_vm3, %v6358_v22 }
 0x539   : > { %v1882_v9 = vpop.f32.mrf.mxu2 }
 0x53a   : > { %v1970_v54 = vsub.f32 %v1966_v59, %v1882_v9  ;;  %v6595_v9 = vld [vmem:[%s8724_s6 + $0x10] sm:$0xff] }
 0x53e   : > { %4724 = vmatmul.msk.f32.gmra.mxu2 %vm920_vm3, %v6564_v61 }
 0x541   : > { %v1885_v29 = vpop.f32.mrf.mxu2 }
 0x542   : > { %v1972_v19 = vsub.f32 %v1966_v59, %v1885_v29 }
 0x546   : > { %4725 = vmatmul.msk.f32.gmra.mxu2 %vm920_vm3, %v6365_v39 }
 0x549   : > { %v1888_v6 = vpop.f32.mrf.mxu2 }
 0x54a   : > { %v1974_v28 = vsub.f32 %v1966_v59, %v1888_v6 }
 0x54c   : > { %5064 = vtanh.f32 %v1974_v28  ;;  %v6584_v28 = vpop.f32.mrf.mxu1 }
 0x54d   : > { %5066 = vtanh.f32 %v1972_v19  ;;  %8957 = vst [vmem:[#allocation85_spill] sm:$0xff] %v6584_v28 }
 0x54e   : > { %4726 = vmatmul.msk.f32.gmra.mxu2 %vm920_vm3, %v6575_v38  ;;  %5068 = vtanh.f32 %v1970_v54  ;;  %v6589_v54 = vld [vmem:[%s8724_s6] sm:$0xff] }
 0x54f   : > { %5070 = vtanh.f32 %v1968_v43 }
 0x551   : > { %v1914_v51 = vpop.f32.mrf.mxu2 }
 0x552   : > { %v5065_v56 = vpop.eup %5064  ;;  %v1943_v43 = vmul.f32 %v6589_v54, %v1914_v51 }
 0x553   : > { %4745 = vmatpush.msk.msra.mxu1 %vm927_vm1, %v5065_v56  ;;  %v5067_v5 = vpop.eup %5066 }
 0x554   : > { %v5069_v29 = vpop.eup %5068 }
 0x555   : > { %2324 = vmatpush.msra.mxu1 %v5067_v5  ;;  %v5071_v42 = vpop.eup %5070 }
 0x556   : > { %4727 = vmatmul.msk.f32.gmra.mxu2 %vm920_vm3, %v6372_v36 }
 0x557   : > { %2325 = vmatpush.msra.mxu1 %v5069_v29  ;;  %v6602_v29 = vpop.f32.mrf.mxu1 }
 0x558   : > { %8958 = vst [vmem:[#allocation86_spill] sm:$0xff] %v6602_v29 }
 0x559   : > { %v1917_v27 = vpop.f32.mrf.mxu2  ;;  %2326 = vmatpush.msra.mxu1 %v5071_v42 }
 0x55a   : > { %v1945_v19 = vmul.f32 %v6595_v9, %v1917_v27  ;;  %4746 = vmatmul.msk.f32.vlgmr.msra.gmra.mxu1 %vm920_vm3, %v6469_v58 }
 0x55c   : > { %v1947_v59 = vadd.f32 %v1945_v19, %v1943_v43 }
 0x55e   : > { %v1948_v6 = vrot.slane %v1947_v59, 4 }
 0x55f   : > { %v6607_v63 = vpop.f32.mrf.mxu1 }
 0x560   : > { %v1949_v56 = vadd.f32 %v1948_v6, %v1947_v59  ;;  %8959 = vst [vmem:[#allocation87_spill] sm:$0xff] %v6607_v63  ;;  %v6799_v63 = vld [vmem:[%s8726_s8 + $0x8] sm:$0xff] }
 0x561   : > { %8973 = vst [vmem:[#allocation101_spill] sm:$0xff] %v6799_v63 }
 0x562   : > { %v1950_v5 = vrot.slane %v1949_v56, 2  ;;  %4747 = vmatmul.msk.f32.gmra.mxu1 %vm920_vm3, %v6322_v41 }
 0x564   : > { %v1951_v51 = vadd.f32 %v1950_v5, %v1949_v56 }
 0x566   : > { %v1952_v42 = vrot.slane %v1951_v51, 1 }
 0x567   : > { %v6615_v56 = vpop.f32.mrf.mxu1 }
 0x568   : > { %v1953_v34 = vadd.f32 %v1952_v42, %v1951_v51  ;;  %8960 = vst [vmem:[#allocation88_spill] sm:$0xff] %v6615_v56  ;;  %v4808_v42 = vld [vmem:[%s5361_s19 + $0x170] sm:$0xff] }
 0x56a   : > { %v1963_v28 = vadd.f32 %v1953_v34, %v5789_v2  ;;  %4748 = vmatmul.msk.f32.gmra.mxu1 %vm920_vm3, %v6481_v24 }
 0x56c   : > { %v1965_v27 = vperm.slane %v1963_v28, 0 }
 0x56e   : > { %v1973_v43 = vsub.f32 %v1965_v27, %v6548_v40  ;;  %v1971_v19 = vsub.f32 %v1965_v27, %v6534_v20  ;;  %v1969_v59 = vsub.f32 %v1965_v27, %v6523_v30  ;;  %v1967_v6 = vsub.f32 %v1965_v27, %v6517_v3  ;;  %v4807_v27 = vld [vmem:[%s5361_s19 + $0x168] sm:$0xff] }
 0x56f   : > { %v6622_v30 = vpop.f32.mrf.mxu1 }
 0x570   : > { %5072 = vtanh.f32 %v1973_v43  ;;  %8961 = vst [vmem:[#allocation89_spill] sm:$0xff] %v6622_v30  ;;  %v9018_v30 = vld [vmem:[#allocation12_spill] sm:$0xff] }
 0x571   : > { %5074 = vtanh.f32 %v1971_v19  ;;  %v4805_v19 = vld [vmem:[%s5361_s19 + $0x158] sm:$0xff] }
 0x572   : > { %4749 = vmatmul.msk.f32.gmra.mxu1 %vm920_vm3, %v6330_v49  ;;  %5076 = vtanh.f32 %v1969_v59  ;;  %v4804_v59 = vld [vmem:[%s5361_s19 + $0x150] sm:$0xff] }
 0x573   : > { %5078 = vtanh.f32 %v1967_v6  ;;  %v4803_v6 = vld [vmem:[%s5361_s19 + $0x148] sm:$0xff] }
 0x576   : > { %v5073_v34 = vpop.eup %5072 }
 0x577   : > { %4728 = vmatpush.msk.msra.mxu0 %vm927_vm1, %v5073_v34  ;;  %v5075_v28 = vpop.eup %5074  ;;  %v6630_v3 = vpop.f32.mrf.mxu1  ;;  %v4802_v34 = vld [vmem:[%s5361_s19 + $0x140] sm:$0xff] }
 0x578   : > { %v5077_v40 = vpop.eup %5076  ;;  %8962 = vst [vmem:[#allocation90_spill] sm:$0xff] %v6630_v3 }
 0x579   : > { %2259 = vmatpush.msra.mxu0 %v5075_v28  ;;  %v5079_v20 = vpop.eup %5078  ;;  %v4801_v28 = vld [vmem:[%s5361_s19 + $0x138] sm:$0xff] }
 0x57a   : > { %4750 = vmatmul.msk.f32.gmra.mxu1 %vm920_vm3, %v6497_v37 }
 0x57b   : > { %2260 = vmatpush.msra.mxu0 %v5077_v40 }
 0x57d   : > { %2261 = vmatpush.msra.mxu0 %v5079_v20  ;;  %v4799_v20 = vld [vmem:[%s5361_s19 + $0x128] sm:$0xff] }
 0x57e   : > { %4729 = vmatmul.msk.f32.vlgmr.msra.gmra.mxu0 %vm920_vm3, %v6469_v58 }
 0x57f   : > { %v6636_v5 = vpop.f32.mrf.mxu1 }
 0x580   : > { %8963 = vst [vmem:[#allocation91_spill] sm:$0xff] %v6636_v5 }
 0x582   : > { %4751 = vmatmul.msk.f32.gmra.mxu1 %vm920_vm3, %v6337_v0 }
 0x586   : > { %4730 = vmatmul.msk.f32.gmra.mxu0 %vm920_vm3, %v6322_v41 }
 0x587   : > { %v6642_v41 = vpop.f32.mrf.mxu1 }
 0x588   : > { %8964 = vst [vmem:[#allocation92_spill] sm:$0xff] %v6642_v41  ;;  %v6805_v41 = vld [vmem:[%s8731_s13 + $0x28] sm:$0xff] }
 0x58a   : > { %4752 = vmatmul.msk.f32.gmra.mxu1 %vm920_vm3, %v6511_v35 }
 0x58e   : > { %4731 = vmatmul.msk.f32.gmra.mxu0 %vm920_vm3, %v6481_v24 }
 0x58f   : > { %v6650_v51 = vpop.f32.mrf.mxu1 }
 0x590   : > { %8965 = vst [vmem:[#allocation93_spill] sm:$0xff] %v6650_v51 }
 0x592   : > { %4753 = vmatmul.msk.f32.gmra.mxu1 %vm920_vm3, %v6344_v14 }
 0x596   : > { %4732 = vmatmul.msk.f32.gmra.mxu0 %vm920_vm3, %v6330_v49  ;;  %v4809_v49 = vld [vmem:[%s5361_s19 + $0x178] sm:$0xff] }
 0x597   : > { %2701 = vmatpush.msrb.mxu1 %v4809_v49  ;;  %2636 = vmatpush.msrb.mxu0 %v4809_v49  ;;  %v6659_v43 = vpop.f32.mrf.mxu1  ;;  %v4798_v49 = vld [vmem:[%s5361_s19 + $0x120] sm:$0xff] }
 0x598   : > { %8966 = vst [vmem:[#allocation94_spill] sm:$0xff] %v6659_v43  ;;  %v6792_v43 = vld [vmem:[%s8731_s13 + $0x30] sm:$0xff] }
 0x599   : > { %2702 = vmatpush.msrb.mxu1 %v4808_v42  ;;  %2637 = vmatpush.msrb.mxu0 %v4808_v42  ;;  %v4797_v42 = vld [vmem:[%s5361_s19 + $0x118] sm:$0xff] }
 0x59a   : > { %4754 = vmatmul.msk.f32.gmra.mxu1 %vm920_vm3, %v6527_v47 }
 0x59b   : > { %2703 = vmatpush.msrb.mxu1 %v4807_v27  ;;  %2638 = vmatpush.msrb.mxu0 %v4807_v27 }
 0x59e   : > { %4733 = vmatmul.msk.f32.gmra.mxu0 %vm920_vm3, %v6497_v37 }
 0x59f   : > { %v6673_v40 = vpop.f32.mrf.mxu1 }
 0x5a0   : > { %8967 = vst [vmem:[#allocation95_spill] sm:$0xff] %v6673_v40  ;;  %v6786_v40 = vld [vmem:[%s8726_s8 + $0x18] sm:$0xff] }
 0x5a1   : > { %8972 = vst [vmem:[#allocation100_spill] sm:$0xff] %v6786_v40 }
 0x5a2   : > { %4755 = vmatmul.msk.f32.gmra.mxu1 %vm920_vm3, %v6351_v32 }
 0x5a6   : > { %4734 = vmatmul.msk.f32.gmra.mxu0 %vm920_vm3, %v6337_v0  ;;  %v4806_v0 = vld [vmem:[%s5361_s19 + $0x160] sm:$0xff] }
 0x5a7   : > { %2704 = vmatpush.msrb.mxu1 %v4806_v0  ;;  %2639 = vmatpush.msrb.mxu0 %v4806_v0  ;;  %v6683_v27 = vpop.f32.mrf.mxu1  ;;  %v4796_v0 = vld [vmem:[%s5361_s19 + $0x110] sm:$0xff] }
 0x5a8   : > { %8968 = vst [vmem:[#allocation96_spill] sm:$0xff] %v6683_v27 }
 0x5a9   : > { %2705 = vmatpush.msrb.mxu1 %v4805_v19  ;;  %2640 = vmatpush.msrb.mxu0 %v4805_v19  ;;  %v4795_v19 = vld [vmem:[%s5361_s19 + $0x108] sm:$0xff] }
 0x5aa   : > { %4756 = vmatmul.msk.f32.gmra.mxu1 %vm920_vm3, %v6552_v55 }
 0x5ab   : > { %2706 = vmatpush.msrb.mxu1 %v4804_v59  ;;  %2641 = vmatpush.msrb.mxu0 %v4804_v59  ;;  %v4794_v59 = vld [vmem:[%s5361_s19 + $0x100] sm:$0xff] }
 0x5ad   : > { %2707 = vmatpush.msrb.mxu1 %v4803_v6  ;;  %2642 = vmatpush.msrb.mxu0 %v4803_v6  ;;  %v6695_v6 = vld [vmem:[%s8727_s9 + $0x8] sm:$0xff] }
 0x5ae   : > { %4735 = vmatmul.msk.f32.gmra.mxu0 %vm920_vm3, %v6511_v35 }
 0x5af   : > { %2708 = vmatpush.msrb.mxu1 %v4802_v34  ;;  %2643 = vmatpush.msrb.mxu0 %v4802_v34  ;;  %v6706_v34 = vpop.f32.mrf.mxu1 }
 0x5b0   : > { %8969 = vst [vmem:[#allocation97_spill] sm:$0xff] %v6706_v34  ;;  %v6778_v34 = vld [vmem:[%s8731_s13 + $0x38] sm:$0xff] }
 0x5b1   : > { %2709 = vmatpush.msrb.mxu1 %v4801_v28  ;;  %2644 = vmatpush.msrb.mxu0 %v4801_v28  ;;  %v6711_v28 = vld [vmem:[%s8731_s13 + $0x70] sm:$0xff] }
 0x5b2   : > { %4757 = vmatmul.msk.f32.gmra.mxu1 %vm920_vm3, %v6358_v22 }
 0x5b6   : > { %4736 = vmatmul.msk.f32.gmra.mxu0 %vm920_vm3, %v6344_v14  ;;  %v4800_v14 = vld [vmem:[%s5361_s19 + $0x130] sm:$0xff] }
 0x5b7   : > { %2710 = vmatpush.msrb.mxu1 %v4800_v14  ;;  %2645 = vmatpush.msrb.mxu0 %v4800_v14  ;;  %v6717_v14 = vld [vmem:[%s8731_s13 + $0x68] sm:$0xff] }
 0x5b9   : > { %2711 = vmatpush.msrb.mxu1 %v4799_v20  ;;  %2646 = vmatpush.msrb.mxu0 %v4799_v20  ;;  %v6725_v20 = vld [vmem:[%s8731_s13 + $0x60] sm:$0xff] }
 0x5ba   : > { %4758 = vmatmul.msk.f32.gmra.mxu1 %vm920_vm3, %v6564_v61 }
 0x5bb   : > { %2712 = vmatpush.msrb.mxu1 %v4798_v49  ;;  %2647 = vmatpush.msrb.mxu0 %v4798_v49  ;;  %v6731_v49 = vld [vmem:[%s8731_s13 + $0x58] sm:$0xff] }
 0x5bd   : > { %2713 = vmatpush.msrb.mxu1 %v4797_v42  ;;  %2648 = vmatpush.msrb.mxu0 %v4797_v42 }
 0x5be   : > { %4737 = vmatmul.msk.f32.gmra.mxu0 %vm920_vm3, %v6527_v47 }
 0x5bf   : > { %2714 = vmatpush.msrb.mxu1 %v4796_v0  ;;  %2649 = vmatpush.msrb.mxu0 %v4796_v0  ;;  %v6739_v0 = vld [vmem:[%s8731_s13 + $0x50] sm:$0xff] }
 0x5c1   : > { %2715 = vmatpush.msrb.mxu1 %v4795_v19  ;;  %2650 = vmatpush.msrb.mxu0 %v4795_v19 }
 0x5c2   : > { %4759 = vmatmul.msk.f32.gmra.mxu1 %vm920_vm3, %v6365_v39 }
 0x5c3   : > { %2716 = vmatpush.msrb.mxu1 %v4794_v59  ;;  %2651 = vmatpush.msrb.mxu0 %v4794_v59  ;;  %v6746_v59 = vld [vmem:[%s8731_s13 + $0x48] sm:$0xff] }
 0x5c5   : > { %2832 = vmatpush.msra.mxu1 %v6695_v6 }
 0x5c6   : > { %4738 = vmatmul.msk.f32.gmra.mxu0 %vm920_vm3, %v6351_v32  ;;  %v6701_v32 = vld [vmem:[%s8731_s13 + $0x78] sm:$0xff] }
 0x5c7   : > { %3411 = vmatpush.msra.mxu0 %v6701_v32 }
 0x5c9   : > { %3412 = vmatpush.msra.mxu0 %v6711_v28 }
 0x5ca   : > { %4760 = vmatmul.msk.f32.gmra.mxu1 %vm920_vm3, %v6575_v38 }
 0x5cb   : > { %3413 = vmatpush.msra.mxu0 %v6717_v14 }
 0x5cd   : > { %3414 = vmatpush.msra.mxu0 %v6725_v20 }
 0x5ce   : > { %4739 = vmatmul.msk.f32.gmra.mxu0 %vm920_vm3, %v6552_v55 }
 0x5cf   : > { %3415 = vmatpush.msra.mxu0 %v6731_v49 }
 0x5d1   : > { %3416 = vmatpush.msra.mxu0 %v6739_v0 }
 0x5d2   : > { %4761 = vmatmul.msk.f32.gmra.mxu1 %vm920_vm3, %v6372_v36 }
 0x5d3   : > { %3417 = vmatpush.msra.mxu0 %v6746_v59 }
 0x5d6   : > { %4740 = vmatmul.msk.f32.gmra.mxu0 %vm920_vm3, %v6358_v22  ;;  %v6753_v22 = vld [vmem:[%s8721_s3] sm:$0xff] }
 0x5d7   : > { %v2328_v42 = vpop.f32.mrf.mxu1 }
 0x5d8   : > { %v2377_v19 = vmul.f32 %v2328_v42, %v6030_v33  ;;  %v6759_v33 = vld [vmem:[%s8726_s8 + $0x38] sm:$0x1]  ;;  %v6766_v42 = vld [vmem:[%s8731_s13 + $0x40] sm:$0xff] }
 0x5d9   : > { %8970 = vst [vmem:[#allocation98_spill] sm:$0xff] %v6759_v33  ;;  %3418 = vmatpush.msra.mxu0 %v6766_v42 }
 0x5da   : > { %4762 = vmatmul.msk.f32.vlgmr.msra.gmra.mxu2 %vm991_vm4, %v2377_v19  ;;  %2717 = vmatmul.f32.vlgmr.msrb.gmra.mxu1 %v6753_v22  ;;  %v6772_v19 = vld [vmem:[%s8726_s8 + $0x28] sm:$0xff] }
 0x5db   : > { %4822 = vmatpush.msk.msrb.mxu1 %vm927_vm1, %v6759_v33  ;;  %8971 = vst [vmem:[#allocation99_spill] sm:$0xff] %v6772_v19  ;;  %3419 = vmatpush.msra.mxu0 %v6778_v34 }
 0x5dd   : > { %2888 = vmatpush.msrb.mxu1 %v6772_v19  ;;  %3420 = vmatpush.msra.mxu0 %v6792_v43 }
 0x5de   : > { %4741 = vmatmul.msk.f32.gmra.mxu0 %vm920_vm3, %v6564_v61 }
 0x5df   : > { %v2331_v27 = vpop.f32.mrf.mxu1  ;;  %2889 = vmatpush.msrb.mxu1 %v6786_v40  ;;  %3421 = vmatpush.msra.mxu0 %v6805_v41 }
 0x5e0   : > { %v2379_v51 = vmul.f32 %v2331_v27, %v6047_v1  ;;  %v6812_v1 = vld [vmem:[%s8721_s3 + $0x8] sm:$0xff]  ;;  %v6818_v27 = vld [vmem:[%s8731_s13 + $0x20] sm:$0xff] }
 0x5e1   : > { %2890 = vmatpush.msrb.mxu1 %v6799_v63  ;;  %8974 = vst [vmem:[#allocation102_spill] sm:$0xff] %v6812_v1  ;;  %3422 = vmatpush.msra.mxu0 %v6818_v27 }
 0x5e2   : > { %4763 = vmatmul.msk.f32.gmra.mxu2 %vm991_vm4, %v2379_v51  ;;  %2720 = vmatmul.f32.gmra.mxu1 %v6812_v1 }
 0x5e3   : > { %3423 = vmatpush.msra.mxu0 %v5988_v48 }
 0x5e5   : > { %3424 = vmatpush.msra.mxu0 %v6000_v10 }
 0x5e6   : > { %4742 = vmatmul.msk.f32.gmra.mxu0 %vm920_vm3, %v6365_v39 }
 0x5e7   : > { %v2334_v51 = vpop.f32.mrf.mxu1  ;;  %3425 = vmatpush.msra.mxu0 %v6007_v62 }
 0x5e8   : > { %v2381_v5 = vmul.f32 %v2334_v51, %v6066_v17 }
 0x5e9   : > { %3426 = vmatpush.msra.mxu0 %v6013_v31  ;;  %v6841_v31 = vld [vmem:[%s8719_s1] sm:$0xff] }
 0x5ea   : > { %4764 = vmatmul.msk.f32.gmra.mxu2 %vm991_vm4, %v2381_v5 }
 0x5ee   : > { %4743 = vmatmul.msk.f32.gmra.mxu0 %vm920_vm3, %v6575_v38 }
 0x5ef   : > { %v2337_v3 = vpop.f32.mrf.mxu1 }
 0x5f0   : > { %v2383_v48 = vmul.f32 %v2337_v3, %v6085_v4 }
 0x5f2   : > { %4765 = vmatmul.msk.f32.gmra.mxu2 %vm991_vm4, %v2383_v48 }
 0x5f6   : > { %4744 = vmatmul.msk.f32.gmra.mxu0 %vm920_vm3, %v6372_v36 }
 0x5f7   : > { %v2340_v10 = vpop.f32.mrf.mxu1 }
 0x5f8   : > { %v2385_v17 = vmul.f32 %v2340_v10, %v6104_v13 }
 0x5fa   : > { %4766 = vmatmul.msk.f32.gmra.mxu2 %vm991_vm4, %v2385_v17 }
 0x5fb   : > { %v2263_v62 = vpop.f32.mrf.mxu0 }
 0x5fc   : > { %v2376_v39 = vmul.f32 %v2263_v62, %v6038_v7  ;;  %v6851_v7 = vld [vmem:[%s8719_s1 + $0x8] sm:$0xff] }
 0x5fd   : > { %8975 = vst [vmem:[#allocation103_spill] sm:$0xff] %v6851_v7 }
 0x5fe   : > { %2472 = vmatmul.f32.vlgmr.msrb.gmra.mxu3 %v2376_v39  ;;  %2652 = vmatmul.f32.vlgmr.msrb.gmra.mxu0 %v6841_v31 }
 0x5ff   : > { %v2343_v4 = vpop.f32.mrf.mxu1  ;;  %3787 = vmatpush.msrb.mxu0 %v6695_v6 }
 0x600   : > { %v2387_v36 = vmul.f32 %v2343_v4, %v6121_v52  ;;  %v6856_v52 = vpop.f32.mrf.mxu2 }
 0x601   : > { %8976 = vst [vmem:[#allocation104_spill] sm:$0xff] %v6856_v52 }
 0x602   : > { %4767 = vmatmul.msk.f32.gmra.mxu2 %vm991_vm4, %v2387_v36 }
 0x603   : > { %v2266_v13 = vpop.f32.mrf.mxu0 }
 0x604   : > { %v2378_v3 = vmul.f32 %v2266_v13, %v6057_v15  ;;  %v6862_v15 = vld [vmem:[%s8719_s1 + $0x10] sm:$0xff] }
 0x605   : > { %8977 = vst [vmem:[#allocation105_spill] sm:$0xff] %v6862_v15 }
 0x606   : > { %2475 = vmatmul.f32.gmra.mxu3 %v2378_v3  ;;  %2655 = vmatmul.f32.gmra.mxu0 %v6851_v7 }
 0x607   : > { %v2346_v5 = vpop.f32.mrf.mxu1 }
 0x608   : > { %v2389_v51 = vmul.f32 %v2346_v5, %v6136_v21  ;;  %v6868_v39 = vpop.f32.mrf.mxu2 }
 0x609   : > { %8978 = vst [vmem:[#allocation106_spill] sm:$0xff] %v6868_v39 }
 0x60a   : > { %4768 = vmatmul.msk.f32.gmra.mxu2 %vm991_vm4, %v2389_v51 }
 0x60b   : > { %v2269_v6 = vpop.f32.mrf.mxu0 }
 0x60c   : > { %v2380_v48 = vmul.f32 %v2269_v6, %v6076_v18  ;;  %v6873_v18 = vld [vmem:[%s8719_s1 + $0x18] sm:$0xff] }
 0x60d   : > { %8979 = vst [vmem:[#allocation107_spill] sm:$0xff] %v6873_v18 }
 0x60e   : > { %2478 = vmatmul.f32.gmra.mxu3 %v2380_v48  ;;  %2658 = vmatmul.f32.gmra.mxu0 %v6862_v15 }
 0x60f   : > { %v2349_v10 = vpop.f32.mrf.mxu1 }
 0x610   : > { %v2391_v17 = vmul.f32 %v2349_v10, %v6152_v44  ;;  %v6885_v5 = vpop.f32.mrf.mxu2 }
 0x611   : > { %8981 = vst [vmem:[#allocation109_spill] sm:$0xff] %v6885_v5 }
 0x612   : > { %4769 = vmatmul.msk.f32.gmra.mxu2 %vm991_vm4, %v2391_v17 }
 0x613   : > { %v2272_v21 = vpop.f32.mrf.mxu0 }
 0x614   : > { %v2382_v62 = vmul.f32 %v2272_v21, %v6095_v57  ;;  %v6882_v57 = vld [vmem:[%s8719_s1 + $0x20] sm:$0xff] }
 0x615   : > { %8980 = vst [vmem:[#allocation108_spill] sm:$0xff] %v6882_v57 }
 0x616   : > { %2481 = vmatmul.f32.gmra.mxu3 %v2382_v62  ;;  %2661 = vmatmul.f32.gmra.mxu0 %v6873_v18 }
 0x617   : > { %v2352_v4 = vpop.f32.mrf.mxu1 }
 0x618   : > { %v2393_v36 = vmul.f32 %v2352_v4, %v6174_v25  ;;  %v6897_v17 = vpop.f32.mrf.mxu2 }
 0x619   : > { %8983 = vst [vmem:[#allocation111_spill] sm:$0xff] %v6897_v17 }
 0x61a   : > { %4770 = vmatmul.msk.f32.gmra.mxu2 %vm991_vm4, %v2393_v36 }
 0x61b   : > { %v2275_v44 = vpop.f32.mrf.mxu0 }
 0x61c   : > { %v2384_v13 = vmul.f32 %v2275_v44, %v6114_v11  ;;  %v6893_v11 = vld [vmem:[%s8719_s1 + $0x28] sm:$0xff] }
 0x61d   : > { %8982 = vst [vmem:[#allocation110_spill] sm:$0xff] %v6893_v11 }
 0x61e   : > { %2484 = vmatmul.f32.gmra.mxu3 %v2384_v13  ;;  %2664 = vmatmul.f32.gmra.mxu0 %v6882_v57 }
 0x61f   : > { %v2355_v3 = vpop.f32.mrf.mxu1 }
 0x620   : > { %v2395_v51 = vmul.f32 %v2355_v3, %v6190_v26  ;;  %v6909_v36 = vpop.f32.mrf.mxu2 }
 0x621   : > { %8985 = vst [vmem:[#allocation113_spill] sm:$0xff] %v6909_v36 }
 0x622   : > { %4771 = vmatmul.msk.f32.gmra.mxu2 %vm991_vm4, %v2395_v51 }
 0x623   : > { %v2278_v25 = vpop.f32.mrf.mxu0 }
 0x624   : > { %v2386_v6 = vmul.f32 %v2278_v25, %v6129_v12  ;;  %v6904_v12 = vld [vmem:[%s8719_s1 + $0x30] sm:$0xff] }
 0x625   : > { %8984 = vst [vmem:[#allocation112_spill] sm:$0xff] %v6904_v12 }
 0x626   : > { %2487 = vmatmul.f32.gmra.mxu3 %v2386_v6  ;;  %2667 = vmatmul.f32.gmra.mxu0 %v6893_v11  ;;  %v9037_v11 = vld [vmem:[#allocation23_spill] sm:$0xff] }
 0x627   : > { %v2358_v48 = vpop.f32.mrf.mxu1 }
 0x628   : > { %v2397_v10 = vmul.f32 %v2358_v48, %v6251_v23  ;;  %v6921_v25 = vpop.f32.mrf.mxu2  ;;  %v8989_v48 = vld [vmem:[#allocation15_spill] sm:$0xff] }
 0x629   : > { %8987 = vst [vmem:[#allocation115_spill] sm:$0xff] %v6921_v25  ;;  %v9014_v25 = vld [vmem:[#allocation56_spill] sm:$0xff] }
 0x62a   : > { %4772 = vmatmul.msk.f32.gmra.mxu2 %vm991_vm4, %v2397_v10 }
 0x62b   : > { %v2281_v26 = vpop.f32.mrf.mxu0 }
 0x62c   : > { %v2388_v21 = vmul.f32 %v2281_v26, %v6145_v8  ;;  %v6915_v8 = vld [vmem:[%s8719_s1 + $0x38] sm:$0xff] }
 0x62d   : > { %8986 = vst [vmem:[#allocation114_spill] sm:$0xff] %v6915_v8  ;;  %v8990_v26 = vld [vmem:[#allocation33_spill] sm:$0xff] }
 0x62e   : > { %2490 = vmatmul.f32.gmra.mxu3 %v2388_v21  ;;  %2670 = vmatmul.f32.gmra.mxu0 %v6904_v12  ;;  %v9035_v12 = vld [vmem:[#allocation14_spill] sm:$0xff] }
 0x62f   : > { %v2361_v62 = vpop.f32.mrf.mxu1 }
 0x630   : > { %v2399_v4 = vmul.f32 %v2361_v62, %v6268_v46 }
 0x632   : > { %4773 = vmatmul.msk.f32.gmra.mxu2 %vm991_vm4, %v2399_v4  ;;  %v6938_v4 = vpop.f32.mrf.mxu2 }
 0x633   : > { %v2284_v23 = vpop.f32.mrf.mxu0  ;;  %8992 = vst [vmem:[#allocation33_spill] sm:$0xff] %v6938_v4  ;;  %v9001_v4 = vld [vmem:[#allocation45_spill] sm:$0xff] }
 0x634   : > { %v2390_v44 = vmul.f32 %v2284_v23, %v6165_v16  ;;  %v6926_v16 = vld [vmem:[%s8719_s1 + $0x40] sm:$0xff]  ;;  %v8993_v23 = vld [vmem:[#allocation16_spill] sm:$0xff] }
 0x635   : > { %8988 = vst [vmem:[#allocation116_spill] sm:$0xff] %v6926_v16 }
 0x636   : > { %2493 = vmatmul.f32.gmra.mxu3 %v2390_v44  ;;  %2673 = vmatmul.f32.gmra.mxu0 %v6915_v8 }
 0x637   : > { %v2364_v13 = vpop.f32.mrf.mxu1 }
 0x638   : > { %v2401_v3 = vmul.f32 %v2364_v13, %v6285_v45 }
 0x63a   : > { %4774 = vmatmul.msk.f32.gmra.mxu2 %vm991_vm4, %v2401_v3  ;;  %v8994_v3 = vld [vmem:[#allocation35_spill] sm:$0xff] }
 0x63b   : > { %v2287_v46 = vpop.f32.mrf.mxu0 }
 0x63c   : > { %v2392_v51 = vmul.f32 %v2287_v46, %v6183_v50  ;;  %v6935_v50 = vld [vmem:[%s8719_s1 + $0x48] sm:$0xff] }
 0x63d   : > { %8991 = vst [vmem:[#allocation15_spill] sm:$0xff] %v6935_v50 }
 0x63e   : > { %2496 = vmatmul.f32.gmra.mxu3 %v2392_v51  ;;  %2676 = vmatmul.f32.gmra.mxu0 %v6926_v16  ;;  %v6946_v51 = vld [vmem:[%s8719_s1 + $0x50] sm:$0xff] }
 0x63f   : > { %v2367_v6 = vpop.f32.mrf.mxu1  ;;  %8995 = vst [vmem:[#allocation16_spill] sm:$0xff] %v6946_v51 }
 0x640   : > { %v2403_v10 = vmul.f32 %v2367_v6, %v8989_v48  ;;  %v8996_v48 = vld [vmem:[#allocation17_spill] sm:$0xff] }
 0x642   : > { %4775 = vmatmul.msk.f32.gmra.mxu2 %vm991_vm4, %v2403_v10 }
 0x643   : > { %v2290_v45 = vpop.f32.mrf.mxu0 }
 0x644   : > { %v2394_v21 = vmul.f32 %v2290_v45, %v8990_v26  ;;  %v6950_v45 = vpop.f32.mrf.mxu2 }
 0x645   : > { %8997 = vst [vmem:[#allocation35_spill] sm:$0xff] %v6950_v45  ;;  %v9013_v45 = vld [vmem:[#allocation9_spill] sm:$0xff] }
 0x646   : > { %2499 = vmatmul.f32.gmra.mxu3 %v2394_v21  ;;  %2679 = vmatmul.f32.gmra.mxu0 %v6935_v50  ;;  %v8998_v21 = vld [vmem:[#allocation36_spill] sm:$0xff] }
 0x647   : > { %v2370_v62 = vpop.f32.mrf.mxu1 }
 0x648   : > { %v2405_v44 = vmul.f32 %v2370_v62, %v8993_v23  ;;  %v8999_v23 = vld [vmem:[#allocation43_spill] sm:$0xff] }
 0x64a   : > { %4776 = vmatmul.msk.f32.gmra.mxu2 %vm991_vm4, %v2405_v44 }
 0x64b   : > { %v2293_v13 = vpop.f32.mrf.mxu0 }
 0x64c   : > { %v2396_v46 = vmul.f32 %v2293_v13, %v8994_v3  ;;  %v9000_v3 = vld [vmem:[#allocation37_spill] sm:$0xff] }
 0x64e   : > { %2502 = vmatmul.f32.gmra.mxu3 %v2396_v46  ;;  %2682 = vmatmul.f32.gmra.mxu0 %v6946_v51 }
 0x64f   : > { %v2373_v6 = vpop.f32.mrf.mxu1 }
 0x650   : > { %v2407_v10 = vmul.f32 %v2373_v6, %v8996_v48  ;;  %v6966_v48 = vld [vmem:[%s8727_s9] sm:$0xff] }
 0x652   : > { %4777 = vmatmul.msk.f32.gmra.mxu2 %vm991_vm4, %v2407_v10  ;;  %v9002_v10 = vld [vmem:[#allocation38_spill] sm:$0xff] }
 0x653   : > { %v2296_v26 = vpop.f32.mrf.mxu0 }
 0x654   : > { %v2398_v62 = vmul.f32 %v2296_v26, %v8998_v21 }
 0x656   : > { %2505 = vmatmul.f32.gmra.mxu3 %v2398_v62  ;;  %2685 = vmatmul.f32.gmra.mxu0 %v8999_v23  ;;  %v9004_v62 = vld [vmem:[#allocation39_spill] sm:$0xff] }
 0x657   : > { %v6955_v44 = vpop.f32.mrf.mxu1 }
 0x65b   : > { %v2299_v13 = vpop.f32.mrf.mxu0 }
 0x65c   : > { %v2400_v46 = vmul.f32 %v2299_v13, %v9000_v3  ;;  %v6980_v13 = vld [vmem:[%s8719_s1 + $0x70] sm:$0xff] }
 0x65d   : > { %9005 = vst [vmem:[#allocation36_spill] sm:$0xff] %v6980_v13 }
 0x65e   : > { %2508 = vmatmul.f32.gmra.mxu3 %v2400_v46  ;;  %2688 = vmatmul.f32.gmra.mxu0 %v9001_v4  ;;  %v6973_v4 = vld [vmem:[%s8719_s1 + $0x68] sm:$0xff]  ;;  %v9006_v46 = vld [vmem:[#allocation40_spill] sm:$0xff] }
 0x65f   : > { %v6959_v36 = vpop.f32.mrf.mxu1  ;;  %9003 = vst [vmem:[#allocation17_spill] sm:$0xff] %v6973_v4 }
 0x660   : > { %2738 = vmatpush.msra.mxu3 %v6959_v36 }
 0x662   : > { %2739 = vmatpush.msra.mxu3 %v6955_v44 }
 0x663   : > { %v2302_v6 = vpop.f32.mrf.mxu0 }
 0x664   : > { %2803 = vmatpush.msrb.mxu3 %v6966_v48  ;;  %v2402_v26 = vmul.f32 %v2302_v6, %v9002_v10  ;;  %v6987_v10 = vld [vmem:[%s8719_s1 + $0x78] sm:$0xff] }
 0x665   : > { %9007 = vst [vmem:[#allocation43_spill] sm:$0xff] %v6987_v10 }
 0x666   : > { %2511 = vmatmul.f32.gmra.mxu3 %v2402_v26  ;;  %2691 = vmatmul.f32.gmra.mxu0 %v6973_v4 }
 0x66b   : > { %v2305_v21 = vpop.f32.mrf.mxu0 }
 0x66c   : > { %v2404_v23 = vmul.f32 %v2305_v21, %v9004_v62  ;;  %v6995_v21 = vld [vmem:[%s8722_s4] sm:$0xff]  ;;  %v9009_v62 = vld [vmem:[#allocation52_spill] sm:$0xff] }
 0x66d   : > { %9008 = vst [vmem:[#allocation37_spill] sm:$0xff] %v6995_v21 }
 0x66e   : > { %2514 = vmatmul.f32.gmra.mxu3 %v2404_v23  ;;  %2694 = vmatmul.f32.gmra.mxu0 %v6980_v13 }
 0x673   : > { %v2308_v3 = vpop.f32.mrf.mxu0 }
 0x674   : > { %v2406_v6 = vmul.f32 %v2308_v3, %v9006_v46  ;;  %v9011_v3 = vld [vmem:[#allocation53_spill] sm:$0xff] }
 0x676   : > { %2517 = vmatmul.f32.gmra.mxu3 %v2406_v6  ;;  %2697 = vmatmul.f32.gmra.mxu0 %v6987_v10  ;;  %v9012_v6 = vld [vmem:[#allocation55_spill] sm:$0xff] }
 0x67b   : > { %v6990_v26 = vpop.f32.mrf.mxu0 }
 0x67e   : > { %4810 = vmatmul.msk.f32.vlgmr.msra.gmra.mxu3 %vm793_vm0, %v6995_v21 }
 0x67f   : > { %4819 = vmatpush.msk.msra.mxu3 %vm927_vm1, %v9009_v62 }
 0x681   : > { %v7001_v23 = vpop.f32.mrf.mxu3  ;;  %2865 = vmatpush.msra.mxu3 %v9011_v3 }
 0x682   : > { %9010 = vst [vmem:[#allocation45_spill] sm:$0xff] %v7001_v23 }
 0x683   : > { %v2656_v46 = vpop.f32.mrf.mxu0  ;;  %2866 = vmatpush.msra.mxu3 %v9012_v6 }
 0x684   : > { %v7006_v5 = vadd.f32 %v2656_v46, %v9013_v45 }
 0x685   : > { %2867 = vmatpush.msra.mxu3 %v9014_v25 }
 0x686   : > { %v2941_v52 = vsel %vm920_vm3, %v7006_v5, 0.0 }
 0x687   : > { %2942 = vadd.xlane.f32.xlu0 %v2941_v52 }
 0x689   : > { %v7011_v17 = vpop.f32.mrf.mxu3 }
 0x68a   : > { %9015 = vst [vmem:[#allocation38_spill] sm:$0xff] %v7011_v17 }
 0x68b   : > { %v7013_v39 = vpop.f32.mrf.mxu0 }
 0x691   : > { %v7015_v62 = vpop.f32.mrf.mxu3 }
 0x692   : > { %9016 = vst [vmem:[#allocation39_spill] sm:$0xff] %v7015_v62 }
 0x693   : > { %v7017_v23 = vpop.f32.mrf.mxu0 }
 0x699   : > { %v7019_v3 = vpop.f32.mrf.mxu3 }
 0x69a   : > { %9017 = vst [vmem:[#allocation40_spill] sm:$0xff] %v7019_v3  ;;  %v9022_v3 = vld [vmem:[#allocation4_spill] sm:$0xff] }
 0x69b   : > { %v2665_v6 = vpop.f32.mrf.mxu0 }
 0x69c   : > { %v7022_v46 = vadd.f32 %v2665_v6, %v9018_v30 }
 0x69e   : > { %v2950_v25 = vsel %vm920_vm3, %v7022_v46, 0.0 }
 0x69f   : > { %2951 = vadd.xlane.f32.xlu0 %v2950_v25 }
 0x6a1   : > { %v7026_v29 = vpop.f32.mrf.mxu3 }
 0x6a2   : > { %9019 = vst [vmem:[#allocation52_spill] sm:$0xff] %v7026_v29 }
 0x6a3   : > { %v7028_v52 = vpop.f32.mrf.mxu0 }
 0x6a9   : > { %v7030_v17 = vpop.f32.mrf.mxu3 }
 0x6aa   : > { %9020 = vst [vmem:[#allocation53_spill] sm:$0xff] %v7030_v17 }
 0x6ab   : > { %v7032_v58 = vpop.f32.mrf.mxu0 }
 0x6b1   : > { %v7034_v62 = vpop.f32.mrf.mxu3 }
 0x6b2   : > { %9021 = vst [vmem:[#allocation55_spill] sm:$0xff] %v7034_v62  ;;  %v9026_v62 = vld [vmem:[#allocation22_spill] sm:$0xff] }
 0x6b3   : > { %v2674_v56 = vpop.f32.mrf.mxu0 }
 0x6b4   : > { %v7037_v21 = vadd.f32 %v2674_v56, %v9022_v3 }
 0x6b6   : > { %v2959_v6 = vsel %vm920_vm3, %v7037_v21, 0.0 }
 0x6b7   : > { %2960 = vadd.xlane.f32.xlu0 %v2959_v6 }
 0x6b9   : > { %v7041_v30 = vpop.f32.mrf.mxu3 }
 0x6ba   : > { %9023 = vst [vmem:[#allocation56_spill] sm:$0xff] %v7041_v30 }
 0x6bb   : > { %v7043_v25 = vpop.f32.mrf.mxu0 }
 0x6c1   : > { %v7045_v29 = vpop.f32.mrf.mxu3 }
 0x6c2   : > { %9024 = vst [vmem:[#allocation117_spill] sm:$0xff] %v7045_v29 }
 0x6c3   : > { %v7047_v45 = vpop.f32.mrf.mxu0 }
 0x6c9   : > { %v7049_v17 = vpop.f32.mrf.mxu3 }
 0x6ca   : > { %9025 = vst [vmem:[#allocation118_spill] sm:$0xff] %v7049_v17  ;;  %v9030_v17 = vld [vmem:[#allocation26_spill] sm:$0xff] }
 0x6cb   : > { %v2683_v10 = vpop.f32.mrf.mxu0 }
 0x6cc   : > { %v7052_v13 = vadd.f32 %v2683_v10, %v9026_v62 }
 0x6ce   : > { %v2968_v56 = vsel %vm920_vm3, %v7052_v13, 0.0 }
 0x6cf   : > { %2969 = vadd.xlane.f32.xlu0 %v2968_v56 }
 0x6d1   : > { %v7056_v3 = vpop.f32.mrf.mxu3 }
 0x6d2   : > { %9027 = vst [vmem:[#allocation119_spill] sm:$0xff] %v7056_v3 }
 0x6d3   : > { %v7058_v6 = vpop.f32.mrf.mxu0 }
 0x6d9   : > { %v7060_v30 = vpop.f32.mrf.mxu3 }
 0x6da   : > { %9028 = vst [vmem:[#allocation120_spill] sm:$0xff] %v7060_v30  ;;  %v9034_v30 = vld [vmem:[#allocation2_spill] sm:$0xff] }
 0x6db   : > { %v7062_v4 = vpop.f32.mrf.mxu0 }
 0x6e1   : > { %v7064_v29 = vpop.f32.mrf.mxu3 }
 0x6e2   : > { %9029 = vst [vmem:[#allocation121_spill] sm:$0xff] %v7064_v29  ;;  %v1029_v29 = vsel %vm920_vm3, %v9035_v12, 0.0  ;;  %v1995_v12 = vsel %vm920_vm3, %v6497_v37, 0.0  ;;  %v2007_v37 = vsel %vm920_vm3, %v6527_v47, 0.0  ;;  %v2025_v47 = vsel %vm920_vm3, %v6575_v38, 0.0  ;;  %v5164_v38 = vld [vmem:[%s8731_s13 + $0xa0] sm:$0xff] }
 0x6e3   : > { %v2692_v51 = vpop.f32.mrf.mxu0 }
 0x6e4   : > { %v7067_v50 = vadd.f32 %v2692_v51, %v9030_v17  ;;  %v9036_v51 = vld [vmem:[#allocation19_spill] sm:$0xff] }
 0x6e5   : > { %v1047_v17 = vsel %vm920_vm3, %v9036_v51, 0.0 }
 0x6e6   : > { %v2977_v10 = vsel %vm920_vm3, %v7067_v50, 0.0 }
 0x6e7   : > { %2978 = vadd.xlane.f32.xlu0 %v2977_v10  ;;  %v1056_v10 = vsel %vm920_vm3, %v9037_v11, 0.0  ;;  %v2001_v11 = vsel %vm920_vm3, %v6511_v35, 0.0  ;;  %v2013_v35 = vsel %vm920_vm3, %v6552_v55, 0.0  ;;  %v5160_v55 = vld [vmem:[%s8731_s13 + $0xc0] sm:$0xff] }
 0x6e9   : > { %v7071_v62 = vpop.f32.mrf.mxu3 }
 0x6ea   : > { %9031 = vst [vmem:[#allocation122_spill] sm:$0xff] %v7071_v62  ;;  %v9038_v62 = vld [vmem:[#allocation27_spill] sm:$0xff] }
 0x6f1   : > { %v7073_v56 = vpop.f32.mrf.mxu3 }
 0x6f2   : > { %9032 = vst [vmem:[#allocation123_spill] sm:$0xff] %v7073_v56  ;;  %v1065_v56 = vsel %vm920_vm3, %v9038_v62, 0.0 }
 0x6f9   : > { %v7075_v3 = vpop.f32.mrf.mxu3 }
 0x6fa   : > { %9033 = vst [vmem:[#allocation124_spill] sm:$0xff] %v7075_v3 }
 0x701   : > { %v2741_v16 = vpop.f32.mrf.mxu3 }
 0x702   : > { %v2742_v8 = vadd.f32 %v2741_v16, %v9034_v30  ;;  %v1989_v16 = vsel %vm920_vm3, %v6481_v24, 0.0  ;;  %v9041_v24 = vld [vmem:[#allocation62_spill] sm:$0xff] }
 0x704   : > { %2744 = vxpose.xlu1.b32.start.end [1/1] (short) (narrow) %v2742_v8, 32  ;;  %v9040_v8 = vld [vmem:[#allocation61_spill] sm:$0xff] }
 0x77c   : > { %1030 = vadd.xlane.f32.xlu1 %v1029_v29 }
 0x784   : > { %1048 = vadd.xlane.f32.xlu1 %v1047_v17  ;;  %v9039_v17 = vld [vmem:[#allocation59_spill] sm:$0xff] }
 0x78c   : > { %1057 = vadd.xlane.f32.xlu1 %v1056_v10 }
 0x794   : > { %1066 = vadd.xlane.f32.xlu1 %v1065_v56  ;;  %v9042_v56 = vld [vmem:[#allocation63_spill] sm:$0xff] }
 0x79c   : > { %1990 = vadd.xlane.f32.xlu1 %v1989_v16  ;;  %v2019_v16 = vsel %vm920_vm3, %v6564_v61, 0.0  ;;  %v5161_v61 = vld [vmem:[%s8731_s13 + $0xb8] sm:$0xff] }
 0x7a4   : > { %1996 = vadd.xlane.f32.xlu1 %v1995_v12  ;;  %v5162_v12 = vld [vmem:[%s8731_s13 + $0xb0] sm:$0xff] }
 0x7a8   : > { %v2760_v29 = vpop.trf.xlu1 }
 0x7a9   : > { %4811 = vmatmul.msk.f32.vlgmr.msrb.gmra.mxu3 %vm849_vm2, %v2760_v29  ;;  %4815 = vmatmul.msk.f32.vlgmr.msra.gmra.mxu1 %vm849_vm2, %v2760_v29 }
 0x7aa   : > { %4825 = vmatpush.msk.msrb.mxu3 %vm927_vm1, %v9039_v17  ;;  %v5163_v17 = vld [vmem:[%s8731_s13 + $0xa8] sm:$0xff] }
 0x7ac   : > { %2002 = vadd.xlane.f32.xlu1 %v2001_v11  ;;  %3143 = vmatpush.msrb.mxu3 %v9040_v8  ;;  %v5165_v11 = vld [vmem:[%s8731_s13 + $0x98] sm:$0xff]  ;;  %v5166_v8 = vld [vmem:[%s8731_s13 + $0x90] sm:$0xff] }
 0x7ae   : > { %3144 = vmatpush.msrb.mxu3 %v9041_v24 }
 0x7b0   : > { %v2761_v62 = vpop.trf.xlu1  ;;  %3145 = vmatpush.msrb.mxu3 %v9042_v56  ;;  %v5168_v56 = vld [vmem:[%s8731_s13 + $0x80] sm:$0xff] }
 0x7b1   : > { %4812 = vmatmul.msk.f32.gmra.mxu3 %vm849_vm2, %v2761_v62  ;;  %4816 = vmatmul.msk.f32.gmra.mxu1 %vm849_vm2, %v2761_v62  ;;  %v5167_v62 = vld [vmem:[%s8731_s13 + $0x88] sm:$0xff] }
 0x7b4   : > { %2008 = vadd.xlane.f32.xlu1 %v2007_v37 }
 0x7b8   : > { %v2762_v51 = vpop.trf.xlu1 }
 0x7b9   : > { %4813 = vmatmul.msk.f32.gmra.mxu3 %vm849_vm2, %v2762_v51  ;;  %4817 = vmatmul.msk.f32.gmra.mxu1 %vm849_vm2, %v2762_v51  ;;  %v9045_v51 = vld [vmem:[#allocation5_spill] sm:$0xff] }
 0x7bc   : > { %2014 = vadd.xlane.f32.xlu1 %v2013_v35 }
 0x7c0   : > { %v2763_v10 = vpop.trf.xlu1 }
 0x7c1   : > { %4814 = vmatmul.msk.f32.gmra.mxu3 %vm849_vm2, %v2763_v10  ;;  %4818 = vmatmul.msk.f32.gmra.mxu1 %vm849_vm2, %v2763_v10  ;;  %v9046_v10 = vld [vmem:[#allocation10_spill] sm:$0xff] }
 0x7c4   : > { %2020 = vadd.xlane.f32.xlu1 %v2019_v16  ;;  %v7172_v16 = vadd.f32 %v7013_v39, %v9046_v10 }
 0x7c9   : > { %4820 = vmatmul.msk.f32.vlgmr.msra.gmra.mxu3 %vm920_vm3, %v6955_v44  ;;  %4823 = vmatmul.msk.f32.vlgmr.msrb.gmra.mxu1 %vm920_vm3, %v6955_v44  ;;  %v9043_v44 = vld [vmem:[#allocation8_spill] sm:$0xff] }
 0x7ca   : > { %3483 = vmatpush.msra.mxu3 %v5160_v55  ;;  %v7128_v29 = vadd.f32 %v6990_v26, %v9043_v44  ;;  %v9047_v55 = vld [vmem:[#allocation7_spill] sm:$0xff]  ;;  %v9060_v44 = vld [vmem:[#allocation30_spill] sm:$0xff] }
 0x7cc   : > { %2026 = vadd.xlane.f32.xlu1 %v2025_v47  ;;  %3484 = vmatpush.msra.mxu3 %v5161_v61  ;;  %v2938_v26 = vsel %vm920_vm3, %v7128_v29, 0.0  ;;  %v7176_v47 = vadd.f32 %v7047_v45, %v9047_v55 }
 0x7ce   : > { %3485 = vmatpush.msra.mxu3 %v5162_v12  ;;  %v2965_v61 = vsel %vm920_vm3, %v7176_v47, 0.0  ;;  %v9048_v12 = vld [vmem:[#allocation20_spill] sm:$0xff] }
 0x7d0   : > { %3486 = vmatpush.msra.mxu3 %v5163_v17  ;;  %v7184_v17 = vadd.f32 %v7062_v4, %v9048_v12  ;;  %v9050_v4 = vld [vmem:[#allocation3_spill] sm:$0xff] }
 0x7d1   : > { %4821 = vmatmul.msk.f32.gmra.mxu3 %vm920_vm3, %v6959_v36  ;;  %4824 = vmatmul.msk.f32.gmra.mxu1 %vm920_vm3, %v6959_v36  ;;  %v9044_v36 = vld [vmem:[#allocation11_spill] sm:$0xff] }
 0x7d2   : > { %3487 = vmatpush.msra.mxu3 %v5164_v38  ;;  %v7150_v24 = vadd.f32 %v7017_v23, %v9044_v36  ;;  %v7164_v23 = vadd.f32 %v7032_v58, %v9045_v51  ;;  %v2695_v58 = vpop.f32.mrf.mxu0  ;;  %v2974_v39 = vsel %vm920_vm3, %v7184_v17, 0.0  ;;  %v9049_v38 = vld [vmem:[#allocation31_spill] sm:$0xff] }
 0x7d3   : > { %v7248_v36 = vadd.f32 %v2695_v58, %v8955_v53 }
 0x7d4   : > { %2939 = vadd.xlane.f32.xlu1 %v2938_v26  ;;  %3488 = vmatpush.msra.mxu3 %v5165_v11  ;;  %v2947_v37 = vsel %vm920_vm3, %v7150_v24, 0.0  ;;  %v2956_v35 = vsel %vm920_vm3, %v7164_v23, 0.0 }
 0x7d6   : > { %3489 = vmatpush.msra.mxu3 %v5166_v8  ;;  %v7199_v8 = vadd.f32 %v7028_v52, %v9050_v4 }
 0x7d8   : > { %3490 = vmatpush.msra.mxu3 %v5167_v62  ;;  %v7205_v62 = vpop.f32.mrf.mxu2 }
 0x7d9   : > { %4826 = vmatmul.msk.f32.vlgmr.msrb.gmra.mxu3 %vm920_vm3, %v7128_v29  ;;  %9051 = vst [vmem:[#allocation14_spill] sm:$0xff] %v7205_v62 }
 0x7da   : > { %3491 = vmatpush.msra.mxu3 %v5168_v56  ;;  %v2698_v45 = vpop.f32.mrf.mxu0 }
 0x7db   : > { %v7191_v26 = vadd.f32 %v2698_v45, %v9049_v38 }
 0x7dc   : > { %2948 = vadd.xlane.f32.xlu1 %v2947_v37  ;;  %v9053_v37 = vld [vmem:[#allocation6_spill] sm:$0xff] }
 0x7dd   : > { %v2983_v11 = vsel %vm920_vm3, %v7191_v26, 0.0 }
 0x7e0   : > { %v7209_v56 = vpop.f32.mrf.mxu2 }
 0x7e1   : > { %4827 = vmatmul.msk.f32.gmra.mxu3 %vm920_vm3, %v7006_v5  ;;  %9052 = vst [vmem:[#allocation19_spill] sm:$0xff] %v7209_v56 }
 0x7e4   : > { %2957 = vadd.xlane.f32.xlu1 %v2956_v35  ;;  %v7213_v35 = vadd.f32 %v7043_v25, %v9053_v37  ;;  %v9056_v25 = vld [vmem:[#allocation24_spill] sm:$0xff] }
 0x7e5   : > { %v7231_v56 = vadd.f32 %v7058_v6, %v9056_v25 }
 0x7e8   : > { %v7217_v52 = vpop.f32.mrf.mxu2 }
 0x7e9   : > { %4828 = vmatmul.msk.f32.gmra.mxu3 %vm920_vm3, %v7172_v16  ;;  %9054 = vst [vmem:[#allocation23_spill] sm:$0xff] %v7217_v52 }
 0x7ec   : > { %2966 = vadd.xlane.f32.xlu1 %v2965_v61 }
 0x7f1   : > { %4829 = vmatmul.msk.f32.gmra.mxu3 %vm920_vm3, %v7150_v24 }
 0x7f4   : > { %2975 = vadd.xlane.f32.xlu1 %v2974_v39  ;;  %v7223_v39 = vpop.f32.mrf.mxu2 }
 0x7f5   : > { %9055 = vst [vmem:[#allocation27_spill] sm:$0xff] %v7223_v39 }
 0x7f9   : > { %4830 = vmatmul.msk.f32.gmra.mxu3 %vm920_vm3, %v7022_v46 }
 0x7fc   : > { %2984 = vadd.xlane.f32.xlu1 %v2983_v11  ;;  %v7235_v52 = vpop.f32.mrf.mxu2 }
 0x7fd   : > { %9057 = vst [vmem:[#allocation59_spill] sm:$0xff] %v7235_v52 }
 0x801   : > { %4831 = vmatmul.msk.f32.gmra.mxu3 %vm920_vm3, %v7199_v8 }
 0x804   : > { %v7241_v38 = vpop.f32.mrf.mxu2 }
 0x805   : > { %9058 = vst [vmem:[#allocation61_spill] sm:$0xff] %v7241_v38  ;;  %v5169_v38 = vld [vmem:[%s8724_s6 + $0x18] sm:$0xff] }
 0x809   : > { %4832 = vmatmul.msk.f32.gmra.mxu3 %vm920_vm3, %v7164_v23 }
 0x80c   : > { %v7245_v51 = vpop.f32.mrf.mxu2 }
 0x80d   : > { %9059 = vst [vmem:[#allocation62_spill] sm:$0xff] %v7245_v51 }
 0x811   : > { %4833 = vmatmul.msk.f32.gmra.mxu3 %vm920_vm3, %v7037_v21 }
 0x814   : > { %v7256_v4 = vpop.f32.mrf.mxu2 }
 0x815   : > { %9061 = vst [vmem:[#allocation63_spill] sm:$0xff] %v7256_v4 }
 0x819   : > { %4834 = vmatmul.msk.f32.gmra.mxu3 %vm920_vm3, %v7213_v35 }
 0x821   : > { %4835 = vmatmul.msk.f32.gmra.mxu3 %vm920_vm3, %v7176_v47 }
 0x826   : > { %v7221_v61 = vpop.f32.mrf.mxu1 }
 0x829   : > { %4836 = vmatmul.msk.f32.gmra.mxu3 %vm920_vm3, %v7052_v13 }
 0x82c   : > { %v7227_v45 = vpop.f32.mrf.mxu3 }
 0x82e   : > { %v2837_v11 = vpop.f32.mrf.mxu1 }
 0x831   : > { %4837 = vmatmul.msk.f32.gmra.mxu3 %vm920_vm3, %v7231_v56 }
 0x834   : > { %v7237_v3 = vpop.f32.mrf.mxu3 }
 0x836   : > { %v2840_v62 = vpop.f32.mrf.mxu1 }
 0x839   : > { %4838 = vmatmul.msk.f32.gmra.mxu3 %vm920_vm3, %v7184_v17 }
 0x83c   : > { %v2811_v39 = vpop.f32.mrf.mxu3 }
 0x83e   : > { %v2843_v12 = vpop.f32.mrf.mxu1 }
 0x841   : > { %4839 = vmatmul.msk.f32.gmra.mxu3 %vm920_vm3, %v7067_v50 }
 0x844   : > { %v2814_v6 = vpop.f32.mrf.mxu3 }
 0x846   : > { %v2892_v55 = vpop.f32.mrf.mxu1 }
 0x847   : > { %v2899_v30 = vmul.f32 %v9060_v44, %v2892_v55 }
 0x849   : > { %4840 = vmatmul.msk.f32.gmra.mxu3 %vm920_vm3, %v7248_v36  ;;  %v2909_v10 = vsel %vm991_vm4, %v2899_v30, 0.0 }
 0x84c   : > { %v2869_v52 = vpop.f32.mrf.mxu3 }
 0x84d   : > { %v2898_v44 = vmul.f32 %v6589_v54, %v2869_v52 }
 0x84e   : > { %v2895_v25 = vpop.f32.mrf.mxu1 }
 0x84f   : > { %v2901_v37 = vmul.f32 %v5169_v38, %v2895_v25  ;;  %v7264_v38 = vpop.f32.mrf.mxu2 }
 0x850   : > { %9062 = vst [vmem:[#allocation30_spill] sm:$0xff] %v7264_v38 }
 0x851   : > { %v2910_v51 = vsel %vm991_vm4, %v2901_v37, 0.0  ;;  %4841 = vmatmul.msk.f32.gmra.mxu3 %vm920_vm3, %v7191_v26 }
 0x852   : > { %v2911_v58 = vadd.f32 %v2910_v51, %v2909_v10 }
 0x854   : > { %v2912_v53 = vrot.slane %v2911_v58, 4  ;;  %v2872_v57 = vpop.f32.mrf.mxu3 }
 0x855   : > { %v2900_v55 = vmul.f32 %v6595_v9, %v2872_v57 }
 0x856   : > { %v2913_v18 = vadd.f32 %v2912_v53, %v2911_v58 }
 0x857   : > { %v2902_v15 = vadd.f32 %v2900_v55, %v2898_v44  ;;  %v7267_v33 = vpop.f32.mrf.mxu2  ;;  %v4923_v55 = vld [vmem:[%s5361_s19 + $0x1f8] sm:$0xff] }
 0x858   : > { %v2914_v7 = vrot.slane %v2913_v18, 2  ;;  %9063 = vst [vmem:[#allocation125_spill] sm:$0xff] %v7267_v33 }
 0x859   : > { %v2903_v25 = vrot.slane %v2902_v15, 4 }
 0x85a   : > { %v2915_v4 = vadd.f32 %v2914_v7, %v2913_v18 }
 0x85b   : > { %v2904_v30 = vadd.f32 %v2903_v25, %v2902_v15  ;;  %v4922_v25 = vld [vmem:[%s5361_s19 + $0x1f0] sm:$0xff] }
 0x85c   : > { %v2916_v63 = vrot.slane %v2915_v4, 1 }
 0x85d   : > { %v2905_v37 = vrot.slane %v2904_v30, 2 }
 0x85e   : > { %v2917_v40 = vadd.f32 %v2916_v63, %v2915_v4 }
 0x85f   : > { %v2906_v19 = vadd.f32 %v2905_v37, %v2904_v30  ;;  %v7272_v4 = vpop.f32.mrf.mxu2  ;;  %v4919_v30 = vld [vmem:[%s5361_s19 + $0x1d8] sm:$0xff] }
 0x860   : > { %v2919_v51 = vadd.f32 %v2917_v40, %v5791_v60  ;;  %9064 = vst [vmem:[#allocation126_spill] sm:$0xff] %v7272_v4 }
 0x861   : > { %v2907_v10 = vrot.slane %v2906_v19, 1 }
 0x862   : > { %v2921_v1 = vperm.slane %v2919_v51, 0  ;;  %v4918_v51 = vld [vmem:[%s5361_s19 + $0x1d0] sm:$0xff] }
 0x863   : > { %v2908_v54 = vadd.f32 %v2907_v10, %v2906_v19  ;;  %v4917_v10 = vld [vmem:[%s5361_s19 + $0x1c8] sm:$0xff] }
 0x864   : > { %v2929_v9 = vsub.f32 %v2921_v1, %v2843_v12  ;;  %v2927_v53 = vsub.f32 %v2921_v1, %v2840_v62  ;;  %v2925_v52 = vsub.f32 %v2921_v1, %v2837_v11  ;;  %v2923_v7 = vsub.f32 %v2921_v1, %v7221_v61 }
 0x865   : > { %v2918_v57 = vadd.f32 %v2908_v54, %v5789_v2  ;;  %v4916_v54 = vld [vmem:[%s5361_s19 + $0x1c0] sm:$0xff] }
 0x866   : > { %5080 = vtanh.f32 %v2929_v9  ;;  %v4915_v9 = vld [vmem:[%s5361_s19 + $0x1b8] sm:$0xff] }
 0x867   : > { %v2920_v58 = vperm.slane %v2918_v57, 0  ;;  %5082 = vtanh.f32 %v2927_v53  ;;  %v4914_v53 = vld [vmem:[%s5361_s19 + $0x1b0] sm:$0xff] }
 0x868   : > { %5084 = vtanh.f32 %v2925_v52  ;;  %v4912_v52 = vld [vmem:[%s5361_s19 + $0x1a0] sm:$0xff] }
 0x869   : > { %v2928_v15 = vsub.f32 %v2920_v58, %v2814_v6  ;;  %v2926_v63 = vsub.f32 %v2920_v58, %v2811_v39  ;;  %v2924_v40 = vsub.f32 %v2920_v58, %v7237_v3  ;;  %v2922_v19 = vsub.f32 %v2920_v58, %v7227_v45  ;;  %v7279_v45 = vpop.f32.mrf.mxu2  ;;  %v4911_v58 = vld [vmem:[%s5361_s19 + $0x198] sm:$0xff] }
 0x86a   : > { %9065 = vst [vmem:[#allocation127_spill] sm:$0xff] %v7279_v45  ;;  %v9171_v45 = vld [vmem:[#allocation85_spill] sm:$0xff] }
 0x86b   : > { %5086 = vtanh.f32 %v2928_v15 }
 0x86c   : > { %v5081_v18 = vpop.eup %5080  ;;  %5088 = vtanh.f32 %v2923_v7  ;;  %v4910_v7 = vld [vmem:[%s5361_s19 + $0x190] sm:$0xff] }
 0x86d   : > { %4859 = vmatpush.msk.msrb.mxu2 %vm927_vm1, %v5081_v18  ;;  %5090 = vtanh.f32 %v2926_v63  ;;  %v5083_v12 = vpop.eup %5082  ;;  %v4908_v63 = vld [vmem:[%s5361_s19 + $0x180] sm:$0xff]  ;;  %v7375_v18 = vpop.f32.mrf.mxu3 }
 0x86e   : > { %5092 = vtanh.f32 %v2924_v40  ;;  %v5085_v62 = vpop.eup %5084  ;;  %9076 = vst [vmem:[#allocation138_spill] sm:$0xff] %v7375_v18 }
 0x86f   : > { %3279 = vmatpush.msrb.mxu2 %v5083_v12  ;;  %5094 = vtanh.f32 %v2922_v19  ;;  %v5178_v19 = vld [vmem:[%s8726_s8 + $0x10] sm:$0xff]  ;;  %v9082_v12 = vld [vmem:[#allocation102_spill] sm:$0xff] }
 0x871   : > { %v5087_v1 = vpop.eup %5086  ;;  %3280 = vmatpush.msrb.mxu2 %v5085_v62  ;;  %v7285_v6 = vpop.f32.mrf.mxu2  ;;  %v9083_v62 = vld [vmem:[#allocation99_spill] sm:$0xff] }
 0x872   : > { %v5089_v61 = vpop.eup %5088  ;;  %4842 = vmatpush.msk.msra.mxu1 %vm927_vm1, %v5087_v1  ;;  %9066 = vst [vmem:[#allocation128_spill] sm:$0xff] %v7285_v6 }
 0x873   : > { %v5091_v3 = vpop.eup %5090  ;;  %3281 = vmatpush.msrb.mxu2 %v5089_v61 }
 0x874   : > { %3214 = vmatpush.msra.mxu1 %v5091_v3  ;;  %4860 = vmatmul.msk.f32.vlgmr.msrb.gmra.mxu2 %vm920_vm3, %v7128_v29  ;;  %v5093_v39 = vpop.eup %5092  ;;  %v9085_v3 = vld [vmem:[#allocation100_spill] sm:$0xff] }
 0x875   : > { %v5095_v11 = vpop.eup %5094  ;;  %3656 = vmatpush.msra.mxu2 %v4923_v55 }
 0x876   : > { %3215 = vmatpush.msra.mxu1 %v5093_v39  ;;  %v5180_v39 = vld [vmem:[%s8729_s11 + $0x10] sm:$0xff] }
 0x877   : > { %3657 = vmatpush.msra.mxu2 %v4922_v25 }
 0x878   : > { %3216 = vmatpush.msra.mxu1 %v5095_v11 }
 0x879   : > { %4843 = vmatmul.msk.f32.vlgmr.msra.gmra.mxu1 %vm920_vm3, %v7128_v29  ;;  %v7293_v44 = vpop.f32.mrf.mxu2 }
 0x87a   : > { %9067 = vst [vmem:[#allocation129_spill] sm:$0xff] %v7293_v44  ;;  %3591 = vmatpush.msrb.mxu1 %v4923_v55 }
 0x87c   : > { %4861 = vmatmul.msk.f32.gmra.mxu2 %vm920_vm3, %v7006_v5  ;;  %3592 = vmatpush.msrb.mxu1 %v4922_v25  ;;  %v5181_v25 = vld [vmem:[%s8729_s11 + $0x18] sm:$0xff] }
 0x881   : > { %4844 = vmatmul.msk.f32.gmra.mxu1 %vm920_vm3, %v7006_v5  ;;  %v7301_v5 = vpop.f32.mrf.mxu2 }
 0x882   : > { %9068 = vst [vmem:[#allocation130_spill] sm:$0xff] %v7301_v5 }
 0x884   : > { %4862 = vmatmul.msk.f32.gmra.mxu2 %vm920_vm3, %v7172_v16 }
 0x889   : > { %4845 = vmatmul.msk.f32.gmra.mxu1 %vm920_vm3, %v7172_v16  ;;  %v7307_v29 = vpop.f32.mrf.mxu2 }
 0x88a   : > { %9069 = vst [vmem:[#allocation131_spill] sm:$0xff] %v7307_v29  ;;  %v9168_v29 = vld [vmem:[#allocation84_spill] sm:$0xff] }
 0x88c   : > { %4863 = vmatmul.msk.f32.gmra.mxu2 %vm920_vm3, %v7150_v24 }
 0x891   : > { %4846 = vmatmul.msk.f32.gmra.mxu1 %vm920_vm3, %v7150_v24  ;;  %v7313_v24 = vpop.f32.mrf.mxu2 }
 0x892   : > { %9070 = vst [vmem:[#allocation132_spill] sm:$0xff] %v7313_v24 }
 0x894   : > { %4864 = vmatmul.msk.f32.gmra.mxu2 %vm920_vm3, %v7022_v46 }
 0x899   : > { %4847 = vmatmul.msk.f32.gmra.mxu1 %vm920_vm3, %v7022_v46  ;;  %v7321_v46 = vpop.f32.mrf.mxu2 }
 0x89a   : > { %9071 = vst [vmem:[#allocation133_spill] sm:$0xff] %v7321_v46  ;;  %v9157_v46 = vld [vmem:[#allocation28_spill] sm:$0xff] }
 0x89c   : > { %4865 = vmatmul.msk.f32.gmra.mxu2 %vm920_vm3, %v7199_v8 }
 0x8a1   : > { %4848 = vmatmul.msk.f32.gmra.mxu1 %vm920_vm3, %v7199_v8  ;;  %v7334_v37 = vpop.f32.mrf.mxu2 }
 0x8a2   : > { %9072 = vst [vmem:[#allocation134_spill] sm:$0xff] %v7334_v37 }
 0x8a4   : > { %4866 = vmatmul.msk.f32.gmra.mxu2 %vm920_vm3, %v7164_v23 }
 0x8a9   : > { %4849 = vmatmul.msk.f32.gmra.mxu1 %vm920_vm3, %v7164_v23  ;;  %v4921_v23 = vld [vmem:[%s5361_s19 + $0x1e8] sm:$0xff]  ;;  %v7345_v57 = vpop.f32.mrf.mxu2 }
 0x8aa   : > { %3658 = vmatpush.msra.mxu2 %v4921_v23  ;;  %3593 = vmatpush.msrb.mxu1 %v4921_v23  ;;  %9073 = vst [vmem:[#allocation135_spill] sm:$0xff] %v7345_v57 }
 0x8ac   : > { %4867 = vmatmul.msk.f32.gmra.mxu2 %vm920_vm3, %v7037_v21 }
 0x8b1   : > { %4850 = vmatmul.msk.f32.gmra.mxu1 %vm920_vm3, %v7037_v21  ;;  %v4920_v21 = vld [vmem:[%s5361_s19 + $0x1e0] sm:$0xff]  ;;  %v7355_v15 = vpop.f32.mrf.mxu2 }
 0x8b2   : > { %3594 = vmatpush.msrb.mxu1 %v4920_v21  ;;  %3659 = vmatpush.msra.mxu2 %v4920_v21  ;;  %9074 = vst [vmem:[#allocation136_spill] sm:$0xff] %v7355_v15  ;;  %v9086_v21 = vld [vmem:[#allocation101_spill] sm:$0xff] }
 0x8b4   : > { %4868 = vmatmul.msk.f32.gmra.mxu2 %vm920_vm3, %v7213_v35  ;;  %3595 = vmatpush.msrb.mxu1 %v4919_v30 }
 0x8b5   : > { %3660 = vmatpush.msra.mxu2 %v4919_v30  ;;  %v9087_v30 = vld [vmem:[#allocation103_spill] sm:$0xff] }
 0x8b6   : > { %3596 = vmatpush.msrb.mxu1 %v4918_v51 }
 0x8b7   : > { %3661 = vmatpush.msra.mxu2 %v4918_v51 }
 0x8b8   : > { %3597 = vmatpush.msrb.mxu1 %v4917_v10 }
 0x8b9   : > { %4851 = vmatmul.msk.f32.gmra.mxu1 %vm920_vm3, %v7213_v35  ;;  %3662 = vmatpush.msra.mxu2 %v4917_v10  ;;  %v7369_v40 = vpop.f32.mrf.mxu2 }
 0x8ba   : > { %3598 = vmatpush.msrb.mxu1 %v4916_v54  ;;  %9075 = vst [vmem:[#allocation137_spill] sm:$0xff] %v7369_v40  ;;  %v9148_v40 = vld [vmem:[#allocation24_spill] sm:$0xff] }
 0x8bb   : > { %3663 = vmatpush.msra.mxu2 %v4916_v54  ;;  %v5182_v54 = vld [vmem:[%s8729_s11 + $0x20] sm:$0xff] }
 0x8bc   : > { %4869 = vmatmul.msk.f32.gmra.mxu2 %vm920_vm3, %v7176_v47  ;;  %3599 = vmatpush.msrb.mxu1 %v4915_v9 }
 0x8bd   : > { %3664 = vmatpush.msra.mxu2 %v4915_v9 }
 0x8be   : > { %3600 = vmatpush.msrb.mxu1 %v4914_v53 }
 0x8bf   : > { %3665 = vmatpush.msra.mxu2 %v4914_v53 }
 0x8c1   : > { %4852 = vmatmul.msk.f32.gmra.mxu1 %vm920_vm3, %v7176_v47  ;;  %v4913_v47 = vld [vmem:[%s5361_s19 + $0x1a8] sm:$0xff] }
 0x8c2   : > { %3601 = vmatpush.msrb.mxu1 %v4913_v47  ;;  %3666 = vmatpush.msra.mxu2 %v4913_v47  ;;  %v5183_v47 = vld [vmem:[%s8729_s11 + $0x28] sm:$0xff] }
 0x8c4   : > { %4870 = vmatmul.msk.f32.gmra.mxu2 %vm920_vm3, %v7052_v13  ;;  %3602 = vmatpush.msrb.mxu1 %v4912_v52 }
 0x8c5   : > { %3667 = vmatpush.msra.mxu2 %v4912_v52 }
 0x8c6   : > { %3603 = vmatpush.msrb.mxu1 %v4911_v58 }
 0x8c7   : > { %3668 = vmatpush.msra.mxu2 %v4911_v58  ;;  %v9089_v58 = vld [vmem:[#allocation105_spill] sm:$0xff] }
 0x8c8   : > { %3604 = vmatpush.msrb.mxu1 %v4910_v7 }
 0x8c9   : > { %4853 = vmatmul.msk.f32.gmra.mxu1 %vm920_vm3, %v7052_v13  ;;  %3669 = vmatpush.msra.mxu2 %v4910_v7  ;;  %v4909_v13 = vld [vmem:[%s5361_s19 + $0x188] sm:$0xff] }
 0x8ca   : > { %3605 = vmatpush.msrb.mxu1 %v4909_v13 }
 0x8cb   : > { %3670 = vmatpush.msra.mxu2 %v4909_v13  ;;  %v5184_v13 = vld [vmem:[%s8729_s11 + $0x30] sm:$0xff] }
 0x8cc   : > { %4871 = vmatmul.msk.f32.gmra.mxu2 %vm920_vm3, %v7231_v56  ;;  %3606 = vmatpush.msrb.mxu1 %v4908_v63 }
 0x8cd   : > { %3671 = vmatpush.msra.mxu2 %v4908_v63 }
 0x8ce   : > { %4366 = vmatpush.msra.mxu1 %v6701_v32  ;;  %v7384_v32 = vpop.f32.mrf.mxu2 }
 0x8cf   : > { %3758 = vmatpush.msrb.mxu2 %v6966_v48  ;;  %9077 = vst [vmem:[#allocation139_spill] sm:$0xff] %v7384_v32  ;;  %v5177_v48 = vld [vmem:[%s8729_s11 + $0x8] sm:$0xff]  ;;  %v9153_v32 = vld [vmem:[#allocation26_spill] sm:$0xff] }
 0x8d0   : > { %4367 = vmatpush.msra.mxu1 %v6711_v28  ;;  %v7388_v28 = vpop.f32.mrf.mxu3 }
 0x8d1   : > { %4854 = vmatmul.msk.f32.gmra.mxu1 %vm920_vm3, %v7231_v56  ;;  %9078 = vst [vmem:[#allocation140_spill] sm:$0xff] %v7388_v28  ;;  %v9174_v28 = vld [vmem:[#allocation88_spill] sm:$0xff] }
 0x8d2   : > { %4368 = vmatpush.msra.mxu1 %v6717_v14  ;;  %v5170_v14 = vld [vmem:[%s8731_s13 + $0x18] sm:$0xff] }
 0x8d4   : > { %4872 = vmatmul.msk.f32.gmra.mxu2 %vm920_vm3, %v7184_v17  ;;  %4369 = vmatpush.msra.mxu1 %v6725_v20 }
 0x8d6   : > { %4370 = vmatpush.msra.mxu1 %v6731_v49  ;;  %v5173_v49 = vld [vmem:[%s8731_s13] sm:$0xff] }
 0x8d8   : > { %4371 = vmatpush.msra.mxu1 %v6739_v0  ;;  %v7409_v20 = vpop.f32.mrf.mxu3  ;;  %v5174_v0 = vld [vmem:[%s8726_s8 + $0x30] sm:$0x1] }
 0x8d9   : > { %4855 = vmatmul.msk.f32.gmra.mxu1 %vm920_vm3, %v7184_v17  ;;  %9080 = vst [vmem:[#allocation142_spill] sm:$0xff] %v7409_v20 }
 0x8da   : > { %4372 = vmatpush.msra.mxu1 %v6746_v59 }
 0x8dc   : > { %4873 = vmatmul.msk.f32.gmra.mxu2 %vm920_vm3, %v7067_v50  ;;  %4373 = vmatpush.msra.mxu1 %v6766_v42  ;;  %v5175_v42 = vld [vmem:[%s8729_s11] sm:$0xff] }
 0x8de   : > { %4374 = vmatpush.msra.mxu1 %v6778_v34  ;;  %v7399_v34 = vpop.f32.mrf.mxu2 }
 0x8df   : > { %9079 = vst [vmem:[#allocation141_spill] sm:$0xff] %v7399_v34 }
 0x8e0   : > { %4375 = vmatpush.msra.mxu1 %v6792_v43  ;;  %v5171_v43 = vld [vmem:[%s8731_s13 + $0x10] sm:$0xff]  ;;  %v7437_v1 = vpop.f32.mrf.mxu3 }
 0x8e1   : > { %4856 = vmatmul.msk.f32.gmra.mxu1 %vm920_vm3, %v7067_v50 }
 0x8e2   : > { %4376 = vmatpush.msra.mxu1 %v6805_v41  ;;  %v5172_v41 = vld [vmem:[%s8731_s13 + $0x8] sm:$0xff] }
 0x8e4   : > { %4874 = vmatmul.msk.f32.gmra.mxu2 %vm920_vm3, %v7248_v36  ;;  %4377 = vmatpush.msra.mxu1 %v6818_v27 }
 0x8e6   : > { %4378 = vmatpush.msra.mxu1 %v5170_v14 }
 0x8e8   : > { %4379 = vmatpush.msra.mxu1 %v5171_v43  ;;  %v7452_v10 = vpop.f32.mrf.mxu3  ;;  %v5185_v43 = vld [vmem:[%s8729_s11 + $0x38] sm:$0xff] }
 0x8e9   : > { %4857 = vmatmul.msk.f32.gmra.mxu1 %vm920_vm3, %v7248_v36  ;;  %9088 = vst [vmem:[#allocation102_spill] sm:$0xff] %v7452_v10 }
 0x8ea   : > { %4380 = vmatpush.msra.mxu1 %v5172_v41 }
 0x8ec   : > { %4875 = vmatmul.msk.f32.gmra.mxu2 %vm920_vm3, %v7191_v26  ;;  %4381 = vmatpush.msra.mxu1 %v5173_v49 }
 0x8f0   : > { %v7468_v49 = vpop.f32.mrf.mxu3 }
 0x8f1   : > { %4858 = vmatmul.msk.f32.gmra.mxu1 %vm920_vm3, %v7191_v26  ;;  %v9081_v26 = vld [vmem:[#allocation98_spill] sm:$0xff]  ;;  %9090 = vst [vmem:[#allocation99_spill] sm:$0xff] %v7468_v49 }
 0x8f2   : > { %9084 = vst [vmem:[#allocation98_spill] sm:$0xff] %v7437_v1 }
 0x8f4   : > { %3672 = vmatmul.f32.vlgmr.msra.gmra.mxu2 %v6753_v22  ;;  %v5176_v22 = vld [vmem:[%s8726_s8 + $0x20] sm:$0xff] }
 0x8f5   : > { %4933 = vmatpush.msk.msra.mxu2 %vm927_vm1, %v5174_v0  ;;  %v9091_v0 = vld [vmem:[#allocation107_spill] sm:$0xff] }
 0x8f6   : > { %v3218_v59 = vpop.f32.mrf.mxu1 }
 0x8f7   : > { %v3331_v27 = vmul.f32 %v5175_v42, %v3218_v59  ;;  %v3283_v50 = vpop.f32.mrf.mxu2  ;;  %3820 = vmatpush.msra.mxu2 %v5176_v22  ;;  %v5186_v42 = vld [vmem:[%s8729_s11 + $0x40] sm:$0xff]  ;;  %v5187_v22 = vld [vmem:[%s8729_s11 + $0x48] sm:$0xff] }
 0x8f8   : > { %v3332_v17 = vmul.f32 %v5177_v48, %v3283_v50 }
 0x8f9   : > { %3427 = vmatmul.f32.vlgmr.msra.gmra.mxu0 %v3331_v27  ;;  %3607 = vmatmul.f32.vlgmr.msrb.gmra.mxu1 %v6841_v31  ;;  %v5179_v31 = vld [vmem:[%s8726_s8] sm:$0xff] }
 0x8fa   : > { %4876 = vmatmul.msk.f32.vlgmr.msra.gmra.mxu3 %vm991_vm4, %v3332_v17  ;;  %4936 = vmatpush.msk.msra.mxu0 %vm927_vm1, %v9081_v26  ;;  %v9092_v17 = vld [vmem:[#allocation108_spill] sm:$0xff]  ;;  %v7480_v26 = vpop.f32.mrf.mxu3 }
 0x8fb   : > { %3821 = vmatpush.msra.mxu2 %v5178_v19  ;;  %9093 = vst [vmem:[#allocation100_spill] sm:$0xff] %v7480_v26  ;;  %v9134_v26 = vld [vmem:[#allocation4_spill] sm:$0xff] }
 0x8fc   : > { %3675 = vmatmul.f32.gmra.mxu2 %v9082_v12  ;;  %3843 = vmatpush.msra.mxu0 %v9083_v62  ;;  %v5188_v12 = vld [vmem:[%s8729_s11 + $0x50] sm:$0xff] }
 0x8fd   : > { %3822 = vmatpush.msra.mxu2 %v5179_v31 }
 0x8fe   : > { %v3221_v61 = vpop.f32.mrf.mxu1  ;;  %3844 = vmatpush.msra.mxu0 %v9085_v3 }
 0x8ff   : > { %v3333_v11 = vmul.f32 %v5180_v39, %v3221_v61  ;;  %v3286_v55 = vpop.f32.mrf.mxu2  ;;  %v5189_v61 = vld [vmem:[%s8729_s11 + $0x58] sm:$0xff]  ;;  %v9094_v39 = vld [vmem:[#allocation110_spill] sm:$0xff] }
 0x900   : > { %v3334_v23 = vmul.f32 %v5181_v25, %v3286_v55  ;;  %3845 = vmatpush.msra.mxu0 %v9086_v21  ;;  %v5190_v25 = vld [vmem:[%s8729_s11 + $0x60] sm:$0xff] }
 0x901   : > { %3430 = vmatmul.f32.gmra.mxu0 %v3333_v11  ;;  %3610 = vmatmul.f32.gmra.mxu1 %v9087_v30  ;;  %v5191_v30 = vld [vmem:[%s8729_s11 + $0x68] sm:$0xff] }
 0x902   : > { %4877 = vmatmul.msk.f32.gmra.mxu3 %vm991_vm4, %v3334_v23  ;;  %v7490_v11 = vpop.f32.mrf.mxu3 }
 0x903   : > { %9095 = vst [vmem:[#allocation101_spill] sm:$0xff] %v7490_v11  ;;  %v9169_v11 = vld [vmem:[#allocation41_spill] sm:$0xff] }
 0x906   : > { %v3224_v51 = vpop.f32.mrf.mxu1 }
 0x907   : > { %v3335_v9 = vmul.f32 %v5182_v54, %v3224_v51  ;;  %v3289_v53 = vpop.f32.mrf.mxu2  ;;  %v9096_v54 = vld [vmem:[#allocation112_spill] sm:$0xff] }
 0x908   : > { %v3336_v52 = vmul.f32 %v5183_v47, %v3289_v53  ;;  %v5192_v47 = vld [vmem:[%s8729_s11 + $0x70] sm:$0xff] }
 0x909   : > { %3433 = vmatmul.f32.gmra.mxu0 %v3335_v9  ;;  %3613 = vmatmul.f32.gmra.mxu1 %v9089_v58 }
 0x90a   : > { %4878 = vmatmul.msk.f32.gmra.mxu3 %vm991_vm4, %v3336_v52  ;;  %v7500_v53 = vpop.f32.mrf.mxu3 }
 0x90b   : > { %9097 = vst [vmem:[#allocation103_spill] sm:$0xff] %v7500_v53 }
 0x90e   : > { %v3227_v7 = vpop.f32.mrf.mxu1 }
 0x90f   : > { %v3337_v63 = vmul.f32 %v5184_v13, %v3227_v7  ;;  %v3292_v14 = vpop.f32.mrf.mxu2  ;;  %v5193_v7 = vld [vmem:[%s8729_s11 + $0x78] sm:$0xff] }
 0x910   : > { %v3338_v41 = vmul.f32 %v5185_v43, %v3292_v14  ;;  %v5194_v43 = vld [vmem:[%s8729_s11 + $0x80] sm:$0xff] }
 0x911   : > { %3436 = vmatmul.f32.gmra.mxu0 %v3337_v63  ;;  %3616 = vmatmul.f32.gmra.mxu1 %v9091_v0  ;;  %v9098_v63 = vld [vmem:[#allocation114_spill] sm:$0xff] }
 0x912   : > { %4879 = vmatmul.msk.f32.gmra.mxu3 %vm991_vm4, %v3338_v41 }
 0x916   : > { %v3230_v59 = vpop.f32.mrf.mxu1 }
 0x917   : > { %v3339_v27 = vmul.f32 %v5186_v42, %v3230_v59  ;;  %v3295_v50 = vpop.f32.mrf.mxu2  ;;  %v5195_v59 = vld [vmem:[%s8729_s11 + $0x88] sm:$0xff] }
 0x918   : > { %v3340_v48 = vmul.f32 %v5187_v22, %v3295_v50  ;;  %v9100_v50 = vld [vmem:[#allocation116_spill] sm:$0xff] }
 0x919   : > { %3439 = vmatmul.f32.gmra.mxu0 %v3339_v27  ;;  %3619 = vmatmul.f32.gmra.mxu1 %v9092_v17  ;;  %v7516_v27 = vpop.f32.mrf.mxu3 }
 0x91a   : > { %4880 = vmatmul.msk.f32.gmra.mxu3 %vm991_vm4, %v3340_v48  ;;  %9099 = vst [vmem:[#allocation105_spill] sm:$0xff] %v7516_v27  ;;  %v5196_v48 = vld [vmem:[%s8729_s11 + $0x90] sm:$0xff] }
 0x91e   : > { %v3233_v19 = vpop.f32.mrf.mxu1 }
 0x91f   : > { %v3341_v62 = vmul.f32 %v5188_v12, %v3233_v19  ;;  %v3298_v31 = vpop.f32.mrf.mxu2  ;;  %v5197_v12 = vld [vmem:[%s8729_s11 + $0x98] sm:$0xff] }
 0x920   : > { %v3342_v3 = vmul.f32 %v5189_v61, %v3298_v31  ;;  %v9101_v31 = vld [vmem:[#allocation15_spill] sm:$0xff] }
 0x921   : > { %3442 = vmatmul.f32.gmra.mxu0 %v3341_v62  ;;  %3622 = vmatmul.f32.gmra.mxu1 %v9094_v39  ;;  %v7528_v61 = vpop.f32.mrf.mxu3  ;;  %v5198_v39 = vld [vmem:[%s8729_s11 + $0xa0] sm:$0xff] }
 0x922   : > { %4881 = vmatmul.msk.f32.gmra.mxu3 %vm991_vm4, %v3342_v3  ;;  %9102 = vst [vmem:[#allocation107_spill] sm:$0xff] %v7528_v61 }
 0x926   : > { %v3236_v55 = vpop.f32.mrf.mxu1 }
 0x927   : > { %v3343_v23 = vmul.f32 %v5190_v25, %v3236_v55  ;;  %v3301_v21 = vpop.f32.mrf.mxu2 }
 0x928   : > { %v3344_v51 = vmul.f32 %v5191_v30, %v3301_v21  ;;  %v9103_v30 = vld [vmem:[#allocation16_spill] sm:$0xff] }
 0x929   : > { %3445 = vmatmul.f32.gmra.mxu0 %v3343_v23  ;;  %3625 = vmatmul.f32.gmra.mxu1 %v9096_v54  ;;  %v5199_v23 = vld [vmem:[%s8729_s11 + $0xa8] sm:$0xff] }
 0x92a   : > { %4882 = vmatmul.msk.f32.gmra.mxu3 %vm991_vm4, %v3344_v51  ;;  %v7538_v51 = vpop.f32.mrf.mxu3 }
 0x92b   : > { %9104 = vst [vmem:[#allocation108_spill] sm:$0xff] %v7538_v51 }
 0x92e   : > { %v3239_v9 = vpop.f32.mrf.mxu1 }
 0x92f   : > { %v3345_v52 = vmul.f32 %v5192_v47, %v3239_v9  ;;  %v3304_v58 = vpop.f32.mrf.mxu2  ;;  %v5200_v9 = vld [vmem:[%s8729_s11 + $0xb0] sm:$0xff] }
 0x930   : > { %v3346_v13 = vmul.f32 %v5193_v7, %v3304_v58  ;;  %v5201_v58 = vld [vmem:[%s8729_s11 + $0xb8] sm:$0xff] }
 0x931   : > { %3448 = vmatmul.f32.gmra.mxu0 %v3345_v52  ;;  %3628 = vmatmul.f32.gmra.mxu1 %v9098_v63 }
 0x932   : > { %4883 = vmatmul.msk.f32.gmra.mxu3 %vm991_vm4, %v3346_v13  ;;  %v5202_v13 = vld [vmem:[%s8719_s1 + $0x58] sm:$0xff] }
 0x936   : > { %v3242_v14 = vpop.f32.mrf.mxu1 }
 0x937   : > { %v3347_v41 = vmul.f32 %v5194_v43, %v3242_v14  ;;  %v3307_v0 = vpop.f32.mrf.mxu2  ;;  %v7550_v14 = vpop.f32.mrf.mxu3  ;;  %v5203_v43 = vld [vmem:[%s8729_s11 + $0xc0] sm:$0xff] }
 0x938   : > { %v3348_v42 = vmul.f32 %v5195_v59, %v3307_v0  ;;  %9105 = vst [vmem:[#allocation110_spill] sm:$0xff] %v7550_v14  ;;  %v5204_v59 = vld [vmem:[%s8729_s11 + $0xc8] sm:$0xff] }
 0x939   : > { %3451 = vmatmul.f32.gmra.mxu0 %v3347_v41  ;;  %3631 = vmatmul.f32.gmra.mxu1 %v9100_v50  ;;  %v5205_v50 = vld [vmem:[%s8719_s1 + $0x60] sm:$0xff] }
 0x93a   : > { %4884 = vmatmul.msk.f32.gmra.mxu3 %vm991_vm4, %v3348_v42 }
 0x93e   : > { %v3245_v22 = vpop.f32.mrf.mxu1 }
 0x93f   : > { %v3349_v17 = vmul.f32 %v5196_v48, %v3245_v22  ;;  %v3310_v19 = vpop.f32.mrf.mxu2  ;;  %v5206_v48 = vld [vmem:[%s8729_s11 + $0xd0] sm:$0xff] }
 0x940   : > { %v3350_v62 = vmul.f32 %v5197_v12, %v3310_v19  ;;  %v5207_v12 = vld [vmem:[%s8729_s11 + $0xd8] sm:$0xff] }
 0x941   : > { %3454 = vmatmul.f32.gmra.mxu0 %v3349_v17  ;;  %3634 = vmatmul.f32.gmra.mxu1 %v9101_v31  ;;  %v7568_v31 = vpop.f32.mrf.mxu3 }
 0x942   : > { %4885 = vmatmul.msk.f32.gmra.mxu3 %vm991_vm4, %v3350_v62  ;;  %9106 = vst [vmem:[#allocation112_spill] sm:$0xff] %v7568_v31 }
 0x946   : > { %v3248_v3 = vpop.f32.mrf.mxu1 }
 0x947   : > { %v3351_v55 = vmul.f32 %v5198_v39, %v3248_v3  ;;  %v3313_v25 = vpop.f32.mrf.mxu2  ;;  %v9107_v3 = vld [vmem:[#allocation17_spill] sm:$0xff] }
 0x948   : > { %v3352_v21 = vmul.f32 %v5199_v23, %v3313_v25 }
 0x949   : > { %3457 = vmatmul.f32.gmra.mxu0 %v3351_v55  ;;  %3637 = vmatmul.f32.gmra.mxu1 %v9103_v30  ;;  %v5208_v55 = vld [vmem:[%s8729_s11 + $0xe0] sm:$0xff] }
 0x94a   : > { %4886 = vmatmul.msk.f32.gmra.mxu3 %vm991_vm4, %v3352_v21  ;;  %v5209_v21 = vld [vmem:[%s8729_s11 + $0xe8] sm:$0xff] }
 0x94e   : > { %v3251_v54 = vpop.f32.mrf.mxu1 }
 0x94f   : > { %v3353_v47 = vmul.f32 %v5200_v9, %v3251_v54  ;;  %v3316_v52 = vpop.f32.mrf.mxu2  ;;  %v9108_v54 = vld [vmem:[#allocation36_spill] sm:$0xff]  ;;  %v7580_v9 = vpop.f32.mrf.mxu3 }
 0x950   : > { %v3354_v7 = vmul.f32 %v5201_v58, %v3316_v52  ;;  %9109 = vst [vmem:[#allocation114_spill] sm:$0xff] %v7580_v9  ;;  %v5210_v52 = vld [vmem:[%s8729_s11 + $0xf0] sm:$0xff] }
 0x951   : > { %3460 = vmatmul.f32.gmra.mxu0 %v3353_v47  ;;  %3640 = vmatmul.f32.gmra.mxu1 %v5202_v13  ;;  %v5211_v13 = vld [vmem:[%s8729_s11 + $0xf8] sm:$0xff] }
 0x952   : > { %4887 = vmatmul.msk.f32.gmra.mxu3 %vm991_vm4, %v3354_v7 }
 0x956   : > { %v3254_v63 = vpop.f32.mrf.mxu1 }
 0x957   : > { %v3355_v41 = vmul.f32 %v5203_v43, %v3254_v63  ;;  %v3319_v0 = vpop.f32.mrf.mxu2  ;;  %v9110_v43 = vld [vmem:[#allocation43_spill] sm:$0xff] }
 0x958   : > { %v3356_v42 = vmul.f32 %v5204_v59, %v3319_v0 }
 0x959   : > { %3463 = vmatmul.f32.gmra.mxu0 %v3355_v41  ;;  %3643 = vmatmul.f32.gmra.mxu1 %v5205_v50  ;;  %v7590_v41 = vpop.f32.mrf.mxu3 }
 0x95a   : > { %4888 = vmatmul.msk.f32.gmra.mxu3 %vm991_vm4, %v3356_v42  ;;  %9111 = vst [vmem:[#allocation116_spill] sm:$0xff] %v7590_v41 }
 0x95e   : > { %v3257_v22 = vpop.f32.mrf.mxu1 }
 0x95f   : > { %v3357_v17 = vmul.f32 %v5206_v48, %v3257_v22  ;;  %v3322_v19 = vpop.f32.mrf.mxu2 }
 0x960   : > { %v3358_v62 = vmul.f32 %v5207_v12, %v3322_v19 }
 0x961   : > { %3466 = vmatmul.f32.gmra.mxu0 %v3357_v17  ;;  %3646 = vmatmul.f32.gmra.mxu1 %v9107_v3  ;;  %v9115_v17 = vld [vmem:[#allocation9_spill] sm:$0xff] }
 0x962   : > { %4889 = vmatmul.msk.f32.gmra.mxu3 %vm991_vm4, %v3358_v62  ;;  %v9116_v3 = vld [vmem:[#allocation37_spill] sm:$0xff] }
 0x966   : > { %v3260_v39 = vpop.f32.mrf.mxu1 }
 0x967   : > { %v3359_v25 = vmul.f32 %v5208_v55, %v3260_v39  ;;  %v3325_v23 = vpop.f32.mrf.mxu2 }
 0x968   : > { %v3360_v30 = vmul.f32 %v5209_v21, %v3325_v23  ;;  %v9119_v23 = vld [vmem:[#allocation10_spill] sm:$0xff] }
 0x969   : > { %3469 = vmatmul.f32.gmra.mxu0 %v3359_v25  ;;  %3649 = vmatmul.f32.gmra.mxu1 %v9108_v54 }
 0x96a   : > { %4890 = vmatmul.msk.f32.gmra.mxu3 %vm991_vm4, %v3360_v30 }
 0x96e   : > { %v3263_v47 = vpop.f32.mrf.mxu1 }
 0x96f   : > { %v3361_v58 = vmul.f32 %v5210_v52, %v3263_v47  ;;  %v3328_v7 = vpop.f32.mrf.mxu2 }
 0x970   : > { %v3362_v63 = vmul.f32 %v5211_v13, %v3328_v7 }
 0x971   : > { %3472 = vmatmul.f32.gmra.mxu0 %v3361_v58  ;;  %3652 = vmatmul.f32.gmra.mxu1 %v9110_v43  ;;  %v7628_v58 = vpop.xlane.xlu0 %1033  ;;  %v9124_v43 = vld [vmem:[#allocation12_spill] sm:$0xff] }
 0x972   : > { %4891 = vmatmul.msk.f32.gmra.mxu3 %vm991_vm4, %v3362_v63 }
 0x976   : > { %v7592_v0 = vpop.f32.mrf.mxu0  ;;  %v7594_v59 = vpop.f32.mrf.mxu1 }
 0x977   : > { %9112 = vst [vmem:[#allocation15_spill] sm:$0xff] %v7592_v0  ;;  %v7596_v42 = vpop.f32.mrf.mxu2 }
 0x97d   : > { %v7598_v50 = vpop.f32.mrf.mxu3 }
 0x97e   : > { %9113 = vst [vmem:[#allocation16_spill] sm:$0xff] %v7598_v50  ;;  %v7600_v22 = vpop.f32.mrf.mxu0  ;;  %v3611_v48 = vpop.f32.mrf.mxu1 }
 0x97f   : > { %9114 = vst [vmem:[#allocation17_spill] sm:$0xff] %v7600_v22  ;;  %v7603_v19 = vadd.f32 %v3611_v48, %v9115_v17  ;;  %v7605_v12 = vpop.f32.mrf.mxu2  ;;  %v9175_v22 = vld [vmem:[#allocation47_spill] sm:$0xff] }
 0x980   : > { %3693 = vmatpush.msrb.mxu3 %v7605_v12 }
 0x981   : > { %v3896_v62 = vsel %vm920_vm3, %v7603_v19, 0.0 }
 0x982   : > { %3897 = vadd.xlane.f32.xlu0 %v3896_v62  ;;  %3694 = vmatpush.msrb.mxu3 %v7596_v42 }
 0x983   : > { %4924 = vmatmul.msk.f32.vlgmr.msrb.gmra.mxu3 %vm793_vm0, %v9116_v3 }
 0x985   : > { %v7613_v39 = vpop.f32.mrf.mxu3 }
 0x986   : > { %9117 = vst [vmem:[#allocation36_spill] sm:$0xff] %v7613_v39  ;;  %v7615_v55 = vpop.f32.mrf.mxu0  ;;  %v3614_v25 = vpop.f32.mrf.mxu1 }
 0x987   : > { %9118 = vst [vmem:[#allocation43_spill] sm:$0xff] %v7615_v55  ;;  %v7618_v21 = vadd.f32 %v3614_v25, %v9119_v23  ;;  %v7643_v23 = vpop.xlane.xlu0 %1036 }
 0x989   : > { %v3899_v30 = vsel %vm920_vm3, %v7618_v21, 0.0 }
 0x98a   : > { %3900 = vadd.xlane.f32.xlu1 %v3899_v30  ;;  %v9128_v30 = vld [vmem:[#allocation3_spill] sm:$0xff] }
 0x98d   : > { %v7622_v54 = vpop.f32.mrf.mxu3 }
 0x98e   : > { %9120 = vst [vmem:[#allocation9_spill] sm:$0xff] %v7622_v54  ;;  %v7624_v47 = vpop.f32.mrf.mxu0  ;;  %v7626_v52 = vpop.f32.mrf.mxu1 }
 0x98f   : > { %9121 = vst [vmem:[#allocation37_spill] sm:$0xff] %v7624_v47 }
 0x995   : > { %v7630_v7 = vpop.f32.mrf.mxu3 }
 0x996   : > { %9122 = vst [vmem:[#allocation10_spill] sm:$0xff] %v7630_v7  ;;  %v7632_v13 = vpop.f32.mrf.mxu0  ;;  %v3620_v63 = vpop.f32.mrf.mxu1  ;;  %v9144_v7 = vld [vmem:[#allocation22_spill] sm:$0xff] }
 0x997   : > { %9123 = vst [vmem:[#allocation143_spill] sm:$0xff] %v7632_v13  ;;  %v7635_v48 = vadd.f32 %v3620_v63, %v9124_v43 }
 0x999   : > { %9125 = vst [vmem:[#allocation12_spill] sm:$0xff] %v7635_v48  ;;  %v3905_v17 = vsel %vm920_vm3, %v7635_v48, 0.0 }
 0x99a   : > { %3906 = vadd.xlane.f32.xlu0 %v3905_v17  ;;  %v7656_v17 = vpop.xlane.xlu0 %1039 }
 0x99d   : > { %v7639_v62 = vpop.f32.mrf.mxu3 }
 0x99e   : > { %9126 = vst [vmem:[#allocation144_spill] sm:$0xff] %v7639_v62  ;;  %v7641_v3 = vpop.f32.mrf.mxu0  ;;  %v3623_v25 = vpop.f32.mrf.mxu1 }
 0x99f   : > { %9127 = vst [vmem:[#allocation145_spill] sm:$0xff] %v7641_v3  ;;  %v7646_v41 = vadd.f32 %v3623_v25, %v9128_v30  ;;  %v9138_v3 = vld [vmem:[#allocation6_spill] sm:$0xff] }
 0x9a1   : > { %9129 = vst [vmem:[#allocation3_spill] sm:$0xff] %v7646_v41  ;;  %v3908_v9 = vsel %vm920_vm3, %v7646_v41, 0.0 }
 0x9a2   : > { %3909 = vadd.xlane.f32.xlu1 %v3908_v9  ;;  %v1046_v9 = vpop.xlane.xlu0 %1045 }
 0x9a5   : > { %v7650_v63 = vpop.f32.mrf.mxu3 }
 0x9a6   : > { %9130 = vst [vmem:[#allocation146_spill] sm:$0xff] %v7650_v63  ;;  %v7652_v43 = vpop.f32.mrf.mxu0  ;;  %v7654_v14 = vpop.f32.mrf.mxu1 }
 0x9a7   : > { %9131 = vst [vmem:[#allocation147_spill] sm:$0xff] %v7652_v43 }
 0x9aa   : > { %v7676_v54 = vpop.xlane.xlu0 %1054 }
 0x9ad   : > { %v7658_v51 = vpop.f32.mrf.mxu3 }
 0x9ae   : > { %9132 = vst [vmem:[#allocation148_spill] sm:$0xff] %v7658_v51  ;;  %v7660_v27 = vpop.f32.mrf.mxu0  ;;  %v3629_v53 = vpop.f32.mrf.mxu1 }
 0x9af   : > { %9133 = vst [vmem:[#allocation149_spill] sm:$0xff] %v7660_v27  ;;  %v7663_v25 = vadd.f32 %v3629_v53, %v9134_v26  ;;  %v9167_v27 = vld [vmem:[#allocation51_spill] sm:$0xff] }
 0x9b0   : > { %v1591_v6 = vadd.f32 %v9168_v29, %v9167_v27 }
 0x9b1   : > { %9135 = vst [vmem:[#allocation4_spill] sm:$0xff] %v7663_v25  ;;  %v3914_v30 = vsel %vm920_vm3, %v7663_v25, 0.0 }
 0x9b2   : > { %3915 = vadd.xlane.f32.xlu0 %v3914_v30 }
 0x9b5   : > { %v7667_v49 = vpop.f32.mrf.mxu3 }
 0x9b6   : > { %9136 = vst [vmem:[#allocation150_spill] sm:$0xff] %v7667_v49  ;;  %v7669_v43 = vpop.f32.mrf.mxu0  ;;  %v3632_v63 = vpop.f32.mrf.mxu1 }
 0x9b7   : > { %9137 = vst [vmem:[#allocation151_spill] sm:$0xff] %v7669_v43  ;;  %v7672_v20 = vadd.f32 %v3632_v63, %v9138_v3  ;;  %v7691_v63 = vpop.xlane.xlu0 %1063 }
 0x9b9   : > { %9139 = vst [vmem:[#allocation6_spill] sm:$0xff] %v7672_v20  ;;  %v3917_v51 = vsel %vm920_vm3, %v7672_v20, 0.0 }
 0x9ba   : > { %3918 = vadd.xlane.f32.xlu1 %v3917_v51 }
 0x9bd   : > { %v7678_v26 = vpop.f32.mrf.mxu3 }
 0x9be   : > { %9140 = vst [vmem:[#allocation152_spill] sm:$0xff] %v7678_v26  ;;  %v7680_v53 = vpop.f32.mrf.mxu0  ;;  %v7682_v30 = vpop.f32.mrf.mxu1 }
 0x9bf   : > { %9141 = vst [vmem:[#allocation153_spill] sm:$0xff] %v7680_v53 }
 0x9c5   : > { %v7684_v55 = vpop.f32.mrf.mxu3 }
 0x9c6   : > { %9142 = vst [vmem:[#allocation154_spill] sm:$0xff] %v7684_v55  ;;  %v7686_v1 = vpop.f32.mrf.mxu0  ;;  %v3638_v43 = vpop.f32.mrf.mxu1 }
 0x9c7   : > { %9143 = vst [vmem:[#allocation155_spill] sm:$0xff] %v7686_v1  ;;  %v7689_v3 = vadd.f32 %v3638_v43, %v9144_v7  ;;  %v7702_v55 = vpop.xlane.xlu0 %1072 }
 0x9c9   : > { %9145 = vst [vmem:[#allocation22_spill] sm:$0xff] %v7689_v3  ;;  %v3923_v51 = vsel %vm920_vm3, %v7689_v3, 0.0 }
 0x9ca   : > { %3924 = vadd.xlane.f32.xlu0 %v3923_v51 }
 0x9cd   : > { %v7695_v47 = vpop.f32.mrf.mxu3 }
 0x9ce   : > { %9146 = vst [vmem:[#allocation156_spill] sm:$0xff] %v7695_v47  ;;  %v3641_v26 = vpop.f32.mrf.mxu1  ;;  %v7697_v53 = vpop.f32.mrf.mxu0 }
 0x9cf   : > { %9147 = vst [vmem:[#allocation157_spill] sm:$0xff] %v7697_v53  ;;  %v7700_v18 = vadd.f32 %v3641_v26, %v9148_v40  ;;  %v7710_v50 = vpop.xlane.xlu0 %1987 }
 0x9d1   : > { %9149 = vst [vmem:[#allocation24_spill] sm:$0xff] %v7700_v18  ;;  %v3926_v7 = vsel %vm920_vm3, %v7700_v18, 0.0 }
 0x9d2   : > { %3927 = vadd.xlane.f32.xlu1 %v3926_v7 }
 0x9d5   : > { %v7706_v43 = vpop.f32.mrf.mxu3 }
 0x9d6   : > { %9150 = vst [vmem:[#allocation158_spill] sm:$0xff] %v7706_v43  ;;  %v7708_v31 = vpop.f32.mrf.mxu1  ;;  %v7712_v51 = vpop.f32.mrf.mxu0 }
 0x9d7   : > { %9151 = vst [vmem:[#allocation159_spill] sm:$0xff] %v7712_v51  ;;  %v7719_v26 = vpop.xlane.xlu0 %1993 }
 0x9dd   : > { %v7714_v0 = vpop.f32.mrf.mxu3 }
 0x9de   : > { %9152 = vst [vmem:[#allocation160_spill] sm:$0xff] %v7714_v0  ;;  %v3647_v53 = vpop.f32.mrf.mxu1  ;;  %v7723_v7 = vpop.f32.mrf.mxu0 }
 0x9df   : > { %v7717_v40 = vadd.f32 %v3647_v53, %v9153_v32  ;;  %9155 = vst [vmem:[#allocation161_spill] sm:$0xff] %v7723_v7  ;;  %v7730_v51 = vpop.xlane.xlu0 %1999  ;;  %v9161_v7 = vld [vmem:[#allocation2_spill] sm:$0xff] }
 0x9e1   : > { %9154 = vst [vmem:[#allocation26_spill] sm:$0xff] %v7717_v40  ;;  %v3932_v57 = vsel %vm920_vm3, %v7717_v40, 0.0 }
 0x9e2   : > { %3933 = vadd.xlane.f32.xlu0 %v3932_v57  ;;  %v7741_v57 = vld [vmem:[%s8730_s12 + $0x10] sm:$0xff] }
 0x9e5   : > { %v7725_v43 = vpop.f32.mrf.mxu3 }
 0x9e6   : > { %9156 = vst [vmem:[#allocation162_spill] sm:$0xff] %v7725_v43  ;;  %v3650_v15 = vpop.f32.mrf.mxu1  ;;  %v3470_v53 = vpop.f32.mrf.mxu0 }
 0x9e7   : > { %v7728_v47 = vadd.f32 %v3650_v15, %v9157_v46  ;;  %v7736_v37 = vpop.xlane.xlu0 %2005  ;;  %v1076_v46 = vmul.f32 %v7628_v58, %v7741_v57  ;;  %v7761_v58 = vld [vmem:[%s8730_s12 + $0x30] sm:$0xff] }
 0x9e9   : > { %9158 = vst [vmem:[#allocation28_spill] sm:$0xff] %v7728_v47  ;;  %v3935_v32 = vsel %vm920_vm3, %v7728_v47, 0.0 }
 0x9ea   : > { %3936 = vadd.xlane.f32.xlu1 %v3935_v32  ;;  %v7750_v32 = vld [vmem:[%s8730_s12 + $0x18] sm:$0xff] }
 0x9ed   : > { %v3535_v0 = vpop.f32.mrf.mxu3 }
 0x9ee   : > { %v7734_v1 = vadd.f32 %v3535_v0, %v3470_v53  ;;  %v1077_v0 = vmul.f32 %v7643_v23, %v7750_v32 }
 0x9ef   : > { %v7745_v15 = vpop.xlane.xlu0 %2011 }
 0x9f0   : > { %9159 = vst [vmem:[#allocation163_spill] sm:$0xff] %v7734_v1 }
 0x9f5   : > { %v7754_v53 = vpop.f32.mrf.mxu3 }
 0x9f6   : > { %1102 = vperm.xlu0 %5045, %v1076_v46   ;;  %9160 = vst [vmem:[#allocation164_spill] sm:$0xff] %v7754_v53  ;;  %v1080_v46 = vmul.f32 %v1046_v9, %v7761_v58 }
 0x9f7   : > { %v7756_v1 = vpop.xlane.xlu0 %2017 }
 0x9fe   : > { %1107 = vperm.xlu0 %5045, %v1077_v0  }
 0x9ff   : > { %v7765_v61 = vpop.xlane.xlu0 %2023 }
 0xa06   : > { %1122 = vperm.xlu0 %5045, %v1080_v46   ;;  %v3696_v43 = vpop.f32.mrf.mxu3 }
 0xa07   : > { %v3697_v5 = vadd.f32 %v3696_v43, %v9161_v7  ;;  %v7767_v23 = vpop.xlane.xlu0 %2029 }
 0xa09   : > { %3699 = vxpose.xlu2.b32.start.end [1/1] (short) (narrow) %v3697_v5, 32 }
 0xa0f   : > { %v7769_v0 = vpop.xlane.xlu0 %2942 }
 0xa17   : > { %v7771_v53 = vpop.xlane.xlu0 %2951 }
 0xa1f   : > { %v7773_v62 = vpop.xlane.xlu0 %2960 }
 0xa27   : > { %v7775_v13 = vpop.xlane.xlu0 %2969 }
 0xa2f   : > { %v7777_v10 = vpop.xlane.xlu0 %2978 }
 0xa37   : > { %v7779_v9 = vpop.xlane.xlu0 %3897 }
 0xa38   : > { %9162 = vst [vmem:[#allocation2_spill] sm:$0xff] %v7779_v9 }
 0xa3f   : > { %v7781_v46 = vpop.xlane.xlu0 %3906 }
 0xa40   : > { %9163 = vst [vmem:[#allocation165_spill] sm:$0xff] %v7781_v46 }
 0xa47   : > { %v7783_v43 = vpop.xlane.xlu0 %3915 }
 0xa48   : > { %9164 = vst [vmem:[#allocation166_spill] sm:$0xff] %v7783_v43  ;;  %v9172_v43 = vld [vmem:[#allocation42_spill] sm:$0xff] }
 0xa4f   : > { %v7785_v7 = vpop.xlane.xlu0 %3924 }
 0xa50   : > { %9165 = vst [vmem:[#allocation167_spill] sm:$0xff] %v7785_v7 }
 0xa57   : > { %v7787_v5 = vpop.xlane.xlu0 %3933 }
 0xa58   : > { %9166 = vst [vmem:[#allocation168_spill] sm:$0xff] %v7787_v5  ;;  %v9170_v5 = vld [vmem:[#allocation54_spill] sm:$0xff] }
 0xa59   : > { %v1594_v38 = vadd.f32 %v9171_v45, %v9170_v5  ;;  %v7831_v5 = vpop.xlane.xlu1 %1030 }
 0xa68   : > { %v1103_v49 = vpop.permute.xlu0 %1102 }
 0xa69   : > { %v1245_v44 = vadd.f32 %v9169_v11, %v1103_v49  ;;  %v9173_v11 = vld [vmem:[#allocation60_spill] sm:$0xff] }
 0xa6a   : > { %v1603_v39 = vadd.f32 %v9174_v28, %v9173_v11  ;;  %v5213_v28 = vld [vmem:[%s8728_s10 + $0x10] sm:$0xff] }
 0xa6b   : > { %v1634_v4 = vadd.f32 %v1591_v6, %v1245_v44  ;;  %v9176_v6 = vld [vmem:[#allocation13_spill] sm:$0xff]  ;;  %v9177_v44 = vld [vmem:[#allocation18_spill] sm:$0xff] }
 0xa6c   : > { %v1041_v45 = vsel %vm920_vm3, %v9177_v44, 0.0  ;;  %v9181_v44 = vld [vmem:[#allocation68_spill] sm:$0xff] }
 0xa6d   : > { %1650 = vst.msk [vmem:[%s7797_s24 + $0x10] sm:$0xff] %vm920_vm3, %v1634_v4  ;;  %v1026_v4 = vsel %vm920_vm3, %v9176_v6, 0.0 }
 0xa70   : > { %v1108_v7 = vpop.permute.xlu0 %1107 }
 0xa71   : > { %v1248_v29 = vadd.f32 %v9172_v43, %v1108_v7 }
 0xa73   : > { %v1635_v27 = vadd.f32 %v1594_v38, %v1248_v29  ;;  %v9178_v38 = vld [vmem:[#allocation21_spill] sm:$0xff] }
 0xa74   : > { %v1050_v43 = vsel %vm920_vm3, %v9178_v38, 0.0 }
 0xa75   : > { %1651 = vst.msk [vmem:[%s7797_s24 + $0x18] sm:$0xff] %vm920_vm3, %v1635_v27  ;;  %v5215_v27 = vld [vmem:[%s8728_s10] sm:$0xff] }
 0xa78   : > { %v1123_v49 = vpop.permute.xlu0 %1122 }
 0xa79   : > { %v1257_v34 = vadd.f32 %v9175_v22, %v1123_v49  ;;  %v9179_v22 = vld [vmem:[#allocation25_spill] sm:$0xff] }
 0xa7a   : > { %v9180_v49 = vld [vmem:[#allocation29_spill] sm:$0xff] }
 0xa7b   : > { %v1638_v33 = vadd.f32 %v1603_v39, %v1257_v34  ;;  %v5214_v34 = vld [vmem:[%s8728_s10 + $0x8] sm:$0xff]  ;;  %v1059_v39 = vsel %vm920_vm3, %v9179_v22, 0.0  ;;  %v1068_v11 = vsel %vm920_vm3, %v9180_v49, 0.0 }
 0xa7c   : > { %v5219_v22 = vld [vmem:[%s8731_s13 + $0xa8] sm:$0xff] }
 0xa7d   : > { %1654 = vst.msk [vmem:[%s7797_s24 + $0x30] sm:$0xff] %vm920_vm3, %v1638_v33  ;;  %v5212_v33 = vld [vmem:[%s8728_s10 + $0x18] sm:$0x1] }
 0xa92   : > { %1027 = vadd.xlane.f32.xlu2 %v1026_v4  ;;  %v7842_v4 = vpop.xlane.xlu1 %1048 }
 0xa9a   : > { %1042 = vadd.xlane.f32.xlu2 %v1041_v45  ;;  %v1983_v45 = vsel %vm920_vm3, %v9181_v44, 0.0  ;;  %v5224_v44 = vld [vmem:[%s8731_s13 + $0x80] sm:$0xff] }
 0xaa2   : > { %v3715_v7 = vpop.trf.xlu2  ;;  %1051 = vadd.xlane.f32.xlu2 %v1050_v43  ;;  %v7848_v43 = vpop.xlane.xlu1 %1057 }
 0xaa3   : > { %4925 = vmatmul.msk.f32.vlgmr.msrb.gmra.mxu2 %vm849_vm2, %v3715_v7  ;;  %4929 = vmatmul.msk.f32.vlgmr.msrb.gmra.mxu0 %vm849_vm2, %v3715_v7  ;;  %v2944_v7 = vsel %vm920_vm3, %v7172_v16, 0.0  ;;  %v5218_v16 = vld [vmem:[%s8731_s13 + $0xb0] sm:$0xff] }
 0xaa4   : > { %4939 = vmatpush.msk.msrb.mxu2 %vm927_vm1, %v5212_v33  ;;  %v5216_v33 = vld [vmem:[%s8731_s13 + $0xc0] sm:$0xff] }
 0xaa6   : > { %4098 = vmatpush.msrb.mxu2 %v5213_v28  ;;  %v5217_v28 = vld [vmem:[%s8731_s13 + $0xb8] sm:$0xff] }
 0xaa8   : > { %4099 = vmatpush.msrb.mxu2 %v5214_v34 }
 0xaaa   : > { %v3716_v29 = vpop.trf.xlu2  ;;  %1060 = vadd.xlane.f32.xlu2 %v1059_v39  ;;  %4100 = vmatpush.msrb.mxu2 %v5215_v27  ;;  %v7862_v34 = vpop.xlane.xlu1 %1066  ;;  %v5220_v39 = vld [vmem:[%s8731_s13 + $0xa0] sm:$0xff]  ;;  %v9182_v27 = vld [vmem:[#allocation8_spill] sm:$0xff] }
 0xaab   : > { %4926 = vmatmul.msk.f32.gmra.mxu2 %vm849_vm2, %v3716_v29  ;;  %4930 = vmatmul.msk.f32.gmra.mxu0 %vm849_vm2, %v3716_v29  ;;  %v5222_v29 = vld [vmem:[%s8731_s13 + $0x90] sm:$0xff]  ;;  %v7887_v49 = vadd.f32 %v7594_v59, %v9182_v27  ;;  %v2971_v59 = vsel %vm920_vm3, %v7231_v56, 0.0  ;;  %v7950_v27 = vld [vmem:[%s8730_s12] sm:$0xff] }
 0xaad   : > { %v3893_v56 = vsel %vm920_vm3, %v7887_v49, 0.0 }
 0xab2   : > { %v3717_v6 = vpop.trf.xlu2  ;;  %1069 = vadd.xlane.f32.xlu2 %v1068_v11  ;;  %v7891_v11 = vpop.xlane.xlu1 %1990 }
 0xab3   : > { %4927 = vmatmul.msk.f32.gmra.mxu2 %vm849_vm2, %v3717_v6  ;;  %4931 = vmatmul.msk.f32.gmra.mxu0 %vm849_vm2, %v3717_v6  ;;  %v5223_v6 = vld [vmem:[%s8731_s13 + $0x88] sm:$0xff] }
 0xaba   : > { %v3718_v38 = vpop.trf.xlu2  ;;  %1984 = vadd.xlane.f32.xlu2 %v1983_v45  ;;  %v2980_v45 = vsel %vm920_vm3, %v7248_v36, 0.0 }
 0xabb   : > { %4928 = vmatmul.msk.f32.gmra.mxu2 %vm849_vm2, %v3718_v38  ;;  %4932 = vmatmul.msk.f32.gmra.mxu0 %vm849_vm2, %v3718_v38 }
 0xac2   : > { %2945 = vadd.xlane.f32.xlu2 %v2944_v7  ;;  %v9183_v7 = vld [vmem:[#allocation11_spill] sm:$0xff] }
 0xac3   : > { %4934 = vmatmul.msk.f32.vlgmr.msra.gmra.mxu2 %vm920_vm3, %v7596_v42  ;;  %4937 = vmatmul.msk.f32.vlgmr.msra.gmra.mxu0 %vm920_vm3, %v7596_v42  ;;  %v2953_v42 = vsel %vm920_vm3, %v7199_v8, 0.0  ;;  %v5221_v8 = vld [vmem:[%s8731_s13 + $0x98] sm:$0xff] }
 0xac4   : > { %4438 = vmatpush.msra.mxu2 %v5216_v33  ;;  %v7915_v33 = vadd.f32 %v7626_v52, %v9183_v7  ;;  %v7962_v7 = vld [vmem:[%s8730_s12 + $0x20] sm:$0xff] }
 0xac6   : > { %4439 = vmatpush.msra.mxu2 %v5217_v28  ;;  %v3902_v36 = vsel %vm920_vm3, %v7915_v33, 0.0 }
 0xac8   : > { %4440 = vmatpush.msra.mxu2 %v5218_v16  ;;  %v9184_v16 = vld [vmem:[#allocation5_spill] sm:$0xff] }
 0xac9   : > { %v7929_v52 = vadd.f32 %v7654_v14, %v9184_v16  ;;  %v1078_v16 = vmul.f32 %v7656_v17, %v7962_v7 }
 0xaca   : > { %2954 = vadd.xlane.f32.xlu2 %v2953_v42  ;;  %4441 = vmatpush.msra.mxu2 %v5219_v22 }
 0xacb   : > { %4935 = vmatmul.msk.f32.gmra.mxu2 %vm920_vm3, %v7605_v12  ;;  %4938 = vmatmul.msk.f32.gmra.mxu0 %vm920_vm3, %v7605_v12  ;;  %v2962_v12 = vsel %vm920_vm3, %v7213_v35, 0.0  ;;  %v7905_v35 = vpop.xlane.xlu1 %1996  ;;  %9185 = vst [vmem:[#allocation51_spill] sm:$0xff] %v7929_v52  ;;  %v3911_v42 = vsel %vm920_vm3, %v7929_v52, 0.0 }
 0xacc   : > { %4442 = vmatpush.msra.mxu2 %v5220_v39  ;;  %v9186_v39 = vld [vmem:[#allocation7_spill] sm:$0xff] }
 0xace   : > { %4443 = vmatpush.msra.mxu2 %v5221_v8  ;;  %v7939_v8 = vadd.f32 %v7682_v30, %v9186_v39 }
 0xad0   : > { %4444 = vmatpush.msra.mxu2 %v5222_v29  ;;  %9187 = vst [vmem:[#allocation84_spill] sm:$0xff] %v7939_v8  ;;  %v3920_v29 = vsel %vm920_vm3, %v7939_v8, 0.0 }
 0xad2   : > { %2963 = vadd.xlane.f32.xlu2 %v2962_v12  ;;  %4445 = vmatpush.msra.mxu2 %v5223_v6  ;;  %v9188_v12 = vld [vmem:[#allocation20_spill] sm:$0xff] }
 0xad3   : > { %4940 = vmatmul.msk.f32.vlgmr.msrb.gmra.mxu2 %vm920_vm3, %v7887_v49  ;;  %v7911_v38 = vpop.xlane.xlu1 %2002  ;;  %v7954_v6 = vadd.f32 %v7708_v31, %v9188_v12  ;;  %v7985_v12 = vld [vmem:[%s8730_s12 + $0x40] sm:$0xff] }
 0xad4   : > { %4446 = vmatpush.msra.mxu2 %v5224_v44 }
 0xad5   : > { %9189 = vst [vmem:[#allocation41_spill] sm:$0xff] %v7954_v6 }
 0xada   : > { %2972 = vadd.xlane.f32.xlu2 %v2971_v59  ;;  %v3929_v59 = vsel %vm920_vm3, %v7954_v6, 0.0 }
 0xadb   : > { %4941 = vmatmul.msk.f32.gmra.mxu2 %vm920_vm3, %v7603_v19  ;;  %v7921_v28 = vpop.xlane.xlu1 %2008 }
 0xae2   : > { %2981 = vadd.xlane.f32.xlu2 %v2980_v45  ;;  %v3653_v45 = vpop.f32.mrf.mxu1 }
 0xae3   : > { %4942 = vmatmul.msk.f32.gmra.mxu2 %vm920_vm3, %v7618_v21  ;;  %v7933_v22 = vpop.xlane.xlu1 %2014 }
 0xaea   : > { %3894 = vadd.xlane.f32.xlu2 %v3893_v56  ;;  %v9190_v56 = vld [vmem:[#allocation31_spill] sm:$0xff] }
 0xaeb   : > { %4943 = vmatmul.msk.f32.gmra.mxu2 %vm920_vm3, %v7915_v33  ;;  %v7945_v14 = vpop.xlane.xlu1 %2020  ;;  %v7967_v31 = vadd.f32 %v3653_v45, %v9190_v56  ;;  %v7992_v45 = vpop.f32.mrf.mxu0  ;;  %v7997_v56 = vld [vmem:[%s8730_s12 + $0x48] sm:$0xff] }
 0xaec   : > { %9192 = vst [vmem:[#allocation85_spill] sm:$0xff] %v7992_v45  ;;  %v8017_v45 = vld [vmem:[%s8730_s12 + $0x60] sm:$0xff] }
 0xaed   : > { %9191 = vst [vmem:[#allocation54_spill] sm:$0xff] %v7967_v31  ;;  %v3938_v39 = vsel %vm920_vm3, %v7967_v31, 0.0 }
 0xaf2   : > { %3903 = vadd.xlane.f32.xlu2 %v3902_v36 }
 0xaf3   : > { %4944 = vmatmul.msk.f32.gmra.mxu2 %vm920_vm3, %v7635_v48 }
 0xafa   : > { %3912 = vadd.xlane.f32.xlu2 %v3911_v42  ;;  %v7971_v42 = vpop.xlane.xlu1 %2026 }
 0xafb   : > { %4945 = vmatmul.msk.f32.gmra.mxu2 %vm920_vm3, %v7646_v41 }
 0xb02   : > { %3921 = vadd.xlane.f32.xlu2 %v3920_v29  ;;  %v7980_v29 = vld [vmem:[%s8730_s12 + $0x38] sm:$0xff] }
 0xb03   : > { %4946 = vmatmul.msk.f32.gmra.mxu2 %vm920_vm3, %v7929_v52 }
 0xb05   : > { %v1028_v30 = vpop.xlane.xlu2 %1027 }
 0xb06   : > { %v1074_v44 = vmul.f32 %v1028_v30, %v7950_v27  ;;  %v1081_v30 = vmul.f32 %v7842_v4, %v7980_v29  ;;  %v8004_v4 = vld [vmem:[%s8730_s12 + $0x50] sm:$0xff] }
 0xb08   : > { %1092 = vperm.xlu1 %5046, %v1074_v44  }
 0xb0a   : > { %3930 = vadd.xlane.f32.xlu2 %v3929_v59  ;;  %v7990_v59 = vpop.xlane.xlu1 %2939 }
 0xb0b   : > { %4947 = vmatmul.msk.f32.gmra.mxu2 %vm920_vm3, %v7663_v25  ;;  %v8052_v25 = vld [vmem:[%s8730_s12 + $0x70] sm:$0xff] }
 0xb0d   : > { %v1043_v36 = vpop.xlane.xlu2 %1042 }
 0xb10   : > { %1112 = vperm.xlu1 %5046, %v1078_v16  }
 0xb12   : > { %3939 = vadd.xlane.f32.xlu2 %v3938_v39  ;;  %v1083_v39 = vmul.f32 %v7676_v54, %v7997_v56  ;;  %v8024_v54 = vld [vmem:[%s8730_s12 + $0x58] sm:$0xff] }
 0xb13   : > { %4948 = vmatmul.msk.f32.gmra.mxu2 %vm920_vm3, %v7672_v20  ;;  %v8034_v20 = vld [vmem:[%s8730_s12 + $0x8] sm:$0xff] }
 0xb14   : > { %9193 = vst [vmem:[#allocation42_spill] sm:$0xff] %v8034_v20 }
 0xb15   : > { %v1052_v17 = vpop.xlane.xlu2 %1051 }
 0xb16   : > { %v1082_v44 = vmul.f32 %v1052_v17, %v7985_v12  ;;  %v1084_v17 = vmul.f32 %v7848_v43, %v8004_v4 }
 0xb18   : > { %1127 = vperm.xlu1 %5046, %v1081_v30   ;;  %1132 = vperm.xlu0 %5045, %v1082_v44   ;;  %v8012_v44 = vpop.xlane.xlu1 %2948 }
 0xb1b   : > { %4949 = vmatmul.msk.f32.gmra.mxu2 %vm920_vm3, %v7939_v8 }
 0xb1d   : > { %v1061_v16 = vpop.xlane.xlu2 %1060 }
 0xb20   : > { %v8010_v30 = vpop.f32.mrf.mxu0  ;;  %1137 = vperm.xlu1 %5046, %v1083_v39   ;;  %1142 = vperm.xlu0 %5045, %v1084_v17   ;;  %v1086_v39 = vmul.f32 %v7691_v63, %v8017_v45  ;;  %v1085_v17 = vmul.f32 %v1061_v16, %v8024_v54  ;;  %v8042_v63 = vpop.xlane.xlu1 %2957  ;;  %v8047_v16 = vld [vmem:[%s8730_s12 + $0x68] sm:$0xff] }
 0xb23   : > { %4950 = vmatmul.msk.f32.gmra.mxu2 %vm920_vm3, %v7689_v3  ;;  %v1075_v3 = vmul.f32 %v7831_v5, %v8034_v20 }
 0xb25   : > { %v1070_v43 = vpop.xlane.xlu2 %1069 }
 0xb26   : > { %v8029_v8 = vpop.f32.mrf.mxu2 }
 0xb28   : > { %v8038_v46 = vpop.f32.mrf.mxu0  ;;  %1152 = vperm.xlu0 %5045, %v1086_v39   ;;  %1147 = vperm.xlu1 %5046, %v1085_v17   ;;  %v1087_v39 = vmul.f32 %v7862_v34, %v8047_v16  ;;  %v8070_v34 = vld [vmem:[%s8730_s12 + $0x78] sm:$0xff]  ;;  %v8080_v41 = vpop.xlane.xlu1 %2966 }
 0xb29   : > { %9194 = vst [vmem:[#allocation60_spill] sm:$0xff] %v8070_v34  ;;  %v1089_v24 = vmul.f32 %v7702_v55, %v8070_v34 }
 0xb2a   : > { %1097 = vperm.xlu2 %5047, %v1075_v3   ;;  %v1088_v3 = vmul.f32 %v1070_v43, %v8052_v25  ;;  %9195 = vst [vmem:[#allocation88_spill] sm:$0xff] %v8080_v41 }
 0xb2b   : > { %4951 = vmatmul.msk.f32.gmra.mxu2 %vm920_vm3, %v7700_v18  ;;  %v8062_v18 = vld [vmem:[%s8730_s12 + $0x28] sm:$0xff] }
 0xb2c   : > { %v1079_v9 = vmul.f32 %v1043_v36, %v8062_v18  ;;  %v2032_v36 = vmul.f32 %v7710_v50, %v8034_v20  ;;  %v2034_v50 = vmul.f32 %v7719_v26, %v7750_v32  ;;  %v2036_v26 = vmul.f32 %v7730_v51, %v8062_v18 }
 0xb2d   : > { %v1985_v5 = vpop.xlane.xlu2 %1984 }
 0xb2e   : > { %v8057_v17 = vpop.f32.mrf.mxu2  ;;  %v2031_v55 = vmul.f32 %v1985_v5, %v7950_v27  ;;  %v2033_v5 = vmul.f32 %v7891_v11, %v7741_v57 }
 0xb30   : > { %v8065_v52 = vpop.f32.mrf.mxu0  ;;  %1157 = vperm.xlu1 %5046, %v1087_v39   ;;  %1162 = vperm.xlu0 %5045, %v1088_v3   ;;  %v8099_v41 = vpop.xlane.xlu1 %2975 }
 0xb31   : > { %9196 = vst [vmem:[#allocation47_spill] sm:$0xff] %v8099_v41 }
 0xb32   : > { %1117 = vperm.xlu2 %5047, %v1079_v9   ;;  %v2039_v9 = vmul.f32 %v7921_v28, %v7985_v12  ;;  %v2046_v28 = vmul.f32 %v7767_v23, %v8070_v34  ;;  %v5225_v23 = vld [vmem:[%s8724_s6 + $0x8] sm:$0xff] }
 0xb33   : > { %4952 = vmatmul.msk.f32.gmra.mxu2 %vm920_vm3, %v7954_v6 }
 0xb35   : > { %v8074_v43 = vpop.xlane.xlu2 %2945 }
 0xb36   : > { %v8082_v39 = vpop.f32.mrf.mxu2 }
 0xb38   : > { %v8086_v3 = vpop.f32.mrf.mxu0  ;;  %1167 = vperm.xlu1 %5046, %v1089_v24   ;;  %2054 = vperm.xlu0 %5045, %v2032_v36  }
 0xb3a   : > { %2089 = vperm.xlu2 %5047, %v2039_v9  }
 0xb3b   : > { %4953 = vmatmul.msk.f32.gmra.mxu2 %vm920_vm3, %v7717_v40 }
 0xb3d   : > { %v8090_v6 = vpop.xlane.xlu2 %2954 }
 0xb3e   : > { %v8095_v48 = vpop.f32.mrf.mxu2 }
 0xb40   : > { %v3847_v24 = vpop.f32.mrf.mxu0  ;;  %2064 = vperm.xlu0 %5045, %v2034_v50   ;;  %2049 = vperm.xlu1 %5046, %v2031_v55   ;;  %v2987_v50 = vmul.f32 %v7769_v0, %v8034_v20 }
 0xb41   : > { %v3854_v40 = vmul.f32 %v5225_v23, %v3847_v24 }
 0xb42   : > { %2124 = vperm.xlu2 %5047, %v2046_v28   ;;  %v5226_v28 = vld [vmem:[%s8724_s6 + $0x18] sm:$0xff] }
 0xb43   : > { %4954 = vmatmul.msk.f32.gmra.mxu2 %vm920_vm3, %v7728_v47  ;;  %v8117_v47 = vpop.xlane.xlu1 %2984  ;;  %v3864_v11 = vsel %vm991_vm4, %v3854_v40, 0.0  ;;  %v5227_v40 = vld [vmem:[%s8724_s6] sm:$0xff] }
 0xb44   : > { %9197 = vst [vmem:[#allocation13_spill] sm:$0xff] %v8117_v47 }
 0xb45   : > { %v8103_v36 = vpop.xlane.xlu2 %2963 }
 0xb46   : > { %v3824_v9 = vpop.f32.mrf.mxu2 }
 0xb48   : > { %v3850_v55 = vpop.f32.mrf.mxu0  ;;  %2074 = vperm.xlu0 %5045, %v2036_v26   ;;  %2059 = vperm.xlu1 %5046, %v2033_v5   ;;  %v2038_v26 = vmul.f32 %v7736_v37, %v7980_v29  ;;  %v2035_v5 = vmul.f32 %v7905_v35, %v7962_v7 }
 0xb49   : > { %v3856_v51 = vmul.f32 %v5226_v28, %v3850_v55  ;;  %v5228_v28 = vld [vmem:[%s8724_s6 + $0x10] sm:$0xff] }
 0xb4a   : > { %3009 = vperm.xlu2 %5047, %v2987_v50   ;;  %v3853_v50 = vmul.f32 %v5227_v40, %v3824_v9  ;;  %v2037_v40 = vmul.f32 %v7911_v38, %v7761_v58 }
 0xb4b   : > { %v3865_v34 = vsel %vm991_vm4, %v3856_v51, 0.0  ;;  %4955 = vmatmul.msk.f32.gmra.mxu2 %vm920_vm3, %v7967_v31  ;;  %v2990_v51 = vmul.f32 %v7771_v53, %v7962_v7  ;;  %v8137_v35 = vpop.xlane.xlu1 %3900 }
 0xb4c   : > { %v3866_v24 = vadd.f32 %v3865_v34, %v3864_v11 }
 0xb4d   : > { %v8123_v0 = vpop.xlane.xlu2 %2972 }
 0xb4e   : > { %v3867_v23 = vrot.slane %v3866_v24, 4  ;;  %v3827_v55 = vpop.f32.mrf.mxu2 }
 0xb4f   : > { %v3855_v34 = vmul.f32 %v5228_v28, %v3827_v55  ;;  %v2041_v55 = vmul.f32 %v7933_v22, %v8004_v4  ;;  %v2040_v22 = vmul.f32 %v7745_v15, %v7997_v56 }
 0xb50   : > { %v3868_v11 = vadd.f32 %v3867_v23, %v3866_v24  ;;  %2084 = vperm.xlu0 %5045, %v2038_v26   ;;  %2069 = vperm.xlu1 %5046, %v2035_v5   ;;  %v2993_v26 = vmul.f32 %v7773_v62, %v7980_v29  ;;  %v2043_v62 = vmul.f32 %v7945_v14, %v8017_v45 }
 0xb51   : > { %v3857_v37 = vadd.f32 %v3855_v34, %v3853_v50 }
 0xb52   : > { %v3869_v31 = vrot.slane %v3868_v11, 2  ;;  %3024 = vperm.xlu2 %5047, %v2990_v51  }
 0xb53   : > { %v3858_v20 = vrot.slane %v3857_v37, 4  ;;  %v8147_v50 = vpop.xlane.xlu1 %3909 }
 0xb54   : > { %v3870_v47 = vadd.f32 %v3869_v31, %v3868_v11 }
 0xb55   : > { %v3859_v41 = vadd.f32 %v3858_v20, %v3857_v37  ;;  %v8139_v9 = vpop.xlane.xlu2 %2981 }
 0xb56   : > { %v3871_v53 = vrot.slane %v3870_v47, 1 }
 0xb57   : > { %v3860_v24 = vrot.slane %v3859_v41, 2 }
 0xb58   : > { %v3872_v5 = vadd.f32 %v3871_v53, %v3870_v47  ;;  %2099 = vperm.xlu0 %5045, %v2041_v55   ;;  %2079 = vperm.xlu1 %5046, %v2037_v40   ;;  %v2045_v55 = vmul.f32 %v7971_v42, %v8052_v25 }
 0xb59   : > { %v3861_v23 = vadd.f32 %v3860_v24, %v3859_v41 }
 0xb5a   : > { %v3874_v20 = vadd.f32 %v3872_v5, %v5791_v60  ;;  %3039 = vperm.xlu2 %5047, %v2993_v26   ;;  %v2996_v60 = vmul.f32 %v7775_v13, %v8004_v4  ;;  %v2044_v5 = vmul.f32 %v7765_v61, %v8047_v16  ;;  %v2988_v61 = vmul.f32 %v8074_v43, %v7741_v57 }
 0xb5b   : > { %v3862_v31 = vrot.slane %v3861_v23, 1  ;;  %v8162_v40 = vpop.xlane.xlu1 %3918 }
 0xb5c   : > { %v3876_v28 = vperm.slane %v3874_v20, 0 }
 0xb5d   : > { %v3863_v38 = vadd.f32 %v3862_v31, %v3861_v23  ;;  %v8150_v34 = vpop.xlane.xlu2 %3894  ;;  %v3943_v23 = vmul.f32 %v8137_v35, %v7741_v57  ;;  %v2992_v57 = vmul.f32 %v8042_v63, %v7761_v58  ;;  %v9204_v63 = vld [vmem:[#allocation88_spill] sm:$0xff] }
 0xb5e   : > { %v3884_v47 = vsub.f32 %v3876_v28, %v8086_v3  ;;  %v3882_v41 = vsub.f32 %v3876_v28, %v8065_v52  ;;  %v3880_v11 = vsub.f32 %v3876_v28, %v8038_v46  ;;  %v3878_v15 = vsub.f32 %v3876_v28, %v8010_v30 }
 0xb5f   : > { %v3873_v51 = vadd.f32 %v3863_v38, %v5789_v2  ;;  %v2042_v46 = vmul.f32 %v7756_v1, %v8024_v54  ;;  %v2989_v28 = vmul.f32 %v8012_v44, %v7750_v32 }
 0xb60   : > { %5096 = vtanh.f32 %v3884_v47  ;;  %2109 = vperm.xlu0 %5045, %v2043_v62   ;;  %2094 = vperm.xlu1 %5046, %v2040_v22   ;;  %v9198_v22 = vld [vmem:[#allocation49_spill] sm:$0xff]  ;;  %v9199_v62 = vld [vmem:[#allocation82_spill] sm:$0xff]  ;;  %v9200_v47 = vld [vmem:[#allocation32_spill] sm:$0xff] }
 0xb61   : > { %v3875_v37 = vperm.slane %v3873_v51, 0  ;;  %5098 = vtanh.f32 %v3882_v41 }
 0xb62   : > { %3054 = vperm.xlu2 %5047, %v2996_v60   ;;  %5100 = vtanh.f32 %v3880_v11  ;;  %v2991_v60 = vmul.f32 %v8090_v6, %v8062_v18 }
 0xb63   : > { %v3883_v14 = vsub.f32 %v3875_v37, %v8095_v48  ;;  %v3881_v52 = vsub.f32 %v3875_v37, %v8082_v39  ;;  %v3879_v13 = vsub.f32 %v3875_v37, %v8057_v17  ;;  %v3877_v48 = vsub.f32 %v3875_v37, %v8029_v8  ;;  %v8178_v53 = vpop.xlane.xlu1 %3927  ;;  %v9202_v37 = vld [vmem:[#allocation86_spill] sm:$0xff] }
 0xb64   : > { %v2999_v39 = vmul.f32 %v7777_v10, %v8047_v16  ;;  %v2986_v10 = vmul.f32 %v7990_v59, %v7950_v27 }
 0xb65   : > { %5102 = vtanh.f32 %v3883_v14  ;;  %v8167_v2 = vpop.xlane.xlu2 %3903  ;;  %v9203_v14 = vld [vmem:[#allocation44_spill] sm:$0xff] }
 0xb66   : > { %v5097_v3 = vpop.eup %5096  ;;  %5104 = vtanh.f32 %v3878_v15 }
 0xb67   : > { %4973 = vmatpush.msk.msra.mxu3 %vm927_vm1, %v5097_v3  ;;  %5106 = vtanh.f32 %v3881_v52  ;;  %v5099_v30 = vpop.eup %5098  ;;  %v2995_v3 = vmul.f32 %v9204_v63, %v7997_v56 }
 0xb68   : > { %2119 = vperm.xlu0 %5045, %v2045_v55   ;;  %2104 = vperm.xlu1 %5046, %v2042_v46   ;;  %5108 = vtanh.f32 %v3879_v13  ;;  %v5101_v17 = vpop.eup %5100 }
 0xb69   : > { %4234 = vmatpush.msra.mxu3 %v5099_v30  ;;  %5110 = vtanh.f32 %v3877_v48  ;;  %v9205_v48 = vld [vmem:[#allocation64_spill] sm:$0xff]  ;;  %v9206_v30 = vld [vmem:[#allocation89_spill] sm:$0xff] }
 0xb6a   : > { %3069 = vperm.xlu2 %5047, %v2999_v39   ;;  %v9207_v39 = vld [vmem:[#allocation65_spill] sm:$0xff] }
 0xb6b   : > { %v5103_v1 = vpop.eup %5102  ;;  %4235 = vmatpush.msra.mxu3 %v5101_v17  ;;  %v8189_v31 = vpop.xlane.xlu1 %3936  ;;  %v9208_v17 = vld [vmem:[#allocation90_spill] sm:$0xff] }
 0xb6c   : > { %v5105_v42 = vpop.eup %5104  ;;  %4956 = vmatpush.msk.msrb.mxu0 %vm927_vm1, %v5103_v1  ;;  %v1609_v1 = vadd.f32 %v9208_v17, %v9207_v39  ;;  %v9228_v17 = vld [vmem:[#allocation69_spill] sm:$0xff] }
 0xb6d   : > { %v5107_v24 = vpop.eup %5106  ;;  %4236 = vmatpush.msra.mxu3 %v5105_v42  ;;  %v3913_v8 = vpop.xlane.xlu2 %3912  ;;  %v9209_v42 = vld [vmem:[#allocation48_spill] sm:$0xff] }
 0xb6e   : > { %4169 = vmatpush.msrb.mxu0 %v5107_v24  ;;  %4974 = vmatmul.msk.f32.vlgmr.msra.gmra.mxu3 %vm920_vm3, %v7887_v49  ;;  %v5109_v26 = vpop.eup %5108  ;;  %v3947_v35 = vmul.f32 %v3913_v8, %v7761_v58  ;;  %v2994_v58 = vmul.f32 %v8103_v36, %v7985_v12  ;;  %v1606_v36 = vadd.f32 %v9206_v30, %v9205_v48  ;;  %v9227_v48 = vld [vmem:[#allocation13_spill] sm:$0xff] }
 0xb6f   : > { %v5111_v20 = vpop.eup %5110 }
 0xb70   : > { %4170 = vmatpush.msrb.mxu0 %v5109_v26  ;;  %3004 = vperm.xlu0 %5045, %v2986_v10  }
 0xb71   : > { %2114 = vperm.xlu1 %5046, %v2044_v5  }
 0xb72   : > { %4171 = vmatpush.msrb.mxu0 %v5111_v20  ;;  %3969 = vperm.xlu2 %5047, %v3943_v23   ;;  %v9211_v23 = vld [vmem:[#allocation50_spill] sm:$0xff]  ;;  %v9212_v20 = vld [vmem:[#allocation83_spill] sm:$0xff] }
 0xb73   : > { %4957 = vmatmul.msk.f32.vlgmr.msrb.gmra.mxu0 %vm920_vm3, %v7887_v49  ;;  %v1585_v49 = vadd.f32 %v9199_v62, %v9198_v22  ;;  %v9215_v22 = vld [vmem:[#allocation47_spill] sm:$0xff] }
 0xb74   : > { %v2998_v62 = vmul.f32 %v9215_v22, %v8017_v45  ;;  %v3941_v22 = vmul.f32 %v8150_v34, %v7950_v27 }
 0xb75   : > { %v3922_v59 = vpop.xlane.xlu2 %3921 }
 0xb76   : > { %4975 = vmatmul.msk.f32.gmra.mxu3 %vm920_vm3, %v7603_v19  ;;  %v3950_v43 = vmul.f32 %v3922_v59, %v7997_v56  ;;  %v9210_v56 = vld [vmem:[#allocation71_spill] sm:$0xff]  ;;  %v1588_v59 = vadd.f32 %v9212_v20, %v9211_v23 }
 0xb78   : > { %3019 = vperm.xlu0 %5045, %v2989_v28   ;;  %v2997_v28 = vmul.f32 %v8123_v0, %v8024_v54 }
 0xb79   : > { %3014 = vperm.xlu1 %5046, %v2988_v61   ;;  %v9213_v61 = vld [vmem:[#allocation34_spill] sm:$0xff] }
 0xb7a   : > { %v1093_v38 = vpop.permute.xlu1 %1092  ;;  %3989 = vperm.xlu2 %5047, %v3947_v35  }
 0xb7b   : > { %v1239_v41 = vadd.f32 %v9200_v47, %v1093_v38  ;;  %4958 = vmatmul.msk.f32.gmra.mxu0 %vm920_vm3, %v7603_v19  ;;  %v9201_v19 = vld [vmem:[#allocation57_spill] sm:$0xff]  ;;  %v9214_v38 = vld [vmem:[#allocation12_spill] sm:$0xff] }
 0xb7c   : > { %v1597_v15 = vadd.f32 %v9202_v37, %v9201_v19  ;;  %v9222_v37 = vld [vmem:[#allocation75_spill] sm:$0xff] }
 0xb7d   : > { %v1632_v44 = vadd.f32 %v1585_v49, %v1239_v41  ;;  %v3931_v51 = vpop.xlane.xlu2 %3930 }
 0xb7e   : > { %4976 = vmatmul.msk.f32.gmra.mxu3 %vm920_vm3, %v7618_v21  ;;  %v3953_v46 = vmul.f32 %v3931_v51, %v8017_v45  ;;  %v9218_v51 = vld [vmem:[#allocation91_spill] sm:$0xff] }
 0xb7f   : > { %1648 = vst.msk [vmem:[%s7797_s24] sm:$0xff] %vm920_vm3, %v1632_v44  ;;  %v9217_v44 = vld [vmem:[#allocation66_spill] sm:$0xff]  ;;  %v9219_v45 = vld [vmem:[#allocation67_spill] sm:$0xff] }
 0xb80   : > { %3029 = vperm.xlu0 %5045, %v2991_v60   ;;  %v1612_v60 = vadd.f32 %v9218_v51, %v9217_v44  ;;  %v9240_v51 = vld [vmem:[#allocation72_spill] sm:$0xff] }
 0xb81   : > { %3034 = vperm.xlu1 %5046, %v2992_v57   ;;  %v9220_v57 = vld [vmem:[#allocation92_spill] sm:$0xff] }
 0xb82   : > { %v1113_v11 = vpop.permute.xlu1 %1112  ;;  %4004 = vperm.xlu2 %5047, %v3950_v43   ;;  %v1615_v43 = vadd.f32 %v9220_v57, %v9219_v45  ;;  %v9242_v57 = vld [vmem:[#allocation74_spill] sm:$0xff] }
 0xb83   : > { %v1251_v6 = vadd.f32 %v9203_v14, %v1113_v11  ;;  %4959 = vmatmul.msk.f32.gmra.mxu0 %vm920_vm3, %v7618_v21  ;;  %v9221_v11 = vld [vmem:[#allocation73_spill] sm:$0xff] }
 0xb85   : > { %v1636_v52 = vadd.f32 %v1597_v15, %v1251_v6  ;;  %v3940_v13 = vpop.xlane.xlu2 %3939 }
 0xb86   : > { %4977 = vmatmul.msk.f32.gmra.mxu3 %vm920_vm3, %v7915_v33 }
 0xb87   : > { %1652 = vst.msk [vmem:[%s7797_s24 + $0x20] sm:$0xff] %vm920_vm3, %v1636_v52 }
 0xb88   : > { %3044 = vperm.xlu0 %5045, %v2994_v58   ;;  %v9224_v58 = vld [vmem:[#allocation87_spill] sm:$0xff] }
 0xb89   : > { %3049 = vperm.xlu1 %5046, %v2995_v3   ;;  %v3000_v3 = vmul.f32 %v8139_v9, %v8052_v25 }
 0xb8a   : > { %v1128_v55 = vpop.permute.xlu1 %1127  ;;  %v1133_v21 = vpop.permute.xlu0 %1132  ;;  %4019 = vperm.xlu2 %5047, %v3953_v46   ;;  %v9225_v46 = vld [vmem:[#allocation46_spill] sm:$0xff] }
 0xb8b   : > { %v1260_v24 = vadd.f32 %v9209_v42, %v1128_v55  ;;  %v1263_v8 = vadd.f32 %v9210_v56, %v1133_v21  ;;  %4960 = vmatmul.msk.f32.gmra.mxu0 %vm920_vm3, %v7915_v33  ;;  %v9216_v33 = vld [vmem:[#allocation60_spill] sm:$0xff]  ;;  %v9226_v21 = vld [vmem:[#allocation3_spill] sm:$0xff]  ;;  %v9231_v56 = vld [vmem:[#allocation94_spill] sm:$0xff] }
 0xb8c   : > { %v3956_v49 = vmul.f32 %v3940_v13, %v9216_v33  ;;  %v9223_v13 = vld [vmem:[#allocation58_spill] sm:$0xff]  ;;  %v3001_v30 = vmul.f32 %v9227_v48, %v9216_v33 }
 0xb8d   : > { %v1639_v10 = vadd.f32 %v1606_v36, %v1260_v24  ;;  %v1640_v26 = vadd.f32 %v1609_v1, %v1263_v8  ;;  %v1098_v5 = vpop.permute.xlu2 %1097  ;;  %v1600_v63 = vadd.f32 %v9224_v58, %v9223_v13  ;;  %v9229_v1 = vld [vmem:[#allocation93_spill] sm:$0xff]  ;;  %v9230_v24 = vld [vmem:[#allocation70_spill] sm:$0xff]  ;;  %v3944_v58 = vmul.f32 %v8167_v2, %v7750_v32 }
 0xb8e   : > { %v1242_v35 = vadd.f32 %v9213_v61, %v1098_v5  ;;  %4978 = vmatmul.msk.f32.gmra.mxu3 %vm920_vm3, %v9214_v38  ;;  %v1618_v42 = vadd.f32 %v9229_v1, %v9228_v17  ;;  %v1621_v8 = vadd.f32 %v9231_v56, %v9230_v24  ;;  %v9233_v5 = vld [vmem:[#allocation77_spill] sm:$0xff]  ;;  %v9251_v2 = vld [vmem:[#allocation38_spill] sm:$0xff]  ;;  %v9255_v56 = vld [vmem:[#allocation124_spill] sm:$0xff] }
 0xb8f   : > { %1655 = vst.msk [vmem:[%s7797_s24 + $0x38] sm:$0xff] %vm920_vm3, %v1639_v10  ;;  %v9232_v10 = vld [vmem:[#allocation78_spill] sm:$0xff]  ;;  %v9234_v61 = vld [vmem:[#allocation117_spill] sm:$0xff] }
 0xb90   : > { %1656 = vst.msk [vmem:[%s7797_s24 + $0x40] sm:$0xff] %vm920_vm3, %v1640_v26  ;;  %v1633_v47 = vadd.f32 %v1588_v59, %v1242_v35  ;;  %3059 = vperm.xlu0 %5045, %v2997_v28   ;;  %v9235_v35 = vld [vmem:[#allocation132_spill] sm:$0xff]  ;;  %v9253_v1 = vld [vmem:[#allocation81_spill] sm:$0xff] }
 0xb91   : > { %3064 = vperm.xlu1 %5046, %v2998_v62   ;;  %v9236_v62 = vld [vmem:[#allocation14_spill] sm:$0xff] }
 0xb92   : > { %1649 = vst.msk [vmem:[%s7797_s24 + $0x8] sm:$0xff] %vm920_vm3, %v1633_v47  ;;  %v1138_v0 = vpop.permute.xlu1 %1137  ;;  %v1143_v41 = vpop.permute.xlu0 %1142  ;;  %4034 = vperm.xlu2 %5047, %v3956_v49   ;;  %v9237_v49 = vld [vmem:[#allocation51_spill] sm:$0xff]  ;;  %v9238_v47 = vld [vmem:[#allocation42_spill] sm:$0xff] }
 0xb93   : > { %v1266_v19 = vadd.f32 %v9221_v11, %v1138_v0  ;;  %v1269_v15 = vadd.f32 %v9222_v37, %v1143_v41  ;;  %4961 = vmatmul.msk.f32.gmra.mxu0 %vm920_vm3, %v9214_v38  ;;  %v2563_v38 = vadd.f32 %v9235_v35, %v9234_v61  ;;  %v9239_v0 = vld [vmem:[#allocation2_spill] sm:$0xff]  ;;  %v3946_v61 = vmul.f32 %v8147_v50, %v8062_v18 }
 0xb94   : > { %v3942_v41 = vmul.f32 %v9239_v0, %v9238_v47  ;;  %v9262_v0 = vld [vmem:[#allocation45_spill] sm:$0xff] }
 0xb95   : > { %v1641_v14 = vadd.f32 %v1612_v60, %v1266_v19  ;;  %v1642_v6 = vadd.f32 %v1615_v43, %v1269_v15  ;;  %v1118_v52 = vpop.permute.xlu2 %1117  ;;  %v9241_v60 = vld [vmem:[#allocation95_spill] sm:$0xff]  ;;  %v9243_v43 = vld [vmem:[#allocation96_spill] sm:$0xff] }
 0xb96   : > { %v1254_v55 = vadd.f32 %v9225_v46, %v1118_v52  ;;  %4979 = vmatmul.msk.f32.gmra.mxu3 %vm920_vm3, %v9226_v21  ;;  %v1624_v45 = vadd.f32 %v9241_v60, %v9240_v51  ;;  %v1627_v11 = vadd.f32 %v9243_v43, %v9242_v57  ;;  %v9244_v19 = vld [vmem:[#allocation79_spill] sm:$0xff]  ;;  %v9245_v15 = vld [vmem:[#allocation80_spill] sm:$0xff] }
 0xb97   : > { %1657 = vst.msk [vmem:[%s7797_s24 + $0x48] sm:$0xff] %vm920_vm3, %v1641_v14  ;;  %v9266_v51 = vld [vmem:[#allocation111_spill] sm:$0xff] }
 0xb98   : > { %1658 = vst.msk [vmem:[%s7797_s24 + $0x50] sm:$0xff] %vm920_vm3, %v1642_v6  ;;  %v1637_v36 = vadd.f32 %v1600_v63, %v1254_v55  ;;  %3074 = vperm.xlu0 %5045, %v3000_v3   ;;  %v9246_v63 = vld [vmem:[#allocation4_spill] sm:$0xff]  ;;  %v9247_v3 = vld [vmem:[#allocation165_spill] sm:$0xff]  ;;  %v9248_v55 = vld [vmem:[#allocation63_spill] sm:$0xff] }
 0xb99   : > { %3079 = vperm.xlu1 %5046, %v3001_v30   ;;  %v3945_v46 = vmul.f32 %v9247_v3, %v7962_v7 }
 0xb9a   : > { %1653 = vst.msk [vmem:[%s7797_s24 + $0x28] sm:$0xff] %vm920_vm3, %v1637_v36  ;;  %v1153_v39 = vpop.permute.xlu0 %1152  ;;  %v1148_v9 = vpop.permute.xlu1 %1147  ;;  %v9249_v36 = vld [vmem:[#allocation76_spill] sm:$0xff] }
 0xb9b   : > { %v1275_v26 = vadd.f32 %v9232_v10, %v1153_v39  ;;  %v1272_v23 = vadd.f32 %v9233_v5, %v1148_v9  ;;  %4962 = vmatmul.msk.f32.gmra.mxu0 %vm920_vm3, %v9226_v21  ;;  %v9250_v39 = vld [vmem:[#allocation97_spill] sm:$0xff] }
 0xb9c   : > { %v1630_v32 = vadd.f32 %v9250_v39, %v9249_v36  ;;  %v9252_v9 = vld [vmem:[#allocation125_spill] sm:$0xff] }
 0xb9d   : > { %v1644_v20 = vadd.f32 %v1621_v8, %v1275_v26  ;;  %v1643_v59 = vadd.f32 %v1618_v42, %v1272_v23  ;;  %v2090_v28 = vpop.permute.xlu2 %2089  ;;  %v2542_v17 = vadd.f32 %v9252_v9, %v9251_v2  ;;  %v9254_v42 = vld [vmem:[#allocation106_spill] sm:$0xff]  ;;  %v9256_v8 = vld [vmem:[#allocation141_spill] sm:$0xff]  ;;  %v9277_v9 = vld [vmem:[#allocation168_spill] sm:$0xff] }
 0xb9e   : > { %v2217_v33 = vadd.f32 %v9236_v62, %v2090_v28  ;;  %4980 = vmatmul.msk.f32.gmra.mxu3 %vm920_vm3, %v9237_v49  ;;  %v2584_v10 = vadd.f32 %v9256_v8, %v9255_v56  ;;  %v9260_v62 = vld [vmem:[#allocation6_spill] sm:$0xff]  ;;  %v9279_v56 = vld [vmem:[#allocation52_spill] sm:$0xff] }
 0xb9f   : > { %1660 = vst.msk [vmem:[%s7797_s24 + $0x60] sm:$0xff] %vm920_vm3, %v1644_v20  ;;  %v9257_v20 = vld [vmem:[#allocation17_spill] sm:$0xff]  ;;  %v9276_v2 = vld [vmem:[#allocation22_spill] sm:$0xff]  ;;  %v9280_v8 = vld [vmem:[#allocation128_spill] sm:$0xff] }
 0xba0   : > { %1659 = vst.msk [vmem:[%s7797_s24 + $0x58] sm:$0xff] %vm920_vm3, %v1643_v59  ;;  %v2594_v44 = vadd.f32 %v2563_v38, %v2217_v33  ;;  %3959 = vperm.xlu0 %5045, %v3941_v22   ;;  %v9258_v59 = vld [vmem:[#allocation36_spill] sm:$0xff]  ;;  %v9261_v33 = vld [vmem:[#allocation166_spill] sm:$0xff] }
 0xba1   : > { %3964 = vperm.xlu1 %5046, %v3942_v41   ;;  %v3497_v28 = vadd.f32 %v9258_v59, %v9257_v20  ;;  %v9259_v38 = vld [vmem:[#allocation140_spill] sm:$0xff]  ;;  %v9263_v41 = vld [vmem:[#allocation30_spill] sm:$0xff]  ;;  %v9285_v59 = vld [vmem:[#allocation149_spill] sm:$0xff] }
 0xba2   : > { %4786 = vst.msk [vmem:[%s7797_s24 + $0xc0] sm:$0xff] %vm920_vm3, %v2594_v44  ;;  %v1158_v27 = vpop.permute.xlu1 %1157  ;;  %v1163_v34 = vpop.permute.xlu0 %1162  ;;  %v2539_v44 = vadd.f32 %v9263_v41, %v9262_v0  ;;  %v9290_v0 = vld [vmem:[#allocation24_spill] sm:$0xff] }
 0xba3   : > { %v1278_v37 = vadd.f32 %v9244_v19, %v1158_v27  ;;  %v1281_v14 = vadd.f32 %v9245_v15, %v1163_v34  ;;  %4963 = vmatmul.msk.f32.gmra.mxu0 %vm920_vm3, %v9237_v49  ;;  %v3948_v49 = vmul.f32 %v9261_v33, %v7980_v29  ;;  %v9264_v27 = vld [vmem:[#allocation40_spill] sm:$0xff]  ;;  %v9265_v29 = vld [vmem:[#allocation127_spill] sm:$0xff] }
 0xba4   : > { %v2548_v34 = vadd.f32 %v9265_v29, %v9264_v27  ;;  %v9268_v15 = vld [vmem:[#allocation84_spill] sm:$0xff]  ;;  %v9288_v33 = vld [vmem:[#allocation143_spill] sm:$0xff] }
 0xba5   : > { %v1645_v6 = vadd.f32 %v1624_v45, %v1278_v37  ;;  %v1646_v52 = vadd.f32 %v1627_v11, %v1281_v14  ;;  %v2125_v13 = vpop.permute.xlu2 %2124  ;;  %v9267_v45 = vld [vmem:[#allocation104_spill] sm:$0xff]  ;;  %v3949_v37 = vmul.f32 %v8162_v40, %v7985_v12  ;;  %v9269_v14 = vld [vmem:[#allocation167_spill] sm:$0xff]  ;;  %v9272_v12 = vld [vmem:[#allocation53_spill] sm:$0xff] }
 0xba6   : > { %4981 = vmatmul.msk.f32.gmra.mxu3 %vm920_vm3, %v9246_v63  ;;  %v2238_v21 = vadd.f32 %v9248_v55, %v2125_v13  ;;  %v9273_v40 = vld [vmem:[#allocation129_spill] sm:$0xff]  ;;  %v9274_v55 = vld [vmem:[#allocation115_spill] sm:$0xff] }
 0xba7   : > { %1661 = vst.msk [vmem:[%s7797_s24 + $0x68] sm:$0xff] %vm920_vm3, %v1645_v6  ;;  %v3951_v6 = vmul.f32 %v9269_v14, %v8004_v4  ;;  %v9291_v27 = vld [vmem:[#allocation107_spill] sm:$0xff] }
 0xba8   : > { %1662 = vst.msk [vmem:[%s7797_s24 + $0x70] sm:$0xff] %vm920_vm3, %v1646_v52  ;;  %3974 = vperm.xlu0 %5045, %v3944_v58   ;;  %v2601_v35 = vadd.f32 %v2584_v10, %v2238_v21  ;;  %v9270_v58 = vld [vmem:[#allocation39_spill] sm:$0xff] }
 0xba9   : > { %3979 = vperm.xlu1 %5046, %v3945_v46   ;;  %v2554_v46 = vadd.f32 %v9273_v40, %v9272_v12  ;;  %v9282_v10 = vld [vmem:[#allocation131_spill] sm:$0xff] }
 0xbaa   : > { %v1168_v48 = vpop.permute.xlu1 %1167  ;;  %v2055_v30 = vpop.permute.xlu0 %2054  ;;  %4793 = vst.msk [vmem:[%s7797_s24 + $0xf8] sm:$0xff] %vm920_vm3, %v2601_v35  ;;  %v9287_v35 = vld [vmem:[#allocation102_spill] sm:$0xff]  ;;  %v9298_v14 = vld [vmem:[#allocation155_spill] sm:$0xff] }
 0xbab   : > { %v1284_v7 = vadd.f32 %v9253_v1, %v1168_v48  ;;  %v2196_v24 = vadd.f32 %v9254_v42, %v2055_v30  ;;  %4964 = vmatmul.msk.f32.gmra.mxu0 %vm920_vm3, %v9246_v63  ;;  %v9271_v63 = vld [vmem:[#allocation126_spill] sm:$0xff]  ;;  %v9275_v48 = vld [vmem:[#allocation109_spill] sm:$0xff] }
 0xbac   : > { %v2545_v3 = vadd.f32 %v9271_v63, %v9270_v58  ;;  %v9278_v1 = vld [vmem:[#allocation101_spill] sm:$0xff] }
 0xbad   : > { %v1647_v26 = vadd.f32 %v1630_v32, %v1284_v7  ;;  %v2587_v5 = vadd.f32 %v2542_v17, %v2196_v24  ;;  %v3010_v23 = vpop.permute.xlu2 %3009  ;;  %v3952_v32 = vmul.f32 %v8178_v53, %v8024_v54  ;;  %v3954_v17 = vmul.f32 %v9277_v9, %v8047_v16  ;;  %v9281_v53 = vld [vmem:[#allocation56_spill] sm:$0xff] }
 0xbae   : > { %v3151_v22 = vadd.f32 %v9259_v38, %v3010_v23  ;;  %4982 = vmatmul.msk.f32.gmra.mxu3 %vm920_vm3, %v9260_v62  ;;  %v2551_v54 = vadd.f32 %v9280_v8, %v9279_v56  ;;  %v9284_v23 = vld [vmem:[#allocation113_spill] sm:$0xff]  ;;  %v9308_v56 = vld [vmem:[#allocation120_spill] sm:$0xff]  ;;  %v9309_v8 = vld [vmem:[#allocation135_spill] sm:$0xff] }
 0xbaf   : > { %1663 = vst.msk [vmem:[%s7797_s24 + $0x78] sm:$0xff] %vm920_vm3, %v1647_v26  ;;  %v2560_v26 = vadd.f32 %v9282_v10, %v9281_v53  ;;  %v9310_v53 = vld [vmem:[#allocation123_spill] sm:$0xff] }
 0xbb0   : > { %v3542_v47 = vadd.f32 %v3497_v28, %v3151_v22  ;;  %3984 = vperm.xlu0 %5045, %v3946_v61   ;;  %4779 = vst.msk [vmem:[%s7797_s24 + $0x88] sm:$0xff] %vm920_vm3, %v2587_v5  ;;  %v9283_v5 = vld [vmem:[#allocation35_spill] sm:$0xff]  ;;  %v9286_v28 = vld [vmem:[#allocation150_spill] sm:$0xff] }
 0xbb1   : > { %3994 = vperm.xlu1 %5046, %v3948_v49   ;;  %v3515_v61 = vadd.f32 %v9286_v28, %v9285_v59  ;;  %v9289_v49 = vld [vmem:[#allocation144_spill] sm:$0xff]  ;;  %v9311_v10 = vld [vmem:[#allocation139_spill] sm:$0xff] }
 0xbb2   : > { %4893 = vst.msk [vmem:[%s7797_s24 + $0x108] sm:$0xff] %vm920_vm3, %v3542_v47  ;;  %v2065_v18 = vpop.permute.xlu0 %2064  ;;  %v2050_v50 = vpop.permute.xlu1 %2049  ;;  %v3506_v47 = vadd.f32 %v9289_v49, %v9288_v33 }
 0xbb3   : > { %v2202_v60 = vadd.f32 %v9266_v51, %v2065_v18  ;;  %v2193_v57 = vadd.f32 %v9267_v45, %v2050_v50  ;;  %4965 = vmatmul.msk.f32.gmra.mxu0 %vm920_vm3, %v9260_v62  ;;  %v3955_v18 = vmul.f32 %v8189_v31, %v8052_v25  ;;  %v9293_v51 = vld [vmem:[#allocation130_spill] sm:$0xff]  ;;  %v9294_v45 = vld [vmem:[#allocation119_spill] sm:$0xff] }
 0xbb5   : > { %v2589_v43 = vadd.f32 %v2548_v34, %v2202_v60  ;;  %v2586_v11 = vadd.f32 %v2539_v44, %v2193_v57  ;;  %v3025_v19 = vpop.permute.xlu2 %3024  ;;  %v9292_v34 = vld [vmem:[#allocation55_spill] sm:$0xff]  ;;  %v9295_v57 = vld [vmem:[#allocation134_spill] sm:$0xff] }
 0xbb6   : > { %4983 = vmatmul.msk.f32.gmra.mxu3 %vm920_vm3, %v9268_v15  ;;  %v3160_v38 = vadd.f32 %v9287_v35, %v3025_v19  ;;  %v2557_v60 = vadd.f32 %v9293_v51, %v9292_v34  ;;  %v9322_v34 = vld [vmem:[#allocation161_spill] sm:$0xff]  ;;  %v9323_v51 = vld [vmem:[#allocation162_spill] sm:$0xff] }
 0xbb7   : > { %4781 = vst.msk [vmem:[%s7797_s24 + $0x98] sm:$0xff] %vm920_vm3, %v2589_v43  ;;  %v2569_v43 = vadd.f32 %v9295_v57, %v9294_v45 }
 0xbb8   : > { %4778 = vst.msk [vmem:[%s7797_s24 + $0x80] sm:$0xff] %vm920_vm3, %v2586_v11  ;;  %3999 = vperm.xlu0 %5045, %v3949_v37   ;;  %v3545_v44 = vadd.f32 %v3506_v47, %v3160_v38  ;;  %v9296_v11 = vld [vmem:[#allocation23_spill] sm:$0xff]  ;;  %v9297_v37 = vld [vmem:[#allocation33_spill] sm:$0xff]  ;;  %v9317_v47 = vld [vmem:[#allocation112_spill] sm:$0xff] }
 0xbb9   : > { %4009 = vperm.xlu1 %5046, %v3951_v6   ;;  %v9299_v6 = vld [vmem:[#allocation156_spill] sm:$0xff] }
 0xbba   : > { %v2075_v52 = vpop.permute.xlu0 %2074  ;;  %v2060_v13 = vpop.permute.xlu1 %2059  ;;  %4896 = vst.msk [vmem:[%s7797_s24 + $0x120] sm:$0xff] %vm920_vm3, %v3545_v44  ;;  %v9319_v44 = vld [vmem:[#allocation122_spill] sm:$0xff] }
 0xbbb   : > { %v2208_v21 = vadd.f32 %v9274_v55, %v2075_v52  ;;  %v2199_v4 = vadd.f32 %v9275_v48, %v2060_v13  ;;  %4966 = vmatmul.msk.f32.gmra.mxu0 %vm920_vm3, %v9268_v15  ;;  %v3524_v52 = vadd.f32 %v9299_v6, %v9298_v14  ;;  %v9302_v55 = vld [vmem:[#allocation133_spill] sm:$0xff]  ;;  %v9327_v6 = vld [vmem:[#allocation98_spill] sm:$0xff] }
 0xbbc   : > { %v9303_v48 = vld [vmem:[#allocation121_spill] sm:$0xff] }
 0xbbd   : > { %v2591_v30 = vadd.f32 %v2554_v46, %v2208_v21  ;;  %v2588_v36 = vadd.f32 %v2545_v3, %v2199_v4  ;;  %v3040_v39 = vpop.permute.xlu2 %3039  ;;  %v9300_v3 = vld [vmem:[#allocation41_spill] sm:$0xff]  ;;  %v9301_v46 = vld [vmem:[#allocation118_spill] sm:$0xff]  ;;  %v9304_v4 = vld [vmem:[#allocation136_spill] sm:$0xff] }
 0xbbe   : > { %4984 = vmatmul.msk.f32.gmra.mxu3 %vm920_vm3, %v9276_v2  ;;  %v3169_v7 = vadd.f32 %v9278_v1, %v3040_v39  ;;  %v2566_v21 = vadd.f32 %v9302_v55, %v9301_v46  ;;  %v9307_v1 = vld [vmem:[#allocation26_spill] sm:$0xff] }
 0xbbf   : > { %4783 = vst.msk [vmem:[%s7797_s24 + $0xa8] sm:$0xff] %vm920_vm3, %v2591_v30  ;;  %v2575_v30 = vadd.f32 %v9304_v4, %v9303_v48  ;;  %v5229_v4 = vld [vmem:[%s8729_s11] sm:$0xff] }
 0xbc0   : > { %4780 = vst.msk [vmem:[%s7797_s24 + $0x90] sm:$0xff] %vm920_vm3, %v2588_v36  ;;  %4014 = vperm.xlu0 %5045, %v3952_v32   ;;  %v3548_v50 = vadd.f32 %v3515_v61, %v3169_v7  ;;  %v9305_v36 = vld [vmem:[#allocation59_spill] sm:$0xff]  ;;  %v8439_v7 = vpop.f32.mrf.mxu2  ;;  %v9314_v61 = vld [vmem:[#allocation28_spill] sm:$0xff] }
 0xbc1   : > { %4024 = vperm.xlu1 %5046, %v3954_v17   ;;  %v9306_v32 = vld [vmem:[#allocation19_spill] sm:$0xff] }
 0xbc2   : > { %v2085_v42 = vpop.permute.xlu0 %2084  ;;  %v2070_v24 = vpop.permute.xlu1 %2069  ;;  %4899 = vst.msk [vmem:[%s7797_s24 + $0x138] sm:$0xff] %vm920_vm3, %v3548_v50  ;;  %v9318_v50 = vld [vmem:[#allocation138_spill] sm:$0xff] }
 0xbc3   : > { %v2214_v16 = vadd.f32 %v9283_v5, %v2085_v42  ;;  %v2205_v20 = vadd.f32 %v9284_v23, %v2070_v24  ;;  %4967 = vmatmul.msk.f32.gmra.mxu0 %vm920_vm3, %v9276_v2  ;;  %v9312_v5 = vld [vmem:[#allocation62_spill] sm:$0xff]  ;;  %v9313_v23 = vld [vmem:[#allocation27_spill] sm:$0xff] }
 0xbc5   : > { %v2593_v22 = vadd.f32 %v2560_v26, %v2214_v16  ;;  %v2590_v62 = vadd.f32 %v2551_v54, %v2205_v20  ;;  %v3055_v41 = vpop.permute.xlu2 %3054  ;;  %v2572_v54 = vadd.f32 %v9309_v8, %v9308_v56  ;;  %v2581_v26 = vadd.f32 %v9311_v10, %v9310_v53  ;;  %v9334_v8 = vld [vmem:[#allocation147_spill] sm:$0xff]  ;;  %v9336_v10 = vld [vmem:[#allocation100_spill] sm:$0xff] }
 0xbc6   : > { %4985 = vmatmul.msk.f32.gmra.mxu3 %vm920_vm3, %v9290_v0  ;;  %v3178_v25 = vadd.f32 %v9291_v27, %v3055_v41  ;;  %v9320_v27 = vld [vmem:[#allocation137_spill] sm:$0xff] }
 0xbc7   : > { %4785 = vst.msk [vmem:[%s7797_s24 + $0xb8] sm:$0xff] %vm920_vm3, %v2593_v22  ;;  %v9315_v22 = vld [vmem:[#allocation15_spill] sm:$0xff] }
 0xbc8   : > { %4029 = vperm.xlu0 %5045, %v3955_v18   ;;  %4782 = vst.msk [vmem:[%s7797_s24 + $0xa0] sm:$0xff] %vm920_vm3, %v2590_v62  ;;  %v3551_v63 = vadd.f32 %v3524_v52, %v3178_v25  ;;  %v9316_v62 = vld [vmem:[#allocation16_spill] sm:$0xff]  ;;  %v8457_v49 = vpop.f32.mrf.mxu2  ;;  %v2578_v25 = vadd.f32 %v9320_v27, %v9319_v44  ;;  %v9341_v44 = vld [vmem:[#allocation154_spill] sm:$0xff] }
 0xbc9   : > { %v3494_v33 = vadd.f32 %v9316_v62, %v9315_v22  ;;  %v9337_v62 = vld [vmem:[#allocation151_spill] sm:$0xff] }
 0xbca   : > { %v2100_v31 = vpop.permute.xlu0 %2099  ;;  %v2080_v29 = vpop.permute.xlu1 %2079  ;;  %4902 = vst.msk [vmem:[%s7797_s24 + $0x150] sm:$0xff] %vm920_vm3, %v3551_v63  ;;  %v9329_v63 = vld [vmem:[#allocation9_spill] sm:$0xff] }
 0xbcb   : > { %v2223_v19 = vadd.f32 %v9296_v11, %v2100_v31  ;;  %v2211_v15 = vadd.f32 %v9297_v37, %v2080_v29  ;;  %4968 = vmatmul.msk.f32.gmra.mxu0 %vm920_vm3, %v9290_v0  ;;  %v9321_v31 = vld [vmem:[#allocation61_spill] sm:$0xff] }
 0xbcc   : > { %v9325_v37 = vld [vmem:[#allocation37_spill] sm:$0xff] }
 0xbcd   : > { %v2596_v13 = vadd.f32 %v2569_v43, %v2223_v19  ;;  %v2592_v58 = vadd.f32 %v2557_v60, %v2211_v15  ;;  %v3070_v35 = vpop.permute.xlu2 %3069  ;;  %v3533_v60 = vadd.f32 %v9323_v51, %v9322_v34  ;;  %v9324_v43 = vld [vmem:[#allocation54_spill] sm:$0xff] }
 0xbce   : > { %4986 = vmatmul.msk.f32.gmra.mxu3 %vm920_vm3, %v9300_v3  ;;  %v3187_v18 = vadd.f32 %v9317_v47, %v3070_v35  ;;  %v9326_v15 = vld [vmem:[#allocation10_spill] sm:$0xff]  ;;  %v5232_v35 = vld [vmem:[%s8729_s11 + $0x18] sm:$0xff] }
 0xbcf   : > { %4788 = vst.msk [vmem:[%s7797_s24 + $0xd0] sm:$0xff] %vm920_vm3, %v2596_v13  ;;  %v3503_v14 = vadd.f32 %v9326_v15, %v9325_v37  ;;  %v9343_v15 = vld [vmem:[#allocation157_spill] sm:$0xff] }
 0xbd0   : > { %4784 = vst.msk [vmem:[%s7797_s24 + $0xb0] sm:$0xff] %vm920_vm3, %v2592_v58  ;;  %v3554_v11 = vadd.f32 %v3533_v60, %v3187_v18  ;;  %v9328_v58 = vld [vmem:[#allocation43_spill] sm:$0xff]  ;;  %v8484_v46 = vpop.f32.mrf.mxu2 }
 0xbd2   : > { %v2110_v12 = vpop.permute.xlu0 %2109  ;;  %v2095_v40 = vpop.permute.xlu1 %2094  ;;  %4905 = vst.msk [vmem:[%s7797_s24 + $0x168] sm:$0xff] %vm920_vm3, %v3554_v11  ;;  %v5234_v11 = vld [vmem:[%s8729_s11 + $0x28] sm:$0xff] }
 0xbd3   : > { %v2229_v39 = vadd.f32 %v9305_v36, %v2110_v12  ;;  %v2220_v2 = vadd.f32 %v9306_v32, %v2095_v40  ;;  %4969 = vmatmul.msk.f32.gmra.mxu0 %vm920_vm3, %v9300_v3  ;;  %v3500_v3 = vadd.f32 %v9329_v63, %v9328_v58  ;;  %v9330_v12 = vld [vmem:[#allocation142_spill] sm:$0xff]  ;;  %v9346_v63 = vld [vmem:[#allocation159_spill] sm:$0xff] }
 0xbd5   : > { %v2598_v9 = vadd.f32 %v2575_v30, %v2229_v39  ;;  %v2595_v17 = vadd.f32 %v2566_v21, %v2220_v2  ;;  %v5230_v39 = vld [vmem:[%s8729_s11 + $0x8] sm:$0xff] }
 0xbd6   : > { %4987 = vmatmul.msk.f32.gmra.mxu3 %vm920_vm3, %v9307_v1 }
 0xbd7   : > { %4790 = vst.msk [vmem:[%s7797_s24 + $0xe0] sm:$0xff] %vm920_vm3, %v2598_v9  ;;  %v9331_v9 = vld [vmem:[#allocation145_spill] sm:$0xff] }
 0xbd8   : > { %4787 = vst.msk [vmem:[%s7797_s24 + $0xc8] sm:$0xff] %vm920_vm3, %v2595_v17  ;;  %v9332_v17 = vld [vmem:[#allocation146_spill] sm:$0xff] }
 0xbda   : > { %v2120_v42 = vpop.permute.xlu0 %2119  ;;  %v2105_v24 = vpop.permute.xlu1 %2104 }
 0xbdb   : > { %v2235_v16 = vadd.f32 %v9312_v5, %v2120_v42  ;;  %v2226_v20 = vadd.f32 %v9313_v23, %v2105_v24  ;;  %4970 = vmatmul.msk.f32.gmra.mxu0 %vm920_vm3, %v9307_v1  ;;  %v3509_v1 = vadd.f32 %v9332_v17, %v9331_v9  ;;  %v9333_v24 = vld [vmem:[#allocation99_spill] sm:$0xff]  ;;  %v8503_v23 = vpop.f32.mrf.mxu2 }
 0xbdd   : > { %v2600_v59 = vadd.f32 %v2581_v26, %v2235_v16  ;;  %v2597_v28 = vadd.f32 %v2572_v54, %v2226_v20  ;;  %v9335_v54 = vld [vmem:[#allocation148_spill] sm:$0xff] }
 0xbde   : > { %4988 = vmatmul.msk.f32.gmra.mxu3 %vm920_vm3, %v9314_v61  ;;  %v3512_v53 = vadd.f32 %v9335_v54, %v9334_v8  ;;  %v9351_v8 = vld [vmem:[#allocation164_spill] sm:$0xff] }
 0xbdf   : > { %4792 = vst.msk [vmem:[%s7797_s24 + $0xf0] sm:$0xff] %vm920_vm3, %v2600_v59  ;;  %v5231_v59 = vld [vmem:[%s8729_s11 + $0x10] sm:$0xff] }
 0xbe0   : > { %4789 = vst.msk [vmem:[%s7797_s24 + $0xd8] sm:$0xff] %vm920_vm3, %v2597_v28 }
 0xbe2   : > { %v3005_v38 = vpop.permute.xlu0 %3004 }
 0xbe3   : > { %v3148_v0 = vadd.f32 %v9318_v50, %v3005_v38  ;;  %v2115_v41 = vpop.permute.xlu1 %2114  ;;  %4971 = vmatmul.msk.f32.gmra.mxu0 %vm920_vm3, %v9314_v61  ;;  %v9339_v50 = vld [vmem:[#allocation103_spill] sm:$0xff]  ;;  %v8526_v60 = vpop.f32.mrf.mxu2 }
 0xbe4   : > { %v2232_v29 = vadd.f32 %v9321_v31, %v2115_v41  ;;  %v9340_v41 = vld [vmem:[#allocation153_spill] sm:$0xff] }
 0xbe5   : > { %v3541_v45 = vadd.f32 %v3494_v33, %v3148_v0  ;;  %v9338_v33 = vld [vmem:[#allocation152_spill] sm:$0xff]  ;;  %v3521_v27 = vadd.f32 %v9341_v44, %v9340_v41 }
 0xbe6   : > { %v2599_v57 = vadd.f32 %v2578_v25, %v2232_v29  ;;  %4989 = vmatmul.msk.f32.gmra.mxu3 %vm920_vm3, %v9324_v43  ;;  %v3518_v47 = vadd.f32 %v9338_v33, %v9337_v62  ;;  %v9342_v25 = vld [vmem:[#allocation105_spill] sm:$0xff]  ;;  %v5239_v33 = vld [vmem:[%s8729_s11 + $0x50] sm:$0xff] }
 0xbe7   : > { %4892 = vst.msk [vmem:[%s7797_s24 + $0x100] sm:$0xff] %vm920_vm3, %v3541_v45  ;;  %v5233_v45 = vld [vmem:[%s8729_s11 + $0x20] sm:$0xff] }
 0xbe8   : > { %4791 = vst.msk [vmem:[%s7797_s24 + $0xe8] sm:$0xff] %vm920_vm3, %v2599_v57 }
 0xbea   : > { %v3020_v19 = vpop.permute.xlu0 %3019 }
 0xbeb   : > { %v3157_v52 = vadd.f32 %v9327_v6, %v3020_v19  ;;  %v3015_v13 = vpop.permute.xlu1 %3014  ;;  %4972 = vmatmul.msk.f32.gmra.mxu0 %vm920_vm3, %v9324_v43  ;;  %v8551_v17 = vpop.f32.mrf.mxu2 }
 0xbec   : > { %v3154_v40 = vadd.f32 %v9330_v12, %v3015_v13  ;;  %v9345_v13 = vld [vmem:[#allocation108_spill] sm:$0xff] }
 0xbed   : > { %v3544_v55 = vadd.f32 %v3503_v14, %v3157_v52  ;;  %v9344_v14 = vld [vmem:[#allocation158_spill] sm:$0xff] }
 0xbee   : > { %v3543_v21 = vadd.f32 %v3500_v3, %v3154_v40  ;;  %v3527_v6 = vadd.f32 %v9344_v14, %v9343_v15  ;;  %v9347_v3 = vld [vmem:[#allocation160_spill] sm:$0xff]  ;;  %v9348_v40 = vld [vmem:[#allocation110_spill] sm:$0xff] }
 0xbef   : > { %4895 = vst.msk [vmem:[%s7797_s24 + $0x118] sm:$0xff] %vm920_vm3, %v3544_v55  ;;  %v3530_v12 = vadd.f32 %v9347_v3, %v9346_v63  ;;  %v5245_v14 = vld [vmem:[%s8729_s11 + $0x80] sm:$0xff] }
 0xbf0   : > { %4894 = vst.msk [vmem:[%s7797_s24 + $0x110] sm:$0xff] %vm920_vm3, %v3543_v21  ;;  %v4173_v48 = vpop.f32.mrf.mxu0 }
 0xbf1   : > { %v4286_v30 = vmul.f32 %v5229_v4, %v4173_v48  ;;  %v4238_v36 = vpop.f32.mrf.mxu3 }
 0xbf2   : > { %v4287_v32 = vmul.f32 %v5230_v39, %v4238_v36  ;;  %v3030_v2 = vpop.permute.xlu0 %3029 }
 0xbf3   : > { %v3035_v42 = vpop.permute.xlu1 %3034  ;;  %v3163_v56 = vadd.f32 %v9333_v24, %v3030_v2  ;;  %4382 = vmatmul.f32.vlgmr.msra.gmra.mxu1 %v4286_v30  ;;  %v5235_v30 = vld [vmem:[%s8729_s11 + $0x30] sm:$0xff] }
 0xbf4   : > { %v3166_v26 = vadd.f32 %v9336_v10, %v3035_v42  ;;  %4990 = vmatmul.msk.f32.vlgmr.msra.gmra.mxu2 %vm991_vm4, %v4287_v32  ;;  %v5236_v32 = vld [vmem:[%s8729_s11 + $0x38] sm:$0xff]  ;;  %v9349_v42 = vld [vmem:[#allocation114_spill] sm:$0xff] }
 0xbf5   : > { %v3546_v5 = vadd.f32 %v3509_v1, %v3163_v56  ;;  %v9350_v56 = vld [vmem:[#allocation85_spill] sm:$0xff] }
 0xbf6   : > { %v3547_v16 = vadd.f32 %v3512_v53, %v3166_v26  ;;  %v3539_v54 = vadd.f32 %v9351_v8, %v9350_v56  ;;  %v9352_v53 = vld [vmem:[#allocation116_spill] sm:$0xff]  ;;  %v9353_v26 = vld [vmem:[#allocation163_spill] sm:$0xff] }
 0xbf7   : > { %4897 = vst.msk [vmem:[%s7797_s24 + $0x128] sm:$0xff] %vm920_vm3, %v3546_v5 }
 0xbf8   : > { %4898 = vst.msk [vmem:[%s7797_s24 + $0x130] sm:$0xff] %vm920_vm3, %v3547_v16  ;;  %v4176_v20 = vpop.f32.mrf.mxu0 }
 0xbf9   : > { %v4288_v28 = vmul.f32 %v5231_v59, %v4176_v20  ;;  %v4241_v61 = vpop.f32.mrf.mxu3  ;;  %v5237_v59 = vld [vmem:[%s8729_s11 + $0x40] sm:$0xff] }
 0xbfa   : > { %v4289_v38 = vmul.f32 %v5232_v35, %v4241_v61  ;;  %v3045_v22 = vpop.permute.xlu0 %3044  ;;  %v5238_v35 = vld [vmem:[%s8729_s11 + $0x48] sm:$0xff] }
 0xbfb   : > { %v3050_v18 = vpop.permute.xlu1 %3049  ;;  %v3172_v0 = vadd.f32 %v9339_v50, %v3045_v22  ;;  %4385 = vmatmul.f32.gmra.mxu1 %v4288_v28  ;;  %v8570_v22 = vpop.f32.mrf.mxu2  ;;  %v5240_v50 = vld [vmem:[%s8729_s11 + $0x58] sm:$0xff] }
 0xbfc   : > { %v3175_v31 = vadd.f32 %v9342_v25, %v3050_v18  ;;  %4991 = vmatmul.msk.f32.gmra.mxu2 %vm991_vm4, %v4289_v38 }
 0xbfd   : > { %v3549_v29 = vadd.f32 %v3518_v47, %v3172_v0 }
 0xbfe   : > { %v3550_v34 = vadd.f32 %v3521_v27, %v3175_v31  ;;  %v5241_v27 = vld [vmem:[%s8729_s11 + $0x60] sm:$0xff] }
 0xbff   : > { %4900 = vst.msk [vmem:[%s7797_s24 + $0x140] sm:$0xff] %vm920_vm3, %v3549_v29  ;;  %v5242_v29 = vld [vmem:[%s8729_s11 + $0x68] sm:$0xff] }
 0xc00   : > { %4901 = vst.msk [vmem:[%s7797_s24 + $0x148] sm:$0xff] %vm920_vm3, %v3550_v34  ;;  %v4179_v51 = vpop.f32.mrf.mxu0 }
 0xc01   : > { %v4290_v57 = vmul.f32 %v5233_v45, %v4179_v51  ;;  %v4244_v43 = vpop.f32.mrf.mxu3 }
 0xc02   : > { %v4291_v19 = vmul.f32 %v5234_v11, %v4244_v43  ;;  %v3060_v37 = vpop.permute.xlu0 %3059 }
 0xc03   : > { %v3065_v52 = vpop.permute.xlu1 %3064  ;;  %v3181_v58 = vadd.f32 %v9345_v13, %v3060_v37  ;;  %4388 = vmatmul.f32.gmra.mxu1 %v4290_v57  ;;  %v8579_v41 = vpop.f32.mrf.mxu2  ;;  %v5243_v57 = vld [vmem:[%s8729_s11 + $0x70] sm:$0xff]  ;;  %v5246_v13 = vld [vmem:[%s8729_s11 + $0x88] sm:$0xff] }
 0xc04   : > { %v3184_v55 = vadd.f32 %v9348_v40, %v3065_v52  ;;  %4992 = vmatmul.msk.f32.gmra.mxu2 %vm991_vm4, %v4291_v19  ;;  %v5244_v19 = vld [vmem:[%s8729_s11 + $0x78] sm:$0xff] }
 0xc05   : > { %v3552_v21 = vadd.f32 %v3527_v6, %v3181_v58 }
 0xc06   : > { %v3553_v48 = vadd.f32 %v3530_v12, %v3184_v55  ;;  %v5247_v12 = vld [vmem:[%s8729_s11 + $0x90] sm:$0xff] }
 0xc07   : > { %4903 = vst.msk [vmem:[%s7797_s24 + $0x158] sm:$0xff] %vm920_vm3, %v3552_v21  ;;  %v5248_v21 = vld [vmem:[%s8729_s11 + $0x98] sm:$0xff] }
 0xc08   : > { %4904 = vst.msk [vmem:[%s7797_s24 + $0x160] sm:$0xff] %vm920_vm3, %v3553_v48  ;;  %v4182_v4 = vpop.f32.mrf.mxu0 }
 0xc09   : > { %v4292_v36 = vmul.f32 %v5235_v30, %v4182_v4  ;;  %v4247_v39 = vpop.f32.mrf.mxu3 }
 0xc0a   : > { %v4293_v2 = vmul.f32 %v5236_v32, %v4247_v39  ;;  %v3075_v9 = vpop.permute.xlu0 %3074 }
 0xc0b   : > { %v3080_v1 = vpop.permute.xlu1 %3079  ;;  %v3190_v24 = vadd.f32 %v9349_v42, %v3075_v9  ;;  %4391 = vmatmul.f32.gmra.mxu1 %v4292_v36  ;;  %v8588_v45 = vpop.f32.mrf.mxu2  ;;  %v5249_v36 = vld [vmem:[%s8729_s11 + $0xa0] sm:$0xff] }
 0xc0c   : > { %v3193_v10 = vadd.f32 %v9352_v53, %v3080_v1  ;;  %4993 = vmatmul.msk.f32.gmra.mxu2 %vm991_vm4, %v4293_v2  ;;  %v5250_v2 = vld [vmem:[%s8729_s11 + $0xa8] sm:$0xff] }
 0xc0d   : > { %v3555_v5 = vadd.f32 %v9353_v26, %v3190_v24  ;;  %v5251_v24 = vld [vmem:[%s8729_s11 + $0xb0] sm:$0xff] }
 0xc0e   : > { %v3556_v16 = vadd.f32 %v3539_v54, %v3193_v10  ;;  %v5252_v54 = vld [vmem:[%s8729_s11 + $0xb8] sm:$0xff] }
 0xc0f   : > { %4906 = vst.msk [vmem:[%s7797_s24 + $0x170] sm:$0xff] %vm920_vm3, %v3555_v5  ;;  %v5253_v5 = vld [vmem:[%s8729_s11 + $0xc0] sm:$0xff] }
 0xc10   : > { %4907 = vst.msk [vmem:[%s7797_s24 + $0x178] sm:$0xff] %vm920_vm3, %v3556_v16  ;;  %v4185_v20 = vpop.f32.mrf.mxu0 }
 0xc11   : > { %v4294_v28 = vmul.f32 %v5237_v59, %v4185_v20  ;;  %v4250_v61 = vpop.f32.mrf.mxu3  ;;  %v5254_v59 = vld [vmem:[%s8729_s11 + $0xc8] sm:$0xff] }
 0xc12   : > { %v4295_v38 = vmul.f32 %v5238_v35, %v4250_v61  ;;  %v5255_v35 = vld [vmem:[%s8729_s11 + $0xd0] sm:$0xff] }
 0xc13   : > { %4394 = vmatmul.f32.gmra.mxu1 %v4294_v28  ;;  %v8603_v63 = vpop.f32.mrf.mxu2 }
 0xc14   : > { %4994 = vmatmul.msk.f32.gmra.mxu2 %vm991_vm4, %v4295_v38 }
 0xc18   : > { %v4188_v62 = vpop.f32.mrf.mxu0 }
 0xc19   : > { %v4296_v47 = vmul.f32 %v5239_v33, %v4188_v62  ;;  %v4253_v18 = vpop.f32.mrf.mxu3  ;;  %v5256_v33 = vld [vmem:[%s8729_s11 + $0xd8] sm:$0xff] }
 0xc1a   : > { %v4297_v0 = vmul.f32 %v5240_v50, %v4253_v18 }
 0xc1b   : > { %4397 = vmatmul.f32.gmra.mxu1 %v4296_v47  ;;  %v8613_v4 = vpop.f32.mrf.mxu2 }
 0xc1c   : > { %4995 = vmatmul.msk.f32.gmra.mxu2 %vm991_vm4, %v4297_v0  ;;  %v5257_v0 = vld [vmem:[%s8729_s11 + $0xe0] sm:$0xff] }
 0xc20   : > { %v4191_v44 = vpop.f32.mrf.mxu0 }
 0xc21   : > { %v4298_v25 = vmul.f32 %v5241_v27, %v4191_v44  ;;  %v4256_v31 = vpop.f32.mrf.mxu3 }
 0xc22   : > { %v4299_v34 = vmul.f32 %v5242_v29, %v4256_v31 }
 0xc23   : > { %4400 = vmatmul.f32.gmra.mxu1 %v4298_v25  ;;  %v8622_v1 = vpop.f32.mrf.mxu2  ;;  %v5258_v25 = vld [vmem:[%s8729_s11 + $0xe8] sm:$0xff] }
 0xc24   : > { %4996 = vmatmul.msk.f32.gmra.mxu2 %vm991_vm4, %v4299_v34 }
 0xc28   : > { %v4194_v51 = vpop.f32.mrf.mxu0 }
 0xc29   : > { %v4300_v43 = vmul.f32 %v5243_v57, %v4194_v51  ;;  %v4259_v11 = vpop.f32.mrf.mxu3  ;;  %v5259_v51 = vld [vmem:[%s8729_s11 + $0xf0] sm:$0xff] }
 0xc2a   : > { %v4301_v37 = vmul.f32 %v5244_v19, %v4259_v11  ;;  %v5260_v11 = vld [vmem:[%s8729_s11 + $0xf8] sm:$0xff] }
 0xc2b   : > { %4403 = vmatmul.f32.gmra.mxu1 %v4300_v43  ;;  %v8631_v26 = vpop.f32.mrf.mxu2 }
 0xc2c   : > { %4997 = vmatmul.msk.f32.gmra.mxu2 %vm991_vm4, %v4301_v37 }
 0xc30   : > { %v4197_v15 = vpop.f32.mrf.mxu0 }
 0xc31   : > { %v4302_v6 = vmul.f32 %v5245_v14, %v4197_v15  ;;  %v4262_v52 = vpop.f32.mrf.mxu3  ;;  %v3960_v14 = vpop.permute.xlu0 %3959 }
 0xc32   : > { %v4303_v58 = vmul.f32 %v5246_v13, %v4262_v52  ;;  %v4103_v52 = vadd.f32 %v8439_v7, %v3960_v14 }
 0xc33   : > { %4406 = vmatmul.f32.gmra.mxu1 %v4302_v6  ;;  %v8646_v18 = vpop.f32.mrf.mxu2 }
 0xc34   : > { %4998 = vmatmul.msk.f32.gmra.mxu2 %vm991_vm4, %v4303_v58 }
 0xc38   : > { %v4200_v3 = vpop.f32.mrf.mxu0 }
 0xc39   : > { %v4304_v40 = vmul.f32 %v5247_v12, %v4200_v3  ;;  %v4265_v55 = vpop.f32.mrf.mxu3  ;;  %v3965_v12 = vpop.permute.xlu1 %3964 }
 0xc3a   : > { %v4305_v48 = vmul.f32 %v5248_v21, %v4265_v55  ;;  %v4106_v55 = vadd.f32 %v8457_v49, %v3965_v12 }
 0xc3b   : > { %4409 = vmatmul.f32.gmra.mxu1 %v4304_v40  ;;  %v8656_v29 = vpop.f32.mrf.mxu2 }
 0xc3c   : > { %4999 = vmatmul.msk.f32.gmra.mxu2 %vm991_vm4, %v4305_v48 }
 0xc40   : > { %v4203_v30 = vpop.f32.mrf.mxu0 }
 0xc41   : > { %v4306_v39 = vmul.f32 %v5249_v36, %v4203_v30  ;;  %v4268_v32 = vpop.f32.mrf.mxu3  ;;  %v3970_v36 = vpop.permute.xlu2 %3969 }
 0xc42   : > { %v4307_v9 = vmul.f32 %v5250_v2, %v4268_v32  ;;  %v4109_v7 = vadd.f32 %v8484_v46, %v3970_v36 }
 0xc43   : > { %4412 = vmatmul.f32.gmra.mxu1 %v4306_v39  ;;  %v8665_v37 = vpop.f32.mrf.mxu2 }
 0xc44   : > { %5000 = vmatmul.msk.f32.gmra.mxu2 %vm991_vm4, %v4307_v9 }
 0xc48   : > { %v4206_v42 = vpop.f32.mrf.mxu0 }
 0xc49   : > { %v4308_v56 = vmul.f32 %v5251_v24, %v4206_v42  ;;  %v4271_v8 = vpop.f32.mrf.mxu3  ;;  %v3975_v42 = vpop.permute.xlu0 %3974 }
 0xc4a   : > { %v4309_v53 = vmul.f32 %v5252_v54, %v4271_v8  ;;  %v4112_v49 = vadd.f32 %v8503_v23, %v3975_v42 }
 0xc4b   : > { %4415 = vmatmul.f32.gmra.mxu1 %v4308_v56 }
 0xc4c   : > { %5001 = vmatmul.msk.f32.gmra.mxu2 %vm991_vm4, %v4309_v53  ;;  %v3980_v53 = vpop.permute.xlu1 %3979 }
 0xc4d   : > { %v4115_v46 = vadd.f32 %v8526_v60, %v3980_v53 }
 0xc50   : > { %v4209_v10 = vpop.f32.mrf.mxu0 }
 0xc51   : > { %v4310_v16 = vmul.f32 %v5253_v5, %v4209_v10  ;;  %v4274_v20 = vpop.f32.mrf.mxu3 }
 0xc52   : > { %v4311_v28 = vmul.f32 %v5254_v59, %v4274_v20  ;;  %v3985_v59 = vpop.permute.xlu0 %3984 }
 0xc53   : > { %4418 = vmatmul.f32.gmra.mxu1 %v4310_v16  ;;  %v4118_v23 = vadd.f32 %v8551_v17, %v3985_v59 }
 0xc54   : > { %5002 = vmatmul.msk.f32.gmra.mxu2 %vm991_vm4, %v4311_v28 }
 0xc58   : > { %v4212_v61 = vpop.f32.mrf.mxu0 }
 0xc59   : > { %v4312_v38 = vmul.f32 %v5255_v35, %v4212_v61  ;;  %v4277_v62 = vpop.f32.mrf.mxu3 }
 0xc5a   : > { %v4313_v47 = vmul.f32 %v5256_v33, %v4277_v62  ;;  %v3990_v62 = vpop.permute.xlu2 %3989 }
 0xc5b   : > { %4421 = vmatmul.f32.gmra.mxu1 %v4312_v38  ;;  %v4121_v60 = vadd.f32 %v8570_v22, %v3990_v62 }
 0xc5c   : > { %5003 = vmatmul.msk.f32.gmra.mxu2 %vm991_vm4, %v4313_v47 }
 0xc60   : > { %v4215_v50 = vpop.f32.mrf.mxu0 }
 0xc61   : > { %v4314_v44 = vmul.f32 %v5257_v0, %v4215_v50  ;;  %v4280_v27 = vpop.f32.mrf.mxu3 }
 0xc62   : > { %v4315_v31 = vmul.f32 %v5258_v25, %v4280_v27 }
 0xc63   : > { %4424 = vmatmul.f32.gmra.mxu1 %v4314_v44  ;;  %v3995_v44 = vpop.permute.xlu1 %3994 }
 0xc64   : > { %5004 = vmatmul.msk.f32.gmra.mxu2 %vm991_vm4, %v4315_v31  ;;  %v4124_v17 = vadd.f32 %v8579_v41, %v3995_v44 }
 0xc68   : > { %v4218_v34 = vpop.f32.mrf.mxu0 }
 0xc69   : > { %v4316_v57 = vmul.f32 %v5259_v51, %v4218_v34  ;;  %v4283_v43 = vpop.f32.mrf.mxu3  ;;  %v4000_v51 = vpop.permute.xlu0 %3999 }
 0xc6a   : > { %v4317_v19 = vmul.f32 %v5260_v11, %v4283_v43  ;;  %v4127_v22 = vadd.f32 %v8588_v45, %v4000_v51 }
 0xc6b   : > { %4427 = vmatmul.f32.gmra.mxu1 %v4316_v57 }
 0xc6c   : > { %5005 = vmatmul.msk.f32.gmra.mxu2 %vm991_vm4, %v4317_v19 }
 0xc70   : > { %v4383_v15 = vpop.f32.mrf.mxu1 }
 0xc77   : > { %v4448_v6 = vpop.f32.mrf.mxu2 }
 0xc78   : > { %v4449_v13 = vadd.f32 %v4448_v6, %v4383_v15  ;;  %v4386_v58 = vpop.f32.mrf.mxu1  ;;  %v4005_v15 = vpop.permute.xlu2 %4004 }
 0xc79   : > { %v4130_v41 = vadd.f32 %v8603_v63, %v4005_v15 }
 0xc7a   : > { %v4496_v3 = vadd.f32 %v4449_v13, %v4103_v52 }
 0xc7c   : > { %5006 = vst.msk [vmem:[%s7797_s24 + $0x180] sm:$0xff] %vm920_vm3, %v4496_v3 }
 0xc7f   : > { %v4451_v40 = vpop.f32.mrf.mxu2 }
 0xc80   : > { %v4452_v21 = vadd.f32 %v4451_v40, %v4386_v58  ;;  %v4389_v48 = vpop.f32.mrf.mxu1  ;;  %v4010_v58 = vpop.permute.xlu1 %4009 }
 0xc81   : > { %v4133_v45 = vadd.f32 %v8613_v4, %v4010_v58 }
 0xc82   : > { %v4497_v30 = vadd.f32 %v4452_v21, %v4106_v55  ;;  %v4015_v21 = vpop.permute.xlu0 %4014 }
 0xc83   : > { %v4136_v63 = vadd.f32 %v8622_v1, %v4015_v21 }
 0xc84   : > { %5007 = vst.msk [vmem:[%s7797_s24 + $0x188] sm:$0xff] %vm920_vm3, %v4497_v30 }
 0xc87   : > { %v4454_v39 = vpop.f32.mrf.mxu2 }
 0xc88   : > { %v4455_v32 = vadd.f32 %v4454_v39, %v4389_v48  ;;  %v4392_v2 = vpop.f32.mrf.mxu1 }
 0xc8a   : > { %v4498_v9 = vadd.f32 %v4455_v32, %v4109_v7  ;;  %v4020_v7 = vpop.permute.xlu2 %4019 }
 0xc8b   : > { %v4139_v4 = vadd.f32 %v8631_v26, %v4020_v7 }
 0xc8c   : > { %5008 = vst.msk [vmem:[%s7797_s24 + $0x190] sm:$0xff] %vm920_vm3, %v4498_v9 }
 0xc8f   : > { %v4457_v24 = vpop.f32.mrf.mxu2 }
 0xc90   : > { %v4458_v56 = vadd.f32 %v4457_v24, %v4392_v2  ;;  %v4395_v8 = vpop.f32.mrf.mxu1  ;;  %v4025_v24 = vpop.permute.xlu1 %4024 }
 0xc91   : > { %v4142_v1 = vadd.f32 %v8646_v18, %v4025_v24 }
 0xc92   : > { %v4499_v54 = vadd.f32 %v4458_v56, %v4112_v49 }
 0xc94   : > { %5009 = vst.msk [vmem:[%s7797_s24 + $0x198] sm:$0xff] %vm920_vm3, %v4499_v54  ;;  %v4030_v54 = vpop.permute.xlu0 %4029 }
 0xc95   : > { %v4145_v26 = vadd.f32 %v8656_v29, %v4030_v54 }
 0xc97   : > { %v4460_v10 = vpop.f32.mrf.mxu2 }
 0xc98   : > { %v4461_v5 = vadd.f32 %v4460_v10, %v4395_v8  ;;  %v4398_v16 = vpop.f32.mrf.mxu1 }
 0xc9a   : > { %v4500_v20 = vadd.f32 %v4461_v5, %v4115_v46 }
 0xc9c   : > { %5010 = vst.msk [vmem:[%s7797_s24 + $0x1a0] sm:$0xff] %vm920_vm3, %v4500_v20 }
 0xc9f   : > { %v4463_v28 = vpop.f32.mrf.mxu2 }
 0xca0   : > { %v4464_v61 = vadd.f32 %v4463_v28, %v4398_v16  ;;  %v4401_v35 = vpop.f32.mrf.mxu1  ;;  %v4035_v16 = vpop.permute.xlu2 %4034 }
 0xca1   : > { %v4148_v28 = vadd.f32 %v8665_v37, %v4035_v16 }
 0xca2   : > { %v4501_v38 = vadd.f32 %v4464_v61, %v4118_v23 }
 0xca4   : > { %5011 = vst.msk [vmem:[%s7797_s24 + $0x1a8] sm:$0xff] %vm920_vm3, %v4501_v38 }
 0xca7   : > { %v4466_v33 = vpop.f32.mrf.mxu2 }
 0xca8   : > { %v4467_v47 = vadd.f32 %v4466_v33, %v4401_v35  ;;  %v4404_v50 = vpop.f32.mrf.mxu1 }
 0xcaa   : > { %v4502_v0 = vadd.f32 %v4467_v47, %v4121_v60 }
 0xcac   : > { %5012 = vst.msk [vmem:[%s7797_s24 + $0x1b0] sm:$0xff] %vm920_vm3, %v4502_v0 }
 0xcaf   : > { %v4469_v27 = vpop.f32.mrf.mxu2 }
 0xcb0   : > { %v4470_v25 = vadd.f32 %v4469_v27, %v4404_v50  ;;  %v4407_v31 = vpop.f32.mrf.mxu1 }
 0xcb2   : > { %v4503_v34 = vadd.f32 %v4470_v25, %v4124_v17 }
 0xcb4   : > { %5013 = vst.msk [vmem:[%s7797_s24 + $0x1b8] sm:$0xff] %vm920_vm3, %v4503_v34 }
 0xcb7   : > { %v4472_v57 = vpop.f32.mrf.mxu2 }
 0xcb8   : > { %v4473_v43 = vadd.f32 %v4472_v57, %v4407_v31  ;;  %v4410_v11 = vpop.f32.mrf.mxu1 }
 0xcba   : > { %v4504_v19 = vadd.f32 %v4473_v43, %v4127_v22 }
 0xcbc   : > { %5014 = vst.msk [vmem:[%s7797_s24 + $0x1c0] sm:$0xff] %vm920_vm3, %v4504_v19 }
 0xcbf   : > { %v4475_v14 = vpop.f32.mrf.mxu2 }
 0xcc0   : > { %v4476_v6 = vadd.f32 %v4475_v14, %v4410_v11  ;;  %v4413_v52 = vpop.f32.mrf.mxu1 }
 0xcc2   : > { %v4505_v13 = vadd.f32 %v4476_v6, %v4130_v41 }
 0xcc4   : > { %5015 = vst.msk [vmem:[%s7797_s24 + $0x1c8] sm:$0xff] %vm920_vm3, %v4505_v13 }
 0xcc7   : > { %v4478_v3 = vpop.f32.mrf.mxu2 }
 0xcc8   : > { %v4479_v12 = vadd.f32 %v4478_v3, %v4413_v52  ;;  %v4416_v40 = vpop.f32.mrf.mxu1 }
 0xcca   : > { %v4506_v55 = vadd.f32 %v4479_v12, %v4133_v45 }
 0xccc   : > { %5016 = vst.msk [vmem:[%s7797_s24 + $0x1d0] sm:$0xff] %vm920_vm3, %v4506_v55 }
 0xccf   : > { %v4481_v48 = vpop.f32.mrf.mxu2 }
 0xcd0   : > { %v4482_v30 = vadd.f32 %v4481_v48, %v4416_v40  ;;  %v4419_v36 = vpop.f32.mrf.mxu1 }
 0xcd2   : > { %v4507_v39 = vadd.f32 %v4482_v30, %v4136_v63 }
 0xcd4   : > { %5017 = vst.msk [vmem:[%s7797_s24 + $0x1d8] sm:$0xff] %vm920_vm3, %v4507_v39 }
 0xcd7   : > { %v4484_v32 = vpop.f32.mrf.mxu2 }
 0xcd8   : > { %v4485_v2 = vadd.f32 %v4484_v32, %v4419_v36  ;;  %v4422_v42 = vpop.f32.mrf.mxu1 }
 0xcda   : > { %v4508_v9 = vadd.f32 %v4485_v2, %v4139_v4 }
 0xcdc   : > { %5018 = vst.msk [vmem:[%s7797_s24 + $0x1e0] sm:$0xff] %vm920_vm3, %v4508_v9 }
 0xcdf   : > { %v4487_v49 = vpop.f32.mrf.mxu2 }
 0xce0   : > { %v4488_v56 = vadd.f32 %v4487_v49, %v4422_v42  ;;  %v4425_v53 = vpop.f32.mrf.mxu1 }
 0xce2   : > { %v4509_v8 = vadd.f32 %v4488_v56, %v4142_v1 }
 0xce4   : > { %5019 = vst.msk [vmem:[%s7797_s24 + $0x1e8] sm:$0xff] %vm920_vm3, %v4509_v8 }
 0xce7   : > { %v4490_v10 = vpop.f32.mrf.mxu2 }
 0xce8   : > { %v4491_v46 = vadd.f32 %v4490_v10, %v4425_v53  ;;  %v4428_v20 = vpop.f32.mrf.mxu1 }
 0xcea   : > { %v4510_v5 = vadd.f32 %v4491_v46, %v4145_v26 }
 0xcec   : > { %5020 = vst.msk [vmem:[%s7797_s24 + $0x1f0] sm:$0xff] %vm920_vm3, %v4510_v5 }
 0xcef   : > { %v4493_v59 = vpop.f32.mrf.mxu2 }
 0xcf0   : > { %v4494_v18 = vadd.f32 %v4493_v59, %v4428_v20 }
 0xcf2   : > { %v4511_v23 = vadd.f32 %v4494_v18, %v4148_v28 }
 0xcf4   : > { %5021 = vst.msk [vmem:[%s7797_s24 + $0x1f8] sm:$0xff] %vm920_vm3, %v4511_v23 }
 0xcf5 PF: > { %s24_s29 = sadd.s32 1, %s5267_s29  }
 0xcf6   : > { %p21_p4 = scmp.ge.s32.totalorder %s24_s29, 4  }
 0xcf8   :  { %23 = sbr.rel (!%p21_p4) target bundleno = 1 (0x1), region = 112 }

</bundles_post_ra>
